<compile_context>
chip_gen: v5e
topology: v5e:2x2
jax: 0.10.0
libtpu: 0.0.40
codegen_flags: <defaults>
</compile_context>

<pallas_src>
import functools
import math

import jax
import jax.numpy as jnp
from jax import lax
from jax.experimental import pallas as pl
from jax.experimental.pallas import tpu as pltpu

EPSILON = 1e-20
NEG_BIG = -1e30


# ---------------------------------------------------------------------------
# Fused kernel.  grid = (batch blocks, vocab tiles); vocab axis innermost.
# ---------------------------------------------------------------------------
def fused_kernel(q_ref, f_ref, wq_ref, wk_ref, bq_ref, bk_ref,
                 gumbel_ref, qlog_ref, flog_ref,
                 val_ref, logprob_ref, act_ref,
                 sel_ref,                       # VMEM scratch (k, Bb, S, Lf) f32
                 *, scale, k, tau):
    f32 = jnp.float32
    bf16 = jnp.bfloat16
    vt = pl.program_id(1)

    bb, lq, h = q_ref.shape
    lf = f_ref.shape[1]
    s = gumbel_ref.shape[1]

    # ---- attention -> agg -> log_softmax -> gumbel soft/hard top-k ------------
    # Only on the first vocab tile of each batch block; the per-iteration one-hot
    # selections are stored in scratch and reused by the remaining vocab tiles.
    @pl.when(vt == 0)
    def _():
        # projections as single (Bb*L, H) MXU matmuls: bf16 operands, f32 accum.
        q2 = q_ref[...].reshape(bb * lq, h).astype(bf16)
        f2 = f_ref[...].reshape(bb * lf, h).astype(bf16)
        Q = (jnp.dot(q2, wq_ref[...].astype(bf16), preferred_element_type=f32)
             + bq_ref[...]).reshape(bb, lq, h)
        K = (jnp.dot(f2, wk_ref[...].astype(bf16), preferred_element_type=f32)
             + bk_ref[...]).reshape(bb, lf, h)

        # mean over heads of Q_h K_h^T / sqrt(d_h)  ==  scale * (full Q K^T)
        scores = jnp.einsum('bqh,bkh->bqk', Q, K,
                            preferred_element_type=f32) * scale        # (bb,lq,lf)
        agg = jnp.max(scores, axis=1)                                   # (bb,lf)
        m = jnp.max(agg, axis=-1, keepdims=True)
        lse = jnp.log(jnp.sum(jnp.exp(agg - m), axis=-1, keepdims=True)) + m
        logp = agg - lse                                                # (bb,lf)

        # SubsetOperator(k, hard=True): all samples of the batch block at once.
        g0 = agg[:, None, :] + gumbel_ref[...]                          # (bb,s,lf)
        inv_tau = 1.0 / tau

        def soft_body(_, carry):
            g, onehot, khot = carry
            khot_mask = jnp.maximum(1.0 - onehot, EPSILON)
            g = g + jnp.log(khot_mask)
            z = g * inv_tau
            z = z - jnp.max(z, axis=-1, keepdims=True)
            e = jnp.exp(z)                                              # EUP
            onehot = e * pl.reciprocal(jnp.sum(e, axis=-1, keepdims=True),
                                       approx=True)
            return g, onehot, khot + onehot

        _, _, khot = lax.fori_loop(
            0, k, soft_body, (g0, jnp.zeros_like(g0), jnp.zeros_like(g0)),
            unroll=True)

        # hard straight-through: peel the argmax of khot k times (lowest-lane tie
        # break keeps the mask exactly k-hot on float ties); each iteration's
        # one-hot selection is parked in scratch for the value gather.
        lane = lax.broadcasted_iota(jnp.int32, (bb, s, lf), 2)

        def hard_body(i, carry):
            work, hard = carry
            mx = jnp.max(work, axis=-1, keepdims=True)
            is_max = work >= mx
            first = jnp.min(jnp.where(is_max, lane, lf), axis=-1, keepdims=True)
            sel = lane == first
            sel_ref[i] = sel.astype(f32)
            hard = jnp.where(sel, 1.0, hard)
            work = jnp.where(sel, NEG_BIG, work)
            return work, hard

        _, action = lax.fori_loop(0, k, hard_body,
                                  (khot, jnp.zeros_like(khot)), unroll=True)

        # logprob = sum(all_logprobs * action, -1)
        logprob_ref[...] = jnp.sum(logp[:, None, :] * action, axis=-1)  # (bb,s)
        act_ref[...] = action.astype(act_ref.dtype)

    # ---- value for this vocab tile (runs for every grid step) ----------------
    # new_logits = max over the k selected f_logits rows (one-hot MXU gathers);
    # the Lf-k unselected rows contribute exact zeros in the reference's
    # f_logits * action mask, so the running max is initialized to 0.
    vt_len = val_ref.shape[-1]
    old = jnp.max(qlog_ref[...], axis=1)                                # (bb,vt)
    flog = flog_ref[...]                                                # (bb,lf,vt)

    def gather_body(i, new):
        picked = jnp.einsum('bsl,blv->bsv', sel_ref[i], flog,
                            preferred_element_type=f32,
                            precision=lax.Precision.HIGHEST)            # exact gather
        return jnp.maximum(new, picked)

    new = lax.fori_loop(0, k, gather_body,
                        jnp.zeros((bb, s, vt_len), f32), unroll=True)
    # value = log(1 + relu(old + new))
    val_ref[...] = jnp.log(1.0 + jnp.maximum(old[:, None, :] + new, 0.0))


# ---------------------------------------------------------------------------
# Wrapper
# ---------------------------------------------------------------------------
def attention_topk_head(q_embeds, f_embeds, q_logits, f_logits,
                        wq, wk, bq, bk, gumbel, *, num_heads, k=10, tau=1.0,
                        block_b=None, vocab_tile=512):
    B, Lq, H = q_embeds.shape
    _, Lf, _ = f_embeds.shape
    V = q_logits.shape[-1]
    S = gumbel.shape[0]
    d_h = H // num_heads
    scale = 1.0 / (num_heads * math.sqrt(d_h))
    f32 = jnp.float32

    # batch folding: amortize the per-grid-step overhead and feed the projection
    # matmuls Bb*Lq rows.  (largest divisor of B up to the sublane/MXU target.)
    if block_b is None:
        want = max(1, (8 + S - 1) // S, (128 + Lq - 1) // Lq)
        block_b = 1
        for d in range(1, B + 1):
            if B % d == 0 and d <= want:
                block_b = d
    assert B % block_b == 0
    Bb = block_b

    # vocab tiling: bounds the per-step q_logits/f_logits/values blocks so the
    # kernel fits v7x's 64 MiB VMEM at production V.  vocab_tile must be a
    # multiple of 128; small V uses a single full-width tile.
    Vt = V if V <= vocab_tile else vocab_tile
    nv = pl.cdiv(V, Vt)

    # gumbel arrives as [S, B, Lf] (one draw per sample); present per batch row.
    gumbel_b = jnp.transpose(gumbel, (1, 0, 2))                         # [B, S, Lf]

    values, logprobs, actions = pl.pallas_call(
        functools.partial(fused_kernel, scale=scale, k=k, tau=tau),
        grid=(B // Bb, nv),
        in_specs=[
            pl.BlockSpec((Bb, Lq, H), lambda b, v: (b, 0, 0)),   # q_embeds (f32)
            pl.BlockSpec((Bb, Lf, H), lambda b, v: (b, 0, 0)),   # f_embeds (f32)
            pl.BlockSpec((H, H), lambda b, v: (0, 0)),           # wq
            pl.BlockSpec((H, H), lambda b, v: (0, 0)),           # wk
            pl.BlockSpec((1, H), lambda b, v: (0, 0)),           # bq
            pl.BlockSpec((1, H), lambda b, v: (0, 0)),           # bk
            pl.BlockSpec((Bb, S, Lf), lambda b, v: (b, 0, 0)),   # gumbel
            pl.BlockSpec((Bb, Lq, Vt), lambda b, v: (b, 0, v)),  # q_logits
            pl.BlockSpec((Bb, Lf, Vt), lambda b, v: (b, 0, v)),  # f_logits
        ],
        out_specs=[
            pl.BlockSpec((Bb, S, Vt), lambda b, v: (b, 0, v)),   # values
            pl.BlockSpec((Bb, S), lambda b, v: (b, 0)),          # logprobs
            pl.BlockSpec((Bb, S, Lf), lambda b, v: (b, 0, 0)),   # actions (bf16)
        ],
        out_shape=(
            jax.ShapeDtypeStruct((B, S, V), f32),
            jax.ShapeDtypeStruct((B, S), f32),
            jax.ShapeDtypeStruct((B, S, Lf), jnp.bfloat16),
        ),
        scratch_shapes=[pltpu.VMEM((k, Bb, S, Lf), f32)],
        compiler_params=pltpu.CompilerParams(
            dimension_semantics=("parallel", "arbitrary"),
            vmem_limit_bytes=48 * 1024 * 1024),                  # <= v7x 64 MiB
    )(q_embeds, f_embeds, wq, wk, bq, bk, gumbel_b, q_logits, f_logits)

    # sample-major, matching the torch module's output lists:
    # values [S, B, V], logprobs [S, B], actions [S, B, Lf] ({0,1}, bf16 exact).
    values = jnp.transpose(values, (1, 0, 2))
    logprobs = jnp.transpose(logprobs, (1, 0))
    actions = jnp.transpose(actions, (1, 0, 2))
    return values, logprobs, actions


if __name__ == "__main__":
    # Small shapes consistent with the module's forward.
    B, Lq, Lf, H, V = 2, 8, 16, 32, 32
    num_heads = 4
    samples = 2
    k = 10

    key = jax.random.PRNGKey(0)
    ks = jax.random.split(key, 7)

    # "encoder outputs" (synthetic): last_hidden_state + logits for q and f sides.
    q_embeds = jax.random.normal(ks[0], (B, Lq, H), jnp.float32)
    f_embeds = jax.random.normal(ks[1], (B, Lf, H), jnp.float32)
    q_logits = jax.random.normal(ks[2], (B, Lq, V), jnp.float32)
    f_logits = jax.random.normal(ks[3], (B, Lf, V), jnp.float32)

    # CrossAttentionLayer query/key projection parameters.
    wq = jax.random.normal(ks[4], (H, H), jnp.float32) * (1.0 / math.sqrt(H))
    wk = jax.random.normal(ks[5], (H, H), jnp.float32) * (1.0 / math.sqrt(H))
    bq = jnp.zeros((1, H), jnp.float32)
    bk = jnp.zeros((1, H), jnp.float32)

    # Gumbel(0,1) noise for the SubsetOperator, one draw per sample.
    gumbel = jax.random.gumbel(ks[6], (samples, B, Lf), jnp.float32)

    values, logprobs, actions = attention_topk_head(
        q_embeds, f_embeds, q_logits, f_logits,
        wq, wk, bq, bk, gumbel, num_heads=num_heads, k=k, tau=1.0)

    jax.block_until_ready((values, logprobs, actions))

    # sanity: shapes + each action row is an exact k-hot mask.
    assert values.shape == (samples, B, V)
    assert logprobs.shape == (samples, B)
    assert actions.shape == (samples, B, Lf)
    acts = actions.astype(jnp.float32)
    assert bool(jnp.all((acts == 0.0) | (acts == 1.0)))
    assert bool(jnp.all(jnp.sum(acts, axis=-1) == k))

    print("KERNEL_OK")
</pallas_src>

<mosaic_0001>
module attributes {stable_mosaic.version = 11 : i64} {
  func.func @fused_kernel(%arg0: i32, %arg1: i32, %arg2: memref<2x8x32xf32, #tpu.memory_space<vmem>>, %arg3: memref<2x16x32xf32, #tpu.memory_space<vmem>>, %arg4: memref<32x32xf32, #tpu.memory_space<vmem>>, %arg5: memref<32x32xf32, #tpu.memory_space<vmem>>, %arg6: memref<1x32xf32, #tpu.memory_space<vmem>>, %arg7: memref<1x32xf32, #tpu.memory_space<vmem>>, %arg8: memref<2x2x16xf32, #tpu.memory_space<vmem>>, %arg9: memref<2x8x32xf32, #tpu.memory_space<vmem>>, %arg10: memref<2x16x32xf32, #tpu.memory_space<vmem>>, %arg11: memref<2x2x32xf32, #tpu.memory_space<vmem>>, %arg12: memref<2x2xf32, #tpu.memory_space<vmem>>, %arg13: memref<2x2x16xbf16, #tpu.memory_space<vmem>>, %arg14: memref<10x2x2x16xf32, #tpu.memory_space<vmem>>) attributes {dimension_semantics = [#tpu.dimension_semantics<parallel>, #tpu.dimension_semantics<arbitrary>], iteration_bounds = array<i64: 1, 1>, scalar_prefetch = 0 : i64, scratch_operands = 1 : i64, tpu.core_type = #tpu.core_type<tc>, window_params = [{transform_indices = @transform_0, window_bounds = array<i64: 2, 8, 32>}, {transform_indices = @transform_1, window_bounds = array<i64: 2, 16, 32>}, {pipeline_mode = #tpu.pipeline_mode<synchronous>, transform_indices = @transform_2, window_bounds = array<i64: 32, 32>}, {pipeline_mode = #tpu.pipeline_mode<synchronous>, transform_indices = @transform_3, window_bounds = array<i64: 32, 32>}, {pipeline_mode = #tpu.pipeline_mode<synchronous>, transform_indices = @transform_4, window_bounds = array<i64: 1, 32>}, {pipeline_mode = #tpu.pipeline_mode<synchronous>, transform_indices = @transform_5, window_bounds = array<i64: 1, 32>}, {transform_indices = @transform_6, window_bounds = array<i64: 2, 2, 16>}, {transform_indices = @transform_7, window_bounds = array<i64: 2, 8, 32>}, {transform_indices = @transform_8, window_bounds = array<i64: 2, 16, 32>}, {transform_indices = @transform_9, window_bounds = array<i64: 2, 2, 32>}, {transform_indices = @transform_10, window_bounds = array<i64: 2, 2>}, {transform_indices = @transform_11, window_bounds = array<i64: 2, 2, 16>}]} {
    %c0_i32 = arith.constant 0 : i32
    %0 = arith.cmpi eq, %arg1, %c0_i32 : i32
    %1 = arith.extui %0 : i1 to i32
    %c0_i32_0 = arith.constant 0 : i32
    %2 = arith.cmpi ne, %1, %c0_i32_0 : i32
    scf.if %2 {
      %c0_53 = arith.constant 0 : index
      %c0_54 = arith.constant 0 : index
      %c0_55 = arith.constant 0 : index
      %66 = vector.load %arg2[%c0_53, %c0_54, %c0_55] : memref<2x8x32xf32, #tpu.memory_space<vmem>>, vector<2x8x32xf32>
      %67 = vector.shape_cast %66 : vector<2x8x32xf32> to vector<16x32xf32>
      %68 = arith.truncf %67 : vector<16x32xf32> to vector<16x32xbf16>
      %c0_56 = arith.constant 0 : index
      %c0_57 = arith.constant 0 : index
      %c0_58 = arith.constant 0 : index
      %69 = vector.load %arg3[%c0_56, %c0_57, %c0_58] : memref<2x16x32xf32, #tpu.memory_space<vmem>>, vector<2x16x32xf32>
      %70 = vector.shape_cast %69 : vector<2x16x32xf32> to vector<32x32xf32>
      %71 = arith.truncf %70 : vector<32x32xf32> to vector<32x32xbf16>
      %c0_59 = arith.constant 0 : index
      %c0_60 = arith.constant 0 : index
      %72 = vector.load %arg4[%c0_59, %c0_60] : memref<32x32xf32, #tpu.memory_space<vmem>>, vector<32x32xf32>
      %73 = arith.truncf %72 : vector<32x32xf32> to vector<32x32xbf16>
      %cst_61 = arith.constant dense<0.000000e+00> : vector<16x32xf32>
      %74 = tpu.matmul %68, %73, %cst_61 {dimension_numbers = #tpu.dot_dimension_numbers<[1], [0], [0], [1], [0, 0, 1, 1], [], []>} : vector<16x32xbf16>, vector<32x32xbf16>, vector<16x32xf32> -> vector<16x32xf32>
      %c0_62 = arith.constant 0 : index
      %c0_63 = arith.constant 0 : index
      %75 = vector.load %arg6[%c0_62, %c0_63] : memref<1x32xf32, #tpu.memory_space<vmem>>, vector<1x32xf32>
      %76 = vector.broadcast %75 : vector<1x32xf32> to vector<16x32xf32>
      %77 = arith.addf %74, %76 : vector<16x32xf32>
      %78 = vector.shape_cast %77 : vector<16x32xf32> to vector<2x8x32xf32>
      %c0_64 = arith.constant 0 : index
      %c0_65 = arith.constant 0 : index
      %79 = vector.load %arg5[%c0_64, %c0_65] : memref<32x32xf32, #tpu.memory_space<vmem>>, vector<32x32xf32>
      %80 = arith.truncf %79 : vector<32x32xf32> to vector<32x32xbf16>
      %cst_66 = arith.constant dense<0.000000e+00> : vector<32x32xf32>
      %81 = tpu.matmul %71, %80, %cst_66 {dimension_numbers = #tpu.dot_dimension_numbers<[1], [0], [0], [1], [0, 0, 1, 1], [], []>} : vector<32x32xbf16>, vector<32x32xbf16>, vector<32x32xf32> -> vector<32x32xf32>
      %c0_67 = arith.constant 0 : index
      %c0_68 = arith.constant 0 : index
      %82 = vector.load %arg7[%c0_67, %c0_68] : memref<1x32xf32, #tpu.memory_space<vmem>>, vector<1x32xf32>
      %83 = vector.broadcast %82 : vector<1x32xf32> to vector<32x32xf32>
      %84 = arith.addf %81, %83 : vector<32x32xf32>
      %85 = vector.shape_cast %84 : vector<32x32xf32> to vector<2x16x32xf32>
      "tpu.trace_start"() <{level = 10 : i32, message = "bqh,bkh->bqk"}> : () -> ()
      %cst_69 = arith.constant dense<0.000000e+00> : vector<2x8x16xf32>
      %86 = tpu.matmul %78, %85, %cst_69 {dimension_numbers = #tpu.dot_dimension_numbers<[2], [2], [1], [1], [0, 0, 0, 1, 1, 1], [0], [0]>} : vector<2x8x32xf32>, vector<2x16x32xf32>, vector<2x8x16xf32> -> vector<2x8x16xf32>
      "tpu.trace_stop"() : () -> ()
      %cst_70 = arith.constant 0.0883883461 : f32
      %87 = vector.broadcast %cst_70 : f32 to vector<2x8x16xf32>
      %88 = arith.mulf %86, %87 : vector<2x8x16xf32>
      %cst_71 = arith.constant dense<0xFF800000> : vector<2x16xf32>
      %89 = vector.multi_reduction <maximumf>, %88, %cst_71 [1] : vector<2x8x16xf32> to vector<2x16xf32>
      %cst_72 = arith.constant dense<0xFF800000> : vector<2xf32>
      %90 = vector.multi_reduction <maximumf>, %89, %cst_72 [1] : vector<2x16xf32> to vector<2xf32>
      %91 = vector.shape_cast %90 : vector<2xf32> to vector<2x1xf32>
      %92 = vector.broadcast %91 : vector<2x1xf32> to vector<2x16xf32>
      %93 = arith.subf %89, %92 : vector<2x16xf32>
      %94 = math.exp %93 : vector<2x16xf32>
      %cst_73 = arith.constant dense<0.000000e+00> : vector<2xf32>
      %95 = vector.multi_reduction <add>, %94, %cst_73 [1] : vector<2x16xf32> to vector<2xf32>
      %96 = vector.shape_cast %95 : vector<2xf32> to vector<2x1xf32>
      %97 = math.log %96 : vector<2x1xf32>
      %98 = arith.addf %97, %91 : vector<2x1xf32>
      %99 = vector.broadcast %98 : vector<2x1xf32> to vector<2x16xf32>
      %100 = arith.subf %89, %99 : vector<2x16xf32>
      %101 = vector.shape_cast %89 : vector<2x16xf32> to vector<2x1x16xf32>
      %c0_74 = arith.constant 0 : index
      %c0_75 = arith.constant 0 : index
      %c0_76 = arith.constant 0 : index
      %102 = vector.load %arg8[%c0_74, %c0_75, %c0_76] : memref<2x2x16xf32, #tpu.memory_space<vmem>>, vector<2x2x16xf32>
      %103 = vector.broadcast %101 : vector<2x1x16xf32> to vector<2x2x16xf32>
      %104 = arith.addf %103, %102 : vector<2x2x16xf32>
      %cst_77 = arith.constant 0.000000e+00 : f32
      %105 = vector.broadcast %cst_77 : f32 to vector<2x2x16xf32>
      %cst_78 = arith.constant 0.000000e+00 : f32
      %106 = vector.broadcast %cst_78 : f32 to vector<2x2x16xf32>
      %c0_i32_79 = arith.constant 0 : i32
      %cst_80 = arith.constant 1.000000e+00 : f32
      %107 = vector.broadcast %cst_80 : f32 to vector<2x2x16xf32>
      %108 = arith.subf %107, %105 : vector<2x2x16xf32>
      %cst_81 = arith.constant 9.99999968E-21 : f32
      %109 = vector.broadcast %cst_81 : f32 to vector<2x2x16xf32>
      %110 = arith.maximumf %108, %109 : vector<2x2x16xf32>
      %111 = math.log %110 : vector<2x2x16xf32>
      %112 = arith.addf %104, %111 : vector<2x2x16xf32>
      %cst_82 = arith.constant 1.000000e+00 : f32
      %113 = vector.broadcast %cst_82 : f32 to vector<2x2x16xf32>
      %114 = arith.mulf %112, %113 : vector<2x2x16xf32>
      %cst_83 = arith.constant dense<0xFF800000> : vector<2x2xf32>
      %115 = vector.multi_reduction <maximumf>, %114, %cst_83 [2] : vector<2x2x16xf32> to vector<2x2xf32>
      %116 = vector.shape_cast %115 : vector<2x2xf32> to vector<2x2x1xf32>
      %117 = vector.broadcast %116 : vector<2x2x1xf32> to vector<2x2x16xf32>
      %118 = arith.subf %114, %117 : vector<2x2x16xf32>
      %119 = math.exp %118 : vector<2x2x16xf32>
      %cst_84 = arith.constant dense<0.000000e+00> : vector<2x2xf32>
      %120 = vector.multi_reduction <add>, %119, %cst_84 [2] : vector<2x2x16xf32> to vector<2x2xf32>
      %121 = vector.shape_cast %120 : vector<2x2xf32> to vector<2x2x1xf32>
      %122 = tpu.reciprocal %121 {approx = true} : vector<2x2x1xf32> -> vector<2x2x1xf32>
      %123 = vector.broadcast %122 : vector<2x2x1xf32> to vector<2x2x16xf32>
      %124 = arith.mulf %119, %123 : vector<2x2x16xf32>
      %125 = arith.addf %106, %124 : vector<2x2x16xf32>
      %c1_i32_85 = arith.constant 1 : i32
      %cst_86 = arith.constant 1.000000e+00 : f32
      %126 = vector.broadcast %cst_86 : f32 to vector<2x2x16xf32>
      %127 = arith.subf %126, %124 : vector<2x2x16xf32>
      %cst_87 = arith.constant 9.99999968E-21 : f32
      %128 = vector.broadcast %cst_87 : f32 to vector<2x2x16xf32>
      %129 = arith.maximumf %127, %128 : vector<2x2x16xf32>
      %130 = math.log %129 : vector<2x2x16xf32>
      %131 = arith.addf %112, %130 : vector<2x2x16xf32>
      %cst_88 = arith.constant 1.000000e+00 : f32
      %132 = vector.broadcast %cst_88 : f32 to vector<2x2x16xf32>
      %133 = arith.mulf %131, %132 : vector<2x2x16xf32>
      %cst_89 = arith.constant dense<0xFF800000> : vector<2x2xf32>
      %134 = vector.multi_reduction <maximumf>, %133, %cst_89 [2] : vector<2x2x16xf32> to vector<2x2xf32>
      %135 = vector.shape_cast %134 : vector<2x2xf32> to vector<2x2x1xf32>
      %136 = vector.broadcast %135 : vector<2x2x1xf32> to vector<2x2x16xf32>
      %137 = arith.subf %133, %136 : vector<2x2x16xf32>
      %138 = math.exp %137 : vector<2x2x16xf32>
      %cst_90 = arith.constant dense<0.000000e+00> : vector<2x2xf32>
      %139 = vector.multi_reduction <add>, %138, %cst_90 [2] : vector<2x2x16xf32> to vector<2x2xf32>
      %140 = vector.shape_cast %139 : vector<2x2xf32> to vector<2x2x1xf32>
      %141 = tpu.reciprocal %140 {approx = true} : vector<2x2x1xf32> -> vector<2x2x1xf32>
      %142 = vector.broadcast %141 : vector<2x2x1xf32> to vector<2x2x16xf32>
      %143 = arith.mulf %138, %142 : vector<2x2x16xf32>
      %144 = arith.addf %125, %143 : vector<2x2x16xf32>
      %c2_i32_91 = arith.constant 2 : i32
      %cst_92 = arith.constant 1.000000e+00 : f32
      %145 = vector.broadcast %cst_92 : f32 to vector<2x2x16xf32>
      %146 = arith.subf %145, %143 : vector<2x2x16xf32>
      %cst_93 = arith.constant 9.99999968E-21 : f32
      %147 = vector.broadcast %cst_93 : f32 to vector<2x2x16xf32>
      %148 = arith.maximumf %146, %147 : vector<2x2x16xf32>
      %149 = math.log %148 : vector<2x2x16xf32>
      %150 = arith.addf %131, %149 : vector<2x2x16xf32>
      %cst_94 = arith.constant 1.000000e+00 : f32
      %151 = vector.broadcast %cst_94 : f32 to vector<2x2x16xf32>
      %152 = arith.mulf %150, %151 : vector<2x2x16xf32>
      %cst_95 = arith.constant dense<0xFF800000> : vector<2x2xf32>
      %153 = vector.multi_reduction <maximumf>, %152, %cst_95 [2] : vector<2x2x16xf32> to vector<2x2xf32>
      %154 = vector.shape_cast %153 : vector<2x2xf32> to vector<2x2x1xf32>
      %155 = vector.broadcast %154 : vector<2x2x1xf32> to vector<2x2x16xf32>
      %156 = arith.subf %152, %155 : vector<2x2x16xf32>
      %157 = math.exp %156 : vector<2x2x16xf32>
      %cst_96 = arith.constant dense<0.000000e+00> : vector<2x2xf32>
      %158 = vector.multi_reduction <add>, %157, %cst_96 [2] : vector<2x2x16xf32> to vector<2x2xf32>
      %159 = vector.shape_cast %158 : vector<2x2xf32> to vector<2x2x1xf32>
      %160 = tpu.reciprocal %159 {approx = true} : vector<2x2x1xf32> -> vector<2x2x1xf32>
      %161 = vector.broadcast %160 : vector<2x2x1xf32> to vector<2x2x16xf32>
      %162 = arith.mulf %157, %161 : vector<2x2x16xf32>
      %163 = arith.addf %144, %162 : vector<2x2x16xf32>
      %c3_i32_97 = arith.constant 3 : i32
      %cst_98 = arith.constant 1.000000e+00 : f32
      %164 = vector.broadcast %cst_98 : f32 to vector<2x2x16xf32>
      %165 = arith.subf %164, %162 : vector<2x2x16xf32>
      %cst_99 = arith.constant 9.99999968E-21 : f32
      %166 = vector.broadcast %cst_99 : f32 to vector<2x2x16xf32>
      %167 = arith.maximumf %165, %166 : vector<2x2x16xf32>
      %168 = math.log %167 : vector<2x2x16xf32>
      %169 = arith.addf %150, %168 : vector<2x2x16xf32>
      %cst_100 = arith.constant 1.000000e+00 : f32
      %170 = vector.broadcast %cst_100 : f32 to vector<2x2x16xf32>
      %171 = arith.mulf %169, %170 : vector<2x2x16xf32>
      %cst_101 = arith.constant dense<0xFF800000> : vector<2x2xf32>
      %172 = vector.multi_reduction <maximumf>, %171, %cst_101 [2] : vector<2x2x16xf32> to vector<2x2xf32>
      %173 = vector.shape_cast %172 : vector<2x2xf32> to vector<2x2x1xf32>
      %174 = vector.broadcast %173 : vector<2x2x1xf32> to vector<2x2x16xf32>
      %175 = arith.subf %171, %174 : vector<2x2x16xf32>
      %176 = math.exp %175 : vector<2x2x16xf32>
      %cst_102 = arith.constant dense<0.000000e+00> : vector<2x2xf32>
      %177 = vector.multi_reduction <add>, %176, %cst_102 [2] : vector<2x2x16xf32> to vector<2x2xf32>
      %178 = vector.shape_cast %177 : vector<2x2xf32> to vector<2x2x1xf32>
      %179 = tpu.reciprocal %178 {approx = true} : vector<2x2x1xf32> -> vector<2x2x1xf32>
      %180 = vector.broadcast %179 : vector<2x2x1xf32> to vector<2x2x16xf32>
      %181 = arith.mulf %176, %180 : vector<2x2x16xf32>
      %182 = arith.addf %163, %181 : vector<2x2x16xf32>
      %c4_i32_103 = arith.constant 4 : i32
      %cst_104 = arith.constant 1.000000e+00 : f32
      %183 = vector.broadcast %cst_104 : f32 to vector<2x2x16xf32>
      %184 = arith.subf %183, %181 : vector<2x2x16xf32>
      %cst_105 = arith.constant 9.99999968E-21 : f32
      %185 = vector.broadcast %cst_105 : f32 to vector<2x2x16xf32>
      %186 = arith.maximumf %184, %185 : vector<2x2x16xf32>
      %187 = math.log %186 : vector<2x2x16xf32>
      %188 = arith.addf %169, %187 : vector<2x2x16xf32>
      %cst_106 = arith.constant 1.000000e+00 : f32
      %189 = vector.broadcast %cst_106 : f32 to vector<2x2x16xf32>
      %190 = arith.mulf %188, %189 : vector<2x2x16xf32>
      %cst_107 = arith.constant dense<0xFF800000> : vector<2x2xf32>
      %191 = vector.multi_reduction <maximumf>, %190, %cst_107 [2] : vector<2x2x16xf32> to vector<2x2xf32>
      %192 = vector.shape_cast %191 : vector<2x2xf32> to vector<2x2x1xf32>
      %193 = vector.broadcast %192 : vector<2x2x1xf32> to vector<2x2x16xf32>
      %194 = arith.subf %190, %193 : vector<2x2x16xf32>
      %195 = math.exp %194 : vector<2x2x16xf32>
      %cst_108 = arith.constant dense<0.000000e+00> : vector<2x2xf32>
      %196 = vector.multi_reduction <add>, %195, %cst_108 [2] : vector<2x2x16xf32> to vector<2x2xf32>
      %197 = vector.shape_cast %196 : vector<2x2xf32> to vector<2x2x1xf32>
      %198 = tpu.reciprocal %197 {approx = true} : vector<2x2x1xf32> -> vector<2x2x1xf32>
      %199 = vector.broadcast %198 : vector<2x2x1xf32> to vector<2x2x16xf32>
      %200 = arith.mulf %195, %199 : vector<2x2x16xf32>
      %201 = arith.addf %182, %200 : vector<2x2x16xf32>
      %c5_i32_109 = arith.constant 5 : i32
      %cst_110 = arith.constant 1.000000e+00 : f32
      %202 = vector.broadcast %cst_110 : f32 to vector<2x2x16xf32>
      %203 = arith.subf %202, %200 : vector<2x2x16xf32>
      %cst_111 = arith.constant 9.99999968E-21 : f32
      %204 = vector.broadcast %cst_111 : f32 to vector<2x2x16xf32>
      %205 = arith.maximumf %203, %204 : vector<2x2x16xf32>
      %206 = math.log %205 : vector<2x2x16xf32>
      %207 = arith.addf %188, %206 : vector<2x2x16xf32>
      %cst_112 = arith.constant 1.000000e+00 : f32
      %208 = vector.broadcast %cst_112 : f32 to vector<2x2x16xf32>
      %209 = arith.mulf %207, %208 : vector<2x2x16xf32>
      %cst_113 = arith.constant dense<0xFF800000> : vector<2x2xf32>
      %210 = vector.multi_reduction <maximumf>, %209, %cst_113 [2] : vector<2x2x16xf32> to vector<2x2xf32>
      %211 = vector.shape_cast %210 : vector<2x2xf32> to vector<2x2x1xf32>
      %212 = vector.broadcast %211 : vector<2x2x1xf32> to vector<2x2x16xf32>
      %213 = arith.subf %209, %212 : vector<2x2x16xf32>
      %214 = math.exp %213 : vector<2x2x16xf32>
      %cst_114 = arith.constant dense<0.000000e+00> : vector<2x2xf32>
      %215 = vector.multi_reduction <add>, %214, %cst_114 [2] : vector<2x2x16xf32> to vector<2x2xf32>
      %216 = vector.shape_cast %215 : vector<2x2xf32> to vector<2x2x1xf32>
      %217 = tpu.reciprocal %216 {approx = true} : vector<2x2x1xf32> -> vector<2x2x1xf32>
      %218 = vector.broadcast %217 : vector<2x2x1xf32> to vector<2x2x16xf32>
      %219 = arith.mulf %214, %218 : vector<2x2x16xf32>
      %220 = arith.addf %201, %219 : vector<2x2x16xf32>
      %c6_i32_115 = arith.constant 6 : i32
      %cst_116 = arith.constant 1.000000e+00 : f32
      %221 = vector.broadcast %cst_116 : f32 to vector<2x2x16xf32>
      %222 = arith.subf %221, %219 : vector<2x2x16xf32>
      %cst_117 = arith.constant 9.99999968E-21 : f32
      %223 = vector.broadcast %cst_117 : f32 to vector<2x2x16xf32>
      %224 = arith.maximumf %222, %223 : vector<2x2x16xf32>
      %225 = math.log %224 : vector<2x2x16xf32>
      %226 = arith.addf %207, %225 : vector<2x2x16xf32>
      %cst_118 = arith.constant 1.000000e+00 : f32
      %227 = vector.broadcast %cst_118 : f32 to vector<2x2x16xf32>
      %228 = arith.mulf %226, %227 : vector<2x2x16xf32>
      %cst_119 = arith.constant dense<0xFF800000> : vector<2x2xf32>
      %229 = vector.multi_reduction <maximumf>, %228, %cst_119 [2] : vector<2x2x16xf32> to vector<2x2xf32>
      %230 = vector.shape_cast %229 : vector<2x2xf32> to vector<2x2x1xf32>
      %231 = vector.broadcast %230 : vector<2x2x1xf32> to vector<2x2x16xf32>
      %232 = arith.subf %228, %231 : vector<2x2x16xf32>
      %233 = math.exp %232 : vector<2x2x16xf32>
      %cst_120 = arith.constant dense<0.000000e+00> : vector<2x2xf32>
      %234 = vector.multi_reduction <add>, %233, %cst_120 [2] : vector<2x2x16xf32> to vector<2x2xf32>
      %235 = vector.shape_cast %234 : vector<2x2xf32> to vector<2x2x1xf32>
      %236 = tpu.reciprocal %235 {approx = true} : vector<2x2x1xf32> -> vector<2x2x1xf32>
      %237 = vector.broadcast %236 : vector<2x2x1xf32> to vector<2x2x16xf32>
      %238 = arith.mulf %233, %237 : vector<2x2x16xf32>
      %239 = arith.addf %220, %238 : vector<2x2x16xf32>
      %c7_i32_121 = arith.constant 7 : i32
      %cst_122 = arith.constant 1.000000e+00 : f32
      %240 = vector.broadcast %cst_122 : f32 to vector<2x2x16xf32>
      %241 = arith.subf %240, %238 : vector<2x2x16xf32>
      %cst_123 = arith.constant 9.99999968E-21 : f32
      %242 = vector.broadcast %cst_123 : f32 to vector<2x2x16xf32>
      %243 = arith.maximumf %241, %242 : vector<2x2x16xf32>
      %244 = math.log %243 : vector<2x2x16xf32>
      %245 = arith.addf %226, %244 : vector<2x2x16xf32>
      %cst_124 = arith.constant 1.000000e+00 : f32
      %246 = vector.broadcast %cst_124 : f32 to vector<2x2x16xf32>
      %247 = arith.mulf %245, %246 : vector<2x2x16xf32>
      %cst_125 = arith.constant dense<0xFF800000> : vector<2x2xf32>
      %248 = vector.multi_reduction <maximumf>, %247, %cst_125 [2] : vector<2x2x16xf32> to vector<2x2xf32>
      %249 = vector.shape_cast %248 : vector<2x2xf32> to vector<2x2x1xf32>
      %250 = vector.broadcast %249 : vector<2x2x1xf32> to vector<2x2x16xf32>
      %251 = arith.subf %247, %250 : vector<2x2x16xf32>
      %252 = math.exp %251 : vector<2x2x16xf32>
      %cst_126 = arith.constant dense<0.000000e+00> : vector<2x2xf32>
      %253 = vector.multi_reduction <add>, %252, %cst_126 [2] : vector<2x2x16xf32> to vector<2x2xf32>
      %254 = vector.shape_cast %253 : vector<2x2xf32> to vector<2x2x1xf32>
      %255 = tpu.reciprocal %254 {approx = true} : vector<2x2x1xf32> -> vector<2x2x1xf32>
      %256 = vector.broadcast %255 : vector<2x2x1xf32> to vector<2x2x16xf32>
      %257 = arith.mulf %252, %256 : vector<2x2x16xf32>
      %258 = arith.addf %239, %257 : vector<2x2x16xf32>
      %c8_i32_127 = arith.constant 8 : i32
      %cst_128 = arith.constant 1.000000e+00 : f32
      %259 = vector.broadcast %cst_128 : f32 to vector<2x2x16xf32>
      %260 = arith.subf %259, %257 : vector<2x2x16xf32>
      %cst_129 = arith.constant 9.99999968E-21 : f32
      %261 = vector.broadcast %cst_129 : f32 to vector<2x2x16xf32>
      %262 = arith.maximumf %260, %261 : vector<2x2x16xf32>
      %263 = math.log %262 : vector<2x2x16xf32>
      %264 = arith.addf %245, %263 : vector<2x2x16xf32>
      %cst_130 = arith.constant 1.000000e+00 : f32
      %265 = vector.broadcast %cst_130 : f32 to vector<2x2x16xf32>
      %266 = arith.mulf %264, %265 : vector<2x2x16xf32>
      %cst_131 = arith.constant dense<0xFF800000> : vector<2x2xf32>
      %267 = vector.multi_reduction <maximumf>, %266, %cst_131 [2] : vector<2x2x16xf32> to vector<2x2xf32>
      %268 = vector.shape_cast %267 : vector<2x2xf32> to vector<2x2x1xf32>
      %269 = vector.broadcast %268 : vector<2x2x1xf32> to vector<2x2x16xf32>
      %270 = arith.subf %266, %269 : vector<2x2x16xf32>
      %271 = math.exp %270 : vector<2x2x16xf32>
      %cst_132 = arith.constant dense<0.000000e+00> : vector<2x2xf32>
      %272 = vector.multi_reduction <add>, %271, %cst_132 [2] : vector<2x2x16xf32> to vector<2x2xf32>
      %273 = vector.shape_cast %272 : vector<2x2xf32> to vector<2x2x1xf32>
      %274 = tpu.reciprocal %273 {approx = true} : vector<2x2x1xf32> -> vector<2x2x1xf32>
      %275 = vector.broadcast %274 : vector<2x2x1xf32> to vector<2x2x16xf32>
      %276 = arith.mulf %271, %275 : vector<2x2x16xf32>
      %277 = arith.addf %258, %276 : vector<2x2x16xf32>
      %c9_i32_133 = arith.constant 9 : i32
      %cst_134 = arith.constant 1.000000e+00 : f32
      %278 = vector.broadcast %cst_134 : f32 to vector<2x2x16xf32>
      %279 = arith.subf %278, %276 : vector<2x2x16xf32>
      %cst_135 = arith.constant 9.99999968E-21 : f32
      %280 = vector.broadcast %cst_135 : f32 to vector<2x2x16xf32>
      %281 = arith.maximumf %279, %280 : vector<2x2x16xf32>
      %282 = math.log %281 : vector<2x2x16xf32>
      %283 = arith.addf %264, %282 : vector<2x2x16xf32>
      %cst_136 = arith.constant 1.000000e+00 : f32
      %284 = vector.broadcast %cst_136 : f32 to vector<2x2x16xf32>
      %285 = arith.mulf %283, %284 : vector<2x2x16xf32>
      %cst_137 = arith.constant dense<0xFF800000> : vector<2x2xf32>
      %286 = vector.multi_reduction <maximumf>, %285, %cst_137 [2] : vector<2x2x16xf32> to vector<2x2xf32>
      %287 = vector.shape_cast %286 : vector<2x2xf32> to vector<2x2x1xf32>
      %288 = vector.broadcast %287 : vector<2x2x1xf32> to vector<2x2x16xf32>
      %289 = arith.subf %285, %288 : vector<2x2x16xf32>
      %290 = math.exp %289 : vector<2x2x16xf32>
      %cst_138 = arith.constant dense<0.000000e+00> : vector<2x2xf32>
      %291 = vector.multi_reduction <add>, %290, %cst_138 [2] : vector<2x2x16xf32> to vector<2x2xf32>
      %292 = vector.shape_cast %291 : vector<2x2xf32> to vector<2x2x1xf32>
      %293 = tpu.reciprocal %292 {approx = true} : vector<2x2x1xf32> -> vector<2x2x1xf32>
      %294 = vector.broadcast %293 : vector<2x2x1xf32> to vector<2x2x16xf32>
      %295 = arith.mulf %290, %294 : vector<2x2x16xf32>
      %296 = arith.addf %277, %295 : vector<2x2x16xf32>
      %297 = tpu.iota {dimensions = array<i32: 2>} : vector<2x2x16xi32>
      %cst_139 = arith.constant 0.000000e+00 : f32
      %298 = vector.broadcast %cst_139 : f32 to vector<2x2x16xf32>
      %c0_i32_140 = arith.constant 0 : i32
      %cst_141 = arith.constant dense<0xFF800000> : vector<2x2xf32>
      %299 = vector.multi_reduction <maximumf>, %296, %cst_141 [2] : vector<2x2x16xf32> to vector<2x2xf32>
      %300 = vector.shape_cast %299 : vector<2x2xf32> to vector<2x2x1xf32>
      %301 = vector.broadcast %300 : vector<2x2x1xf32> to vector<2x2x16xf32>
      %302 = arith.cmpf oge, %296, %301 : vector<2x2x16xf32>
      %c16_i32 = arith.constant 16 : i32
      %303 = vector.broadcast %c16_i32 : i32 to vector<2x2x16xi32>
      %304 = arith.select %302, %297, %303 : vector<2x2x16xi1>, vector<2x2x16xi32>
      %cst_142 = arith.constant dense<2147483647> : vector<2x2xi32>
      %305 = vector.multi_reduction <minsi>, %304, %cst_142 [2] : vector<2x2x16xi32> to vector<2x2xi32>
      %306 = vector.shape_cast %305 : vector<2x2xi32> to vector<2x2x1xi32>
      %307 = vector.broadcast %306 : vector<2x2x1xi32> to vector<2x2x16xi32>
      %308 = arith.cmpi eq, %297, %307 : vector<2x2x16xi32>
      %309 = arith.extui %308 : vector<2x2x16xi1> to vector<2x2x16xi32>
      %310 = arith.sitofp %309 : vector<2x2x16xi32> to vector<2x2x16xf32>
      %311 = arith.index_cast %c0_i32_140 : i32 to index
      %c0_143 = arith.constant 0 : index
      %c0_144 = arith.constant 0 : index
      %c0_145 = arith.constant 0 : index
      %312 = vector.load %arg14[%311, %c0_143, %c0_144, %c0_145] : memref<10x2x2x16xf32, #tpu.memory_space<vmem>>, vector<1x2x2x16xf32>
      %313 = vector.shape_cast %312 : vector<1x2x2x16xf32> to vector<2x2x16xf32>
      %314 = vector.shape_cast %310 : vector<2x2x16xf32> to vector<1x2x2x16xf32>
      tpu.vector_store %arg14[%311, %c0_143, %c0_144, %c0_145], %314 {strides = array<i32>} : memref<10x2x2x16xf32, #tpu.memory_space<vmem>>, vector<1x2x2x16xf32>,
      %cst_146 = arith.constant 1.000000e+00 : f32
      %315 = vector.broadcast %cst_146 : f32 to vector<2x2x16xf32>
      %316 = arith.select %308, %315, %298 : vector<2x2x16xi1>, vector<2x2x16xf32>
      %cst_147 = arith.constant -1.000000e+30 : f32
      %317 = vector.broadcast %cst_147 : f32 to vector<2x2x16xf32>
      %318 = arith.select %308, %317, %296 : vector<2x2x16xi1>, vector<2x2x16xf32>
      %c1_i32_148 = arith.constant 1 : i32
      %cst_149 = arith.constant dense<0xFF800000> : vector<2x2xf32>
      %319 = vector.multi_reduction <maximumf>, %318, %cst_149 [2] : vector<2x2x16xf32> to vector<2x2xf32>
      %320 = vector.shape_cast %319 : vector<2x2xf32> to vector<2x2x1xf32>
      %321 = vector.broadcast %320 : vector<2x2x1xf32> to vector<2x2x16xf32>
      %322 = arith.cmpf oge, %318, %321 : vector<2x2x16xf32>
      %c16_i32_150 = arith.constant 16 : i32
      %323 = vector.broadcast %c16_i32_150 : i32 to vector<2x2x16xi32>
      %324 = arith.select %322, %297, %323 : vector<2x2x16xi1>, vector<2x2x16xi32>
      %cst_151 = arith.constant dense<2147483647> : vector<2x2xi32>
      %325 = vector.multi_reduction <minsi>, %324, %cst_151 [2] : vector<2x2x16xi32> to vector<2x2xi32>
      %326 = vector.shape_cast %325 : vector<2x2xi32> to vector<2x2x1xi32>
      %327 = vector.broadcast %326 : vector<2x2x1xi32> to vector<2x2x16xi32>
      %328 = arith.cmpi eq, %297, %327 : vector<2x2x16xi32>
      %329 = arith.extui %328 : vector<2x2x16xi1> to vector<2x2x16xi32>
      %330 = arith.sitofp %329 : vector<2x2x16xi32> to vector<2x2x16xf32>
      %331 = arith.index_cast %c1_i32_148 : i32 to index
      %c0_152 = arith.constant 0 : index
      %c0_153 = arith.constant 0 : index
      %c0_154 = arith.constant 0 : index
      %332 = vector.load %arg14[%331, %c0_152, %c0_153, %c0_154] : memref<10x2x2x16xf32, #tpu.memory_space<vmem>>, vector<1x2x2x16xf32>
      %333 = vector.shape_cast %332 : vector<1x2x2x16xf32> to vector<2x2x16xf32>
      %334 = vector.shape_cast %330 : vector<2x2x16xf32> to vector<1x2x2x16xf32>
      tpu.vector_store %arg14[%331, %c0_152, %c0_153, %c0_154], %334 {strides = array<i32>} : memref<10x2x2x16xf32, #tpu.memory_space<vmem>>, vector<1x2x2x16xf32>,
      %cst_155 = arith.constant 1.000000e+00 : f32
      %335 = vector.broadcast %cst_155 : f32 to vector<2x2x16xf32>
      %336 = arith.select %328, %335, %316 : vector<2x2x16xi1>, vector<2x2x16xf32>
      %cst_156 = arith.constant -1.000000e+30 : f32
      %337 = vector.broadcast %cst_156 : f32 to vector<2x2x16xf32>
      %338 = arith.select %328, %337, %318 : vector<2x2x16xi1>, vector<2x2x16xf32>
      %c2_i32_157 = arith.constant 2 : i32
      %cst_158 = arith.constant dense<0xFF800000> : vector<2x2xf32>
      %339 = vector.multi_reduction <maximumf>, %338, %cst_158 [2] : vector<2x2x16xf32> to vector<2x2xf32>
      %340 = vector.shape_cast %339 : vector<2x2xf32> to vector<2x2x1xf32>
      %341 = vector.broadcast %340 : vector<2x2x1xf32> to vector<2x2x16xf32>
      %342 = arith.cmpf oge, %338, %341 : vector<2x2x16xf32>
      %c16_i32_159 = arith.constant 16 : i32
      %343 = vector.broadcast %c16_i32_159 : i32 to vector<2x2x16xi32>
      %344 = arith.select %342, %297, %343 : vector<2x2x16xi1>, vector<2x2x16xi32>
      %cst_160 = arith.constant dense<2147483647> : vector<2x2xi32>
      %345 = vector.multi_reduction <minsi>, %344, %cst_160 [2] : vector<2x2x16xi32> to vector<2x2xi32>
      %346 = vector.shape_cast %345 : vector<2x2xi32> to vector<2x2x1xi32>
      %347 = vector.broadcast %346 : vector<2x2x1xi32> to vector<2x2x16xi32>
      %348 = arith.cmpi eq, %297, %347 : vector<2x2x16xi32>
      %349 = arith.extui %348 : vector<2x2x16xi1> to vector<2x2x16xi32>
      %350 = arith.sitofp %349 : vector<2x2x16xi32> to vector<2x2x16xf32>
      %351 = arith.index_cast %c2_i32_157 : i32 to index
      %c0_161 = arith.constant 0 : index
      %c0_162 = arith.constant 0 : index
      %c0_163 = arith.constant 0 : index
      %352 = vector.load %arg14[%351, %c0_161, %c0_162, %c0_163] : memref<10x2x2x16xf32, #tpu.memory_space<vmem>>, vector<1x2x2x16xf32>
      %353 = vector.shape_cast %352 : vector<1x2x2x16xf32> to vector<2x2x16xf32>
      %354 = vector.shape_cast %350 : vector<2x2x16xf32> to vector<1x2x2x16xf32>
      tpu.vector_store %arg14[%351, %c0_161, %c0_162, %c0_163], %354 {strides = array<i32>} : memref<10x2x2x16xf32, #tpu.memory_space<vmem>>, vector<1x2x2x16xf32>,
      %cst_164 = arith.constant 1.000000e+00 : f32
      %355 = vector.broadcast %cst_164 : f32 to vector<2x2x16xf32>
      %356 = arith.select %348, %355, %336 : vector<2x2x16xi1>, vector<2x2x16xf32>
      %cst_165 = arith.constant -1.000000e+30 : f32
      %357 = vector.broadcast %cst_165 : f32 to vector<2x2x16xf32>
      %358 = arith.select %348, %357, %338 : vector<2x2x16xi1>, vector<2x2x16xf32>
      %c3_i32_166 = arith.constant 3 : i32
      %cst_167 = arith.constant dense<0xFF800000> : vector<2x2xf32>
      %359 = vector.multi_reduction <maximumf>, %358, %cst_167 [2] : vector<2x2x16xf32> to vector<2x2xf32>
      %360 = vector.shape_cast %359 : vector<2x2xf32> to vector<2x2x1xf32>
      %361 = vector.broadcast %360 : vector<2x2x1xf32> to vector<2x2x16xf32>
      %362 = arith.cmpf oge, %358, %361 : vector<2x2x16xf32>
      %c16_i32_168 = arith.constant 16 : i32
      %363 = vector.broadcast %c16_i32_168 : i32 to vector<2x2x16xi32>
      %364 = arith.select %362, %297, %363 : vector<2x2x16xi1>, vector<2x2x16xi32>
      %cst_169 = arith.constant dense<2147483647> : vector<2x2xi32>
      %365 = vector.multi_reduction <minsi>, %364, %cst_169 [2] : vector<2x2x16xi32> to vector<2x2xi32>
      %366 = vector.shape_cast %365 : vector<2x2xi32> to vector<2x2x1xi32>
      %367 = vector.broadcast %366 : vector<2x2x1xi32> to vector<2x2x16xi32>
      %368 = arith.cmpi eq, %297, %367 : vector<2x2x16xi32>
      %369 = arith.extui %368 : vector<2x2x16xi1> to vector<2x2x16xi32>
      %370 = arith.sitofp %369 : vector<2x2x16xi32> to vector<2x2x16xf32>
      %371 = arith.index_cast %c3_i32_166 : i32 to index
      %c0_170 = arith.constant 0 : index
      %c0_171 = arith.constant 0 : index
      %c0_172 = arith.constant 0 : index
      %372 = vector.load %arg14[%371, %c0_170, %c0_171, %c0_172] : memref<10x2x2x16xf32, #tpu.memory_space<vmem>>, vector<1x2x2x16xf32>
      %373 = vector.shape_cast %372 : vector<1x2x2x16xf32> to vector<2x2x16xf32>
      %374 = vector.shape_cast %370 : vector<2x2x16xf32> to vector<1x2x2x16xf32>
      tpu.vector_store %arg14[%371, %c0_170, %c0_171, %c0_172], %374 {strides = array<i32>} : memref<10x2x2x16xf32, #tpu.memory_space<vmem>>, vector<1x2x2x16xf32>,
      %cst_173 = arith.constant 1.000000e+00 : f32
      %375 = vector.broadcast %cst_173 : f32 to vector<2x2x16xf32>
      %376 = arith.select %368, %375, %356 : vector<2x2x16xi1>, vector<2x2x16xf32>
      %cst_174 = arith.constant -1.000000e+30 : f32
      %377 = vector.broadcast %cst_174 : f32 to vector<2x2x16xf32>
      %378 = arith.select %368, %377, %358 : vector<2x2x16xi1>, vector<2x2x16xf32>
      %c4_i32_175 = arith.constant 4 : i32
      %cst_176 = arith.constant dense<0xFF800000> : vector<2x2xf32>
      %379 = vector.multi_reduction <maximumf>, %378, %cst_176 [2] : vector<2x2x16xf32> to vector<2x2xf32>
      %380 = vector.shape_cast %379 : vector<2x2xf32> to vector<2x2x1xf32>
      %381 = vector.broadcast %380 : vector<2x2x1xf32> to vector<2x2x16xf32>
      %382 = arith.cmpf oge, %378, %381 : vector<2x2x16xf32>
      %c16_i32_177 = arith.constant 16 : i32
      %383 = vector.broadcast %c16_i32_177 : i32 to vector<2x2x16xi32>
      %384 = arith.select %382, %297, %383 : vector<2x2x16xi1>, vector<2x2x16xi32>
      %cst_178 = arith.constant dense<2147483647> : vector<2x2xi32>
      %385 = vector.multi_reduction <minsi>, %384, %cst_178 [2] : vector<2x2x16xi32> to vector<2x2xi32>
      %386 = vector.shape_cast %385 : vector<2x2xi32> to vector<2x2x1xi32>
      %387 = vector.broadcast %386 : vector<2x2x1xi32> to vector<2x2x16xi32>
      %388 = arith.cmpi eq, %297, %387 : vector<2x2x16xi32>
      %389 = arith.extui %388 : vector<2x2x16xi1> to vector<2x2x16xi32>
      %390 = arith.sitofp %389 : vector<2x2x16xi32> to vector<2x2x16xf32>
      %391 = arith.index_cast %c4_i32_175 : i32 to index
      %c0_179 = arith.constant 0 : index
      %c0_180 = arith.constant 0 : index
      %c0_181 = arith.constant 0 : index
      %392 = vector.load %arg14[%391, %c0_179, %c0_180, %c0_181] : memref<10x2x2x16xf32, #tpu.memory_space<vmem>>, vector<1x2x2x16xf32>
      %393 = vector.shape_cast %392 : vector<1x2x2x16xf32> to vector<2x2x16xf32>
      %394 = vector.shape_cast %390 : vector<2x2x16xf32> to vector<1x2x2x16xf32>
      tpu.vector_store %arg14[%391, %c0_179, %c0_180, %c0_181], %394 {strides = array<i32>} : memref<10x2x2x16xf32, #tpu.memory_space<vmem>>, vector<1x2x2x16xf32>,
      %cst_182 = arith.constant 1.000000e+00 : f32
      %395 = vector.broadcast %cst_182 : f32 to vector<2x2x16xf32>
      %396 = arith.select %388, %395, %376 : vector<2x2x16xi1>, vector<2x2x16xf32>
      %cst_183 = arith.constant -1.000000e+30 : f32
      %397 = vector.broadcast %cst_183 : f32 to vector<2x2x16xf32>
      %398 = arith.select %388, %397, %378 : vector<2x2x16xi1>, vector<2x2x16xf32>
      %c5_i32_184 = arith.constant 5 : i32
      %cst_185 = arith.constant dense<0xFF800000> : vector<2x2xf32>
      %399 = vector.multi_reduction <maximumf>, %398, %cst_185 [2] : vector<2x2x16xf32> to vector<2x2xf32>
      %400 = vector.shape_cast %399 : vector<2x2xf32> to vector<2x2x1xf32>
      %401 = vector.broadcast %400 : vector<2x2x1xf32> to vector<2x2x16xf32>
      %402 = arith.cmpf oge, %398, %401 : vector<2x2x16xf32>
      %c16_i32_186 = arith.constant 16 : i32
      %403 = vector.broadcast %c16_i32_186 : i32 to vector<2x2x16xi32>
      %404 = arith.select %402, %297, %403 : vector<2x2x16xi1>, vector<2x2x16xi32>
      %cst_187 = arith.constant dense<2147483647> : vector<2x2xi32>
      %405 = vector.multi_reduction <minsi>, %404, %cst_187 [2] : vector<2x2x16xi32> to vector<2x2xi32>
      %406 = vector.shape_cast %405 : vector<2x2xi32> to vector<2x2x1xi32>
      %407 = vector.broadcast %406 : vector<2x2x1xi32> to vector<2x2x16xi32>
      %408 = arith.cmpi eq, %297, %407 : vector<2x2x16xi32>
      %409 = arith.extui %408 : vector<2x2x16xi1> to vector<2x2x16xi32>
      %410 = arith.sitofp %409 : vector<2x2x16xi32> to vector<2x2x16xf32>
      %411 = arith.index_cast %c5_i32_184 : i32 to index
      %c0_188 = arith.constant 0 : index
      %c0_189 = arith.constant 0 : index
      %c0_190 = arith.constant 0 : index
      %412 = vector.load %arg14[%411, %c0_188, %c0_189, %c0_190] : memref<10x2x2x16xf32, #tpu.memory_space<vmem>>, vector<1x2x2x16xf32>
      %413 = vector.shape_cast %412 : vector<1x2x2x16xf32> to vector<2x2x16xf32>
      %414 = vector.shape_cast %410 : vector<2x2x16xf32> to vector<1x2x2x16xf32>
      tpu.vector_store %arg14[%411, %c0_188, %c0_189, %c0_190], %414 {strides = array<i32>} : memref<10x2x2x16xf32, #tpu.memory_space<vmem>>, vector<1x2x2x16xf32>,
      %cst_191 = arith.constant 1.000000e+00 : f32
      %415 = vector.broadcast %cst_191 : f32 to vector<2x2x16xf32>
      %416 = arith.select %408, %415, %396 : vector<2x2x16xi1>, vector<2x2x16xf32>
      %cst_192 = arith.constant -1.000000e+30 : f32
      %417 = vector.broadcast %cst_192 : f32 to vector<2x2x16xf32>
      %418 = arith.select %408, %417, %398 : vector<2x2x16xi1>, vector<2x2x16xf32>
      %c6_i32_193 = arith.constant 6 : i32
      %cst_194 = arith.constant dense<0xFF800000> : vector<2x2xf32>
      %419 = vector.multi_reduction <maximumf>, %418, %cst_194 [2] : vector<2x2x16xf32> to vector<2x2xf32>
      %420 = vector.shape_cast %419 : vector<2x2xf32> to vector<2x2x1xf32>
      %421 = vector.broadcast %420 : vector<2x2x1xf32> to vector<2x2x16xf32>
      %422 = arith.cmpf oge, %418, %421 : vector<2x2x16xf32>
      %c16_i32_195 = arith.constant 16 : i32
      %423 = vector.broadcast %c16_i32_195 : i32 to vector<2x2x16xi32>
      %424 = arith.select %422, %297, %423 : vector<2x2x16xi1>, vector<2x2x16xi32>
      %cst_196 = arith.constant dense<2147483647> : vector<2x2xi32>
      %425 = vector.multi_reduction <minsi>, %424, %cst_196 [2] : vector<2x2x16xi32> to vector<2x2xi32>
      %426 = vector.shape_cast %425 : vector<2x2xi32> to vector<2x2x1xi32>
      %427 = vector.broadcast %426 : vector<2x2x1xi32> to vector<2x2x16xi32>
      %428 = arith.cmpi eq, %297, %427 : vector<2x2x16xi32>
      %429 = arith.extui %428 : vector<2x2x16xi1> to vector<2x2x16xi32>
      %430 = arith.sitofp %429 : vector<2x2x16xi32> to vector<2x2x16xf32>
      %431 = arith.index_cast %c6_i32_193 : i32 to index
      %c0_197 = arith.constant 0 : index
      %c0_198 = arith.constant 0 : index
      %c0_199 = arith.constant 0 : index
      %432 = vector.load %arg14[%431, %c0_197, %c0_198, %c0_199] : memref<10x2x2x16xf32, #tpu.memory_space<vmem>>, vector<1x2x2x16xf32>
      %433 = vector.shape_cast %432 : vector<1x2x2x16xf32> to vector<2x2x16xf32>
      %434 = vector.shape_cast %430 : vector<2x2x16xf32> to vector<1x2x2x16xf32>
      tpu.vector_store %arg14[%431, %c0_197, %c0_198, %c0_199], %434 {strides = array<i32>} : memref<10x2x2x16xf32, #tpu.memory_space<vmem>>, vector<1x2x2x16xf32>,
      %cst_200 = arith.constant 1.000000e+00 : f32
      %435 = vector.broadcast %cst_200 : f32 to vector<2x2x16xf32>
      %436 = arith.select %428, %435, %416 : vector<2x2x16xi1>, vector<2x2x16xf32>
      %cst_201 = arith.constant -1.000000e+30 : f32
      %437 = vector.broadcast %cst_201 : f32 to vector<2x2x16xf32>
      %438 = arith.select %428, %437, %418 : vector<2x2x16xi1>, vector<2x2x16xf32>
      %c7_i32_202 = arith.constant 7 : i32
      %cst_203 = arith.constant dense<0xFF800000> : vector<2x2xf32>
      %439 = vector.multi_reduction <maximumf>, %438, %cst_203 [2] : vector<2x2x16xf32> to vector<2x2xf32>
      %440 = vector.shape_cast %439 : vector<2x2xf32> to vector<2x2x1xf32>
      %441 = vector.broadcast %440 : vector<2x2x1xf32> to vector<2x2x16xf32>
      %442 = arith.cmpf oge, %438, %441 : vector<2x2x16xf32>
      %c16_i32_204 = arith.constant 16 : i32
      %443 = vector.broadcast %c16_i32_204 : i32 to vector<2x2x16xi32>
      %444 = arith.select %442, %297, %443 : vector<2x2x16xi1>, vector<2x2x16xi32>
      %cst_205 = arith.constant dense<2147483647> : vector<2x2xi32>
      %445 = vector.multi_reduction <minsi>, %444, %cst_205 [2] : vector<2x2x16xi32> to vector<2x2xi32>
      %446 = vector.shape_cast %445 : vector<2x2xi32> to vector<2x2x1xi32>
      %447 = vector.broadcast %446 : vector<2x2x1xi32> to vector<2x2x16xi32>
      %448 = arith.cmpi eq, %297, %447 : vector<2x2x16xi32>
      %449 = arith.extui %448 : vector<2x2x16xi1> to vector<2x2x16xi32>
      %450 = arith.sitofp %449 : vector<2x2x16xi32> to vector<2x2x16xf32>
      %451 = arith.index_cast %c7_i32_202 : i32 to index
      %c0_206 = arith.constant 0 : index
      %c0_207 = arith.constant 0 : index
      %c0_208 = arith.constant 0 : index
      %452 = vector.load %arg14[%451, %c0_206, %c0_207, %c0_208] : memref<10x2x2x16xf32, #tpu.memory_space<vmem>>, vector<1x2x2x16xf32>
      %453 = vector.shape_cast %452 : vector<1x2x2x16xf32> to vector<2x2x16xf32>
      %454 = vector.shape_cast %450 : vector<2x2x16xf32> to vector<1x2x2x16xf32>
      tpu.vector_store %arg14[%451, %c0_206, %c0_207, %c0_208], %454 {strides = array<i32>} : memref<10x2x2x16xf32, #tpu.memory_space<vmem>>, vector<1x2x2x16xf32>,
      %cst_209 = arith.constant 1.000000e+00 : f32
      %455 = vector.broadcast %cst_209 : f32 to vector<2x2x16xf32>
      %456 = arith.select %448, %455, %436 : vector<2x2x16xi1>, vector<2x2x16xf32>
      %cst_210 = arith.constant -1.000000e+30 : f32
      %457 = vector.broadcast %cst_210 : f32 to vector<2x2x16xf32>
      %458 = arith.select %448, %457, %438 : vector<2x2x16xi1>, vector<2x2x16xf32>
      %c8_i32_211 = arith.constant 8 : i32
      %cst_212 = arith.constant dense<0xFF800000> : vector<2x2xf32>
      %459 = vector.multi_reduction <maximumf>, %458, %cst_212 [2] : vector<2x2x16xf32> to vector<2x2xf32>
      %460 = vector.shape_cast %459 : vector<2x2xf32> to vector<2x2x1xf32>
      %461 = vector.broadcast %460 : vector<2x2x1xf32> to vector<2x2x16xf32>
      %462 = arith.cmpf oge, %458, %461 : vector<2x2x16xf32>
      %c16_i32_213 = arith.constant 16 : i32
      %463 = vector.broadcast %c16_i32_213 : i32 to vector<2x2x16xi32>
      %464 = arith.select %462, %297, %463 : vector<2x2x16xi1>, vector<2x2x16xi32>
      %cst_214 = arith.constant dense<2147483647> : vector<2x2xi32>
      %465 = vector.multi_reduction <minsi>, %464, %cst_214 [2] : vector<2x2x16xi32> to vector<2x2xi32>
      %466 = vector.shape_cast %465 : vector<2x2xi32> to vector<2x2x1xi32>
      %467 = vector.broadcast %466 : vector<2x2x1xi32> to vector<2x2x16xi32>
      %468 = arith.cmpi eq, %297, %467 : vector<2x2x16xi32>
      %469 = arith.extui %468 : vector<2x2x16xi1> to vector<2x2x16xi32>
      %470 = arith.sitofp %469 : vector<2x2x16xi32> to vector<2x2x16xf32>
      %471 = arith.index_cast %c8_i32_211 : i32 to index
      %c0_215 = arith.constant 0 : index
      %c0_216 = arith.constant 0 : index
      %c0_217 = arith.constant 0 : index
      %472 = vector.load %arg14[%471, %c0_215, %c0_216, %c0_217] : memref<10x2x2x16xf32, #tpu.memory_space<vmem>>, vector<1x2x2x16xf32>
      %473 = vector.shape_cast %472 : vector<1x2x2x16xf32> to vector<2x2x16xf32>
      %474 = vector.shape_cast %470 : vector<2x2x16xf32> to vector<1x2x2x16xf32>
      tpu.vector_store %arg14[%471, %c0_215, %c0_216, %c0_217], %474 {strides = array<i32>} : memref<10x2x2x16xf32, #tpu.memory_space<vmem>>, vector<1x2x2x16xf32>,
      %cst_218 = arith.constant 1.000000e+00 : f32
      %475 = vector.broadcast %cst_218 : f32 to vector<2x2x16xf32>
      %476 = arith.select %468, %475, %456 : vector<2x2x16xi1>, vector<2x2x16xf32>
      %cst_219 = arith.constant -1.000000e+30 : f32
      %477 = vector.broadcast %cst_219 : f32 to vector<2x2x16xf32>
      %478 = arith.select %468, %477, %458 : vector<2x2x16xi1>, vector<2x2x16xf32>
      %c9_i32_220 = arith.constant 9 : i32
      %cst_221 = arith.constant dense<0xFF800000> : vector<2x2xf32>
      %479 = vector.multi_reduction <maximumf>, %478, %cst_221 [2] : vector<2x2x16xf32> to vector<2x2xf32>
      %480 = vector.shape_cast %479 : vector<2x2xf32> to vector<2x2x1xf32>
      %481 = vector.broadcast %480 : vector<2x2x1xf32> to vector<2x2x16xf32>
      %482 = arith.cmpf oge, %478, %481 : vector<2x2x16xf32>
      %c16_i32_222 = arith.constant 16 : i32
      %483 = vector.broadcast %c16_i32_222 : i32 to vector<2x2x16xi32>
      %484 = arith.select %482, %297, %483 : vector<2x2x16xi1>, vector<2x2x16xi32>
      %cst_223 = arith.constant dense<2147483647> : vector<2x2xi32>
      %485 = vector.multi_reduction <minsi>, %484, %cst_223 [2] : vector<2x2x16xi32> to vector<2x2xi32>
      %486 = vector.shape_cast %485 : vector<2x2xi32> to vector<2x2x1xi32>
      %487 = vector.broadcast %486 : vector<2x2x1xi32> to vector<2x2x16xi32>
      %488 = arith.cmpi eq, %297, %487 : vector<2x2x16xi32>
      %489 = arith.extui %488 : vector<2x2x16xi1> to vector<2x2x16xi32>
      %490 = arith.sitofp %489 : vector<2x2x16xi32> to vector<2x2x16xf32>
      %491 = arith.index_cast %c9_i32_220 : i32 to index
      %c0_224 = arith.constant 0 : index
      %c0_225 = arith.constant 0 : index
      %c0_226 = arith.constant 0 : index
      %492 = vector.load %arg14[%491, %c0_224, %c0_225, %c0_226] : memref<10x2x2x16xf32, #tpu.memory_space<vmem>>, vector<1x2x2x16xf32>
      %493 = vector.shape_cast %492 : vector<1x2x2x16xf32> to vector<2x2x16xf32>
      %494 = vector.shape_cast %490 : vector<2x2x16xf32> to vector<1x2x2x16xf32>
      tpu.vector_store %arg14[%491, %c0_224, %c0_225, %c0_226], %494 {strides = array<i32>} : memref<10x2x2x16xf32, #tpu.memory_space<vmem>>, vector<1x2x2x16xf32>,
      %cst_227 = arith.constant 1.000000e+00 : f32
      %495 = vector.broadcast %cst_227 : f32 to vector<2x2x16xf32>
      %496 = arith.select %488, %495, %476 : vector<2x2x16xi1>, vector<2x2x16xf32>
      %cst_228 = arith.constant -1.000000e+30 : f32
      %497 = vector.broadcast %cst_228 : f32 to vector<2x2x16xf32>
      %498 = arith.select %488, %497, %478 : vector<2x2x16xi1>, vector<2x2x16xf32>
      %c10_i32_229 = arith.constant 10 : i32
      %499 = vector.shape_cast %100 : vector<2x16xf32> to vector<2x1x16xf32>
      %500 = vector.broadcast %499 : vector<2x1x16xf32> to vector<2x2x16xf32>
      %501 = arith.mulf %500, %496 : vector<2x2x16xf32>
      %cst_230 = arith.constant dense<0.000000e+00> : vector<2x2xf32>
      %502 = vector.multi_reduction <add>, %501, %cst_230 [2] : vector<2x2x16xf32> to vector<2x2xf32>
      %c0_231 = arith.constant 0 : index
      %c0_232 = arith.constant 0 : index
      %503 = vector.load %arg12[%c0_231, %c0_232] : memref<2x2xf32, #tpu.memory_space<vmem>>, vector<2x2xf32>
      tpu.vector_store %arg12[%c0_231, %c0_232], %502 {strides = array<i32>} : memref<2x2xf32, #tpu.memory_space<vmem>>, vector<2x2xf32>,
      %504 = arith.truncf %496 : vector<2x2x16xf32> to vector<2x2x16xbf16>
      %c0_233 = arith.constant 0 : index
      %c0_234 = arith.constant 0 : index
      %c0_235 = arith.constant 0 : index
      %505 = vector.load %arg13[%c0_233, %c0_234, %c0_235] : memref<2x2x16xbf16, #tpu.memory_space<vmem>>, vector<2x2x16xbf16>
      tpu.vector_store %arg13[%c0_233, %c0_234, %c0_235], %504 {strides = array<i32>} : memref<2x2x16xbf16, #tpu.memory_space<vmem>>, vector<2x2x16xbf16>,
    } else {
    }
    %c0 = arith.constant 0 : index
    %c0_1 = arith.constant 0 : index
    %c0_2 = arith.constant 0 : index
    %3 = vector.load %arg9[%c0, %c0_1, %c0_2] : memref<2x8x32xf32, #tpu.memory_space<vmem>>, vector<2x8x32xf32>
    %cst = arith.constant dense<0xFF800000> : vector<2x32xf32>
    %4 = vector.multi_reduction <maximumf>, %3, %cst [1] : vector<2x8x32xf32> to vector<2x32xf32>
    %c0_3 = arith.constant 0 : index
    %c0_4 = arith.constant 0 : index
    %c0_5 = arith.constant 0 : index
    %5 = vector.load %arg10[%c0_3, %c0_4, %c0_5] : memref<2x16x32xf32, #tpu.memory_space<vmem>>, vector<2x16x32xf32>
    %cst_6 = arith.constant 0.000000e+00 : f32
    %6 = vector.broadcast %cst_6 : f32 to vector<2x2x32xf32>
    %c0_i32_7 = arith.constant 0 : i32
    %7 = arith.index_cast %c0_i32_7 : i32 to index
    %c0_8 = arith.constant 0 : index
    %c0_9 = arith.constant 0 : index
    %c0_10 = arith.constant 0 : index
    %8 = vector.load %arg14[%7, %c0_8, %c0_9, %c0_10] : memref<10x2x2x16xf32, #tpu.memory_space<vmem>>, vector<1x2x2x16xf32>
    %9 = vector.shape_cast %8 : vector<1x2x2x16xf32> to vector<2x2x16xf32>
    "tpu.trace_start"() <{level = 10 : i32, message = "bsl,blv->bsv"}> : () -> ()
    %cst_11 = arith.constant dense<0.000000e+00> : vector<2x2x32xf32>
    %10 = tpu.matmul %9, %5, %cst_11 {dimension_numbers = #tpu.dot_dimension_numbers<[2], [1], [1], [2], [0, 0, 0, 1, 1, 2], [0], [0]>, precision = #tpu.contract_precision<fp32>} : vector<2x2x16xf32>, vector<2x16x32xf32>, vector<2x2x32xf32> -> vector<2x2x32xf32>
    "tpu.trace_stop"() : () -> ()
    %11 = arith.maximumf %6, %10 : vector<2x2x32xf32>
    %c1_i32 = arith.constant 1 : i32
    %12 = arith.index_cast %c1_i32 : i32 to index
    %c0_12 = arith.constant 0 : index
    %c0_13 = arith.constant 0 : index
    %c0_14 = arith.constant 0 : index
    %13 = vector.load %arg14[%12, %c0_12, %c0_13, %c0_14] : memref<10x2x2x16xf32, #tpu.memory_space<vmem>>, vector<1x2x2x16xf32>
    %14 = vector.shape_cast %13 : vector<1x2x2x16xf32> to vector<2x2x16xf32>
    "tpu.trace_start"() <{level = 10 : i32, message = "bsl,blv->bsv"}> : () -> ()
    %cst_15 = arith.constant dense<0.000000e+00> : vector<2x2x32xf32>
    %15 = tpu.matmul %14, %5, %cst_15 {dimension_numbers = #tpu.dot_dimension_numbers<[2], [1], [1], [2], [0, 0, 0, 1, 1, 2], [0], [0]>, precision = #tpu.contract_precision<fp32>} : vector<2x2x16xf32>, vector<2x16x32xf32>, vector<2x2x32xf32> -> vector<2x2x32xf32>
    "tpu.trace_stop"() : () -> ()
    %16 = arith.maximumf %11, %15 : vector<2x2x32xf32>
    %c2_i32 = arith.constant 2 : i32
    %17 = arith.index_cast %c2_i32 : i32 to index
    %c0_16 = arith.constant 0 : index
    %c0_17 = arith.constant 0 : index
    %c0_18 = arith.constant 0 : index
    %18 = vector.load %arg14[%17, %c0_16, %c0_17, %c0_18] : memref<10x2x2x16xf32, #tpu.memory_space<vmem>>, vector<1x2x2x16xf32>
    %19 = vector.shape_cast %18 : vector<1x2x2x16xf32> to vector<2x2x16xf32>
    "tpu.trace_start"() <{level = 10 : i32, message = "bsl,blv->bsv"}> : () -> ()
    %cst_19 = arith.constant dense<0.000000e+00> : vector<2x2x32xf32>
    %20 = tpu.matmul %19, %5, %cst_19 {dimension_numbers = #tpu.dot_dimension_numbers<[2], [1], [1], [2], [0, 0, 0, 1, 1, 2], [0], [0]>, precision = #tpu.contract_precision<fp32>} : vector<2x2x16xf32>, vector<2x16x32xf32>, vector<2x2x32xf32> -> vector<2x2x32xf32>
    "tpu.trace_stop"() : () -> ()
    %21 = arith.maximumf %16, %20 : vector<2x2x32xf32>
    %c3_i32 = arith.constant 3 : i32
    %22 = arith.index_cast %c3_i32 : i32 to index
    %c0_20 = arith.constant 0 : index
    %c0_21 = arith.constant 0 : index
    %c0_22 = arith.constant 0 : index
    %23 = vector.load %arg14[%22, %c0_20, %c0_21, %c0_22] : memref<10x2x2x16xf32, #tpu.memory_space<vmem>>, vector<1x2x2x16xf32>
    %24 = vector.shape_cast %23 : vector<1x2x2x16xf32> to vector<2x2x16xf32>
    "tpu.trace_start"() <{level = 10 : i32, message = "bsl,blv->bsv"}> : () -> ()
    %cst_23 = arith.constant dense<0.000000e+00> : vector<2x2x32xf32>
    %25 = tpu.matmul %24, %5, %cst_23 {dimension_numbers = #tpu.dot_dimension_numbers<[2], [1], [1], [2], [0, 0, 0, 1, 1, 2], [0], [0]>, precision = #tpu.contract_precision<fp32>} : vector<2x2x16xf32>, vector<2x16x32xf32>, vector<2x2x32xf32> -> vector<2x2x32xf32>
    "tpu.trace_stop"() : () -> ()
    %26 = arith.maximumf %21, %25 : vector<2x2x32xf32>
    %c4_i32 = arith.constant 4 : i32
    %27 = arith.index_cast %c4_i32 : i32 to index
    %c0_24 = arith.constant 0 : index
    %c0_25 = arith.constant 0 : index
    %c0_26 = arith.constant 0 : index
    %28 = vector.load %arg14[%27, %c0_24, %c0_25, %c0_26] : memref<10x2x2x16xf32, #tpu.memory_space<vmem>>, vector<1x2x2x16xf32>
    %29 = vector.shape_cast %28 : vector<1x2x2x16xf32> to vector<2x2x16xf32>
    "tpu.trace_start"() <{level = 10 : i32, message = "bsl,blv->bsv"}> : () -> ()
    %cst_27 = arith.constant dense<0.000000e+00> : vector<2x2x32xf32>
    %30 = tpu.matmul %29, %5, %cst_27 {dimension_numbers = #tpu.dot_dimension_numbers<[2], [1], [1], [2], [0, 0, 0, 1, 1, 2], [0], [0]>, precision = #tpu.contract_precision<fp32>} : vector<2x2x16xf32>, vector<2x16x32xf32>, vector<2x2x32xf32> -> vector<2x2x32xf32>
    "tpu.trace_stop"() : () -> ()
    %31 = arith.maximumf %26, %30 : vector<2x2x32xf32>
    %c5_i32 = arith.constant 5 : i32
    %32 = arith.index_cast %c5_i32 : i32 to index
    %c0_28 = arith.constant 0 : index
    %c0_29 = arith.constant 0 : index
    %c0_30 = arith.constant 0 : index
    %33 = vector.load %arg14[%32, %c0_28, %c0_29, %c0_30] : memref<10x2x2x16xf32, #tpu.memory_space<vmem>>, vector<1x2x2x16xf32>
    %34 = vector.shape_cast %33 : vector<1x2x2x16xf32> to vector<2x2x16xf32>
    "tpu.trace_start"() <{level = 10 : i32, message = "bsl,blv->bsv"}> : () -> ()
    %cst_31 = arith.constant dense<0.000000e+00> : vector<2x2x32xf32>
    %35 = tpu.matmul %34, %5, %cst_31 {dimension_numbers = #tpu.dot_dimension_numbers<[2], [1], [1], [2], [0, 0, 0, 1, 1, 2], [0], [0]>, precision = #tpu.contract_precision<fp32>} : vector<2x2x16xf32>, vector<2x16x32xf32>, vector<2x2x32xf32> -> vector<2x2x32xf32>
    "tpu.trace_stop"() : () -> ()
    %36 = arith.maximumf %31, %35 : vector<2x2x32xf32>
    %c6_i32 = arith.constant 6 : i32
    %37 = arith.index_cast %c6_i32 : i32 to index
    %c0_32 = arith.constant 0 : index
    %c0_33 = arith.constant 0 : index
    %c0_34 = arith.constant 0 : index
    %38 = vector.load %arg14[%37, %c0_32, %c0_33, %c0_34] : memref<10x2x2x16xf32, #tpu.memory_space<vmem>>, vector<1x2x2x16xf32>
    %39 = vector.shape_cast %38 : vector<1x2x2x16xf32> to vector<2x2x16xf32>
    "tpu.trace_start"() <{level = 10 : i32, message = "bsl,blv->bsv"}> : () -> ()
    %cst_35 = arith.constant dense<0.000000e+00> : vector<2x2x32xf32>
    %40 = tpu.matmul %39, %5, %cst_35 {dimension_numbers = #tpu.dot_dimension_numbers<[2], [1], [1], [2], [0, 0, 0, 1, 1, 2], [0], [0]>, precision = #tpu.contract_precision<fp32>} : vector<2x2x16xf32>, vector<2x16x32xf32>, vector<2x2x32xf32> -> vector<2x2x32xf32>
    "tpu.trace_stop"() : () -> ()
    %41 = arith.maximumf %36, %40 : vector<2x2x32xf32>
    %c7_i32 = arith.constant 7 : i32
    %42 = arith.index_cast %c7_i32 : i32 to index
    %c0_36 = arith.constant 0 : index
    %c0_37 = arith.constant 0 : index
    %c0_38 = arith.constant 0 : index
    %43 = vector.load %arg14[%42, %c0_36, %c0_37, %c0_38] : memref<10x2x2x16xf32, #tpu.memory_space<vmem>>, vector<1x2x2x16xf32>
    %44 = vector.shape_cast %43 : vector<1x2x2x16xf32> to vector<2x2x16xf32>
    "tpu.trace_start"() <{level = 10 : i32, message = "bsl,blv->bsv"}> : () -> ()
    %cst_39 = arith.constant dense<0.000000e+00> : vector<2x2x32xf32>
    %45 = tpu.matmul %44, %5, %cst_39 {dimension_numbers = #tpu.dot_dimension_numbers<[2], [1], [1], [2], [0, 0, 0, 1, 1, 2], [0], [0]>, precision = #tpu.contract_precision<fp32>} : vector<2x2x16xf32>, vector<2x16x32xf32>, vector<2x2x32xf32> -> vector<2x2x32xf32>
    "tpu.trace_stop"() : () -> ()
    %46 = arith.maximumf %41, %45 : vector<2x2x32xf32>
    %c8_i32 = arith.constant 8 : i32
    %47 = arith.index_cast %c8_i32 : i32 to index
    %c0_40 = arith.constant 0 : index
    %c0_41 = arith.constant 0 : index
    %c0_42 = arith.constant 0 : index
    %48 = vector.load %arg14[%47, %c0_40, %c0_41, %c0_42] : memref<10x2x2x16xf32, #tpu.memory_space<vmem>>, vector<1x2x2x16xf32>
    %49 = vector.shape_cast %48 : vector<1x2x2x16xf32> to vector<2x2x16xf32>
    "tpu.trace_start"() <{level = 10 : i32, message = "bsl,blv->bsv"}> : () -> ()
    %cst_43 = arith.constant dense<0.000000e+00> : vector<2x2x32xf32>
    %50 = tpu.matmul %49, %5, %cst_43 {dimension_numbers = #tpu.dot_dimension_numbers<[2], [1], [1], [2], [0, 0, 0, 1, 1, 2], [0], [0]>, precision = #tpu.contract_precision<fp32>} : vector<2x2x16xf32>, vector<2x16x32xf32>, vector<2x2x32xf32> -> vector<2x2x32xf32>
    "tpu.trace_stop"() : () -> ()
    %51 = arith.maximumf %46, %50 : vector<2x2x32xf32>
    %c9_i32 = arith.constant 9 : i32
    %52 = arith.index_cast %c9_i32 : i32 to index
    %c0_44 = arith.constant 0 : index
    %c0_45 = arith.constant 0 : index
    %c0_46 = arith.constant 0 : index
    %53 = vector.load %arg14[%52, %c0_44, %c0_45, %c0_46] : memref<10x2x2x16xf32, #tpu.memory_space<vmem>>, vector<1x2x2x16xf32>
    %54 = vector.shape_cast %53 : vector<1x2x2x16xf32> to vector<2x2x16xf32>
    "tpu.trace_start"() <{level = 10 : i32, message = "bsl,blv->bsv"}> : () -> ()
    %cst_47 = arith.constant dense<0.000000e+00> : vector<2x2x32xf32>
    %55 = tpu.matmul %54, %5, %cst_47 {dimension_numbers = #tpu.dot_dimension_numbers<[2], [1], [1], [2], [0, 0, 0, 1, 1, 2], [0], [0]>, precision = #tpu.contract_precision<fp32>} : vector<2x2x16xf32>, vector<2x16x32xf32>, vector<2x2x32xf32> -> vector<2x2x32xf32>
    "tpu.trace_stop"() : () -> ()
    %56 = arith.maximumf %51, %55 : vector<2x2x32xf32>
    %c10_i32 = arith.constant 10 : i32
    %57 = vector.shape_cast %4 : vector<2x32xf32> to vector<2x1x32xf32>
    %58 = vector.broadcast %57 : vector<2x1x32xf32> to vector<2x2x32xf32>
    %59 = arith.addf %58, %56 : vector<2x2x32xf32>
    %cst_48 = arith.constant 0.000000e+00 : f32
    %60 = vector.broadcast %cst_48 : f32 to vector<2x2x32xf32>
    %61 = arith.maximumf %59, %60 : vector<2x2x32xf32>
    %cst_49 = arith.constant 1.000000e+00 : f32
    %62 = vector.broadcast %cst_49 : f32 to vector<2x2x32xf32>
    %63 = arith.addf %62, %61 : vector<2x2x32xf32>
    %64 = math.log %63 : vector<2x2x32xf32>
    %c0_50 = arith.constant 0 : index
    %c0_51 = arith.constant 0 : index
    %c0_52 = arith.constant 0 : index
    %65 = vector.load %arg11[%c0_50, %c0_51, %c0_52] : memref<2x2x32xf32, #tpu.memory_space<vmem>>, vector<2x2x32xf32>
    tpu.vector_store %arg11[%c0_50, %c0_51, %c0_52], %64 {strides = array<i32>} : memref<2x2x32xf32, #tpu.memory_space<vmem>>, vector<2x2x32xf32>,
    return
  }
  func.func @transform_0(%arg0: i32, %arg1: i32) -> (i32, i32, i32) {
    %c0_i32 = arith.constant 0 : i32
    %c0_i32_0 = arith.constant 0 : i32
    %c0_i32_1 = arith.constant 0 : i32
    return %arg0, %c0_i32, %c0_i32_0 : i32, i32, i32
  }
  func.func @transform_1(%arg0: i32, %arg1: i32) -> (i32, i32, i32) {
    %c0_i32 = arith.constant 0 : i32
    %c0_i32_0 = arith.constant 0 : i32
    %c0_i32_1 = arith.constant 0 : i32
    return %arg0, %c0_i32, %c0_i32_0 : i32, i32, i32
  }
  func.func @transform_2(%arg0: i32, %arg1: i32) -> (i32, i32) {
    %c0_i32 = arith.constant 0 : i32
    %c0_i32_0 = arith.constant 0 : i32
    %c0_i32_1 = arith.constant 0 : i32
    return %c0_i32, %c0_i32_0 : i32, i32
  }
  func.func @transform_3(%arg0: i32, %arg1: i32) -> (i32, i32) {
    %c0_i32 = arith.constant 0 : i32
    %c0_i32_0 = arith.constant 0 : i32
    %c0_i32_1 = arith.constant 0 : i32
    return %c0_i32, %c0_i32_0 : i32, i32
  }
  func.func @transform_4(%arg0: i32, %arg1: i32) -> (i32, i32) {
    %c0_i32 = arith.constant 0 : i32
    %c0_i32_0 = arith.constant 0 : i32
    %c0_i32_1 = arith.constant 0 : i32
    return %c0_i32, %c0_i32_0 : i32, i32
  }
  func.func @transform_5(%arg0: i32, %arg1: i32) -> (i32, i32) {
    %c0_i32 = arith.constant 0 : i32
    %c0_i32_0 = arith.constant 0 : i32
    %c0_i32_1 = arith.constant 0 : i32
    return %c0_i32, %c0_i32_0 : i32, i32
  }
  func.func @transform_6(%arg0: i32, %arg1: i32) -> (i32, i32, i32) {
    %c0_i32 = arith.constant 0 : i32
    %c0_i32_0 = arith.constant 0 : i32
    %c0_i32_1 = arith.constant 0 : i32
    return %arg0, %c0_i32, %c0_i32_0 : i32, i32, i32
  }
  func.func @transform_7(%arg0: i32, %arg1: i32) -> (i32, i32, i32) {
    %c0_i32 = arith.constant 0 : i32
    %c0_i32_0 = arith.constant 0 : i32
    return %arg0, %c0_i32, %arg1 : i32, i32, i32
  }
  func.func @transform_8(%arg0: i32, %arg1: i32) -> (i32, i32, i32) {
    %c0_i32 = arith.constant 0 : i32
    %c0_i32_0 = arith.constant 0 : i32
    return %arg0, %c0_i32, %arg1 : i32, i32, i32
  }
  func.func @transform_9(%arg0: i32, %arg1: i32) -> (i32, i32, i32) {
    %c0_i32 = arith.constant 0 : i32
    %c0_i32_0 = arith.constant 0 : i32
    return %arg0, %c0_i32, %arg1 : i32, i32, i32
  }
  func.func @transform_10(%arg0: i32, %arg1: i32) -> (i32, i32) {
    %c0_i32 = arith.constant 0 : i32
    %c0_i32_0 = arith.constant 0 : i32
    return %arg0, %c0_i32 : i32, i32
  }
  func.func @transform_11(%arg0: i32, %arg1: i32) -> (i32, i32, i32) {
    %c0_i32 = arith.constant 0 : i32
    %c0_i32_0 = arith.constant 0 : i32
    %c0_i32_1 = arith.constant 0 : i32
    return %arg0, %c0_i32, %c0_i32_0 : i32, i32, i32
  }
}

</mosaic_0001>

<bundles_post_ra>
// kernel: tpu_custom_call.1
= control target key start
LH: loop header
LB: loop body
LE: loop exit
PB: predicated region body
PF: predicated region fallthrough
CT: control target
= control target key end

     0   :  { %17 = vsyncpa [#allocation4], 0  ;;  %s5993_s0 = inlined_call_operand.hbm [shape: f32[2,8,32], index: 0, kind: input, shape index: {}]   ;;  %s5994_s1 = inlined_call_operand.hbm [shape: f32[2,16,32], index: 1, kind: input, shape index: {}]   ;;  %s5995_s2 = inlined_call_operand.hbm [shape: f32[32,32], index: 2, kind: input, shape index: {}]   ;;  %s5996_s3 = inlined_call_operand.hbm [shape: f32[32,32], index: 3, kind: input, shape index: {}]   ;;  %s5997_s4 = inlined_call_operand.vmem [shape: f32[1,32], index: 4, kind: input, shape index: {}]   ;;  %s5998_s5 = inlined_call_operand.hbm [shape: f32[1,32], index: 5, kind: input, shape index: {}]   ;;  %s5999_s6 = inlined_call_operand.vmem [shape: f32[2,2,16], index: 6, kind: input, shape index: {}]   ;;  %s6000_s7 = inlined_call_operand.hbm [shape: f32[2,8,32], index: 7, kind: input, shape index: {}]   ;;  %s6001_s8 = inlined_call_operand.hbm [shape: f32[2,16,32], index: 8, kind: input, shape index: {}]   ;;  %s6002_s9 = inlined_call_operand.hbm [shape: f32[2,2,32], index: 9, kind: output, shape index: {0}]   ;;  %s6003_s10 = inlined_call_operand.hbm [shape: f32[2,2], index: 10, kind: output, shape index: {1}]   ;;  %s6004_s11 = inlined_call_operand.hbm [shape: bf16[2,2,16], index: 11, kind: output, shape index: {2}]  }
   0x1   :  { %18 = vsyncpa [#allocation7], 0 }
   0x2   :  { %19 = vsyncpa [#allocation10], 0 }
   0x3   :  { %20 = vsyncpa [#allocation13], 0 }
   0x4   :  { %21 = vsyncpa [#allocation5], 0 }
   0x5   :  { %22 = vsyncpa [#allocation17], 0  ;;  %s40_s19 = sshll.u32 %s5994_s1, 4  ;;  %s5025_s20 = smov [#allocation6]   ;;  %s41_s19 = int_to_ptr.hbm [resolvable:$true] %s40_s19 }
   0x6   :  { %s42_s21 = sshll.u32 %s5025_s20, 4  ;;  %s66_s24 = sshll.u32 %s5996_s3, 4  ;;  %s43_s21 = int_to_ptr.vmem [resolvable:$true] %s42_s21  ;;  %s67_s24 = int_to_ptr.hbm [resolvable:$true] %s66_s24 }
   0x7   :  { %s5026_s25 = smov 128   ;;  %s5027_s26 = smov 8  }
   0x8   :  { %48 = dma.hbm_to_vmem [thread:$0]  %s41_s19, 512, %s43_s21, [#allocation7], %s5026_s25, %s5026_s25, %s5027_s26  }
   0x9   :  { %s5028_s27 = smov [#allocation9]   ;;  %s94_s1 = sshll.u32 %s6000_s7, 4  ;;  %s95_s1 = int_to_ptr.hbm [resolvable:$true] %s94_s1 }
   0xa   :  { %s68_s28 = sshll.u32 %s5028_s27, 4  ;;  %s27_s13 = sshll.u32 %s5993_s0, 4  ;;  %s69_s28 = int_to_ptr.vmem [resolvable:$true] %s68_s28  ;;  %s28_s13 = int_to_ptr.hbm [resolvable:$true] %s27_s13 }
   0xb   :  { %74 = dma.hbm_to_vmem [thread:$0]  %s67_s24, 512, %s69_s28, [#allocation10], %s5026_s25, %s5026_s25, %s5027_s26  }
   0xc   :  { %s5029_s14 = smov [#allocation12]   ;;  %s5030_s16 = smov [#allocation3]  }
   0xd   :  { %s96_s15 = sshll.u32 %s5029_s14, 4  ;;  %s29_s7 = sshll.u32 %s5030_s16, 4  ;;  %s97_s15 = int_to_ptr.vmem [resolvable:$true] %s96_s15  ;;  %s30_s7 = int_to_ptr.vmem [resolvable:$true] %s29_s7 }
   0xe   :  { %102 = dma.hbm_to_vmem [thread:$0]  %s95_s1, 256, %s97_s15, [#allocation13], %s5026_s25, %s5026_s25, %s5027_s26  }
   0xf   :  { %s53_s19 = sshll.u32 %s5995_s2, 4  ;;  %s82_s21 = sshll.u32 %s5998_s5, 4  ;;  %s54_s19 = int_to_ptr.hbm [resolvable:$true] %s53_s19  ;;  %s83_s21 = int_to_ptr.hbm [resolvable:$true] %s82_s21 }
  0x10   :  { %35 = dma.hbm_to_vmem [thread:$0]  %s28_s13, 256, %s30_s7, [#allocation4], %s5026_s25, %s5026_s25, %s5027_s26  }
  0x11   :  { %s5031_s22 = smov [#allocation8]   ;;  %s5032_s24 = smov [#allocation11]  }
  0x12   :  { %s55_s23 = sshll.u32 %s5031_s22, 4  ;;  %s84_s2 = sshll.u32 %s5032_s24, 4  ;;  %s56_s23 = int_to_ptr.vmem [resolvable:$true] %s55_s23  ;;  %s85_s2 = int_to_ptr.vmem [resolvable:$true] %s84_s2 }
  0x13   :  { %61 = dma.hbm_to_vmem [thread:$0]  %s54_s19, 512, %s56_s23, [#allocation7], %s5026_s25, %s5026_s25, %s5027_s26  }
  0x14   :  { %s107_s29 = sshll.u32 %s6001_s8, 4  ;;  %s5033_s30 = smov [#allocation14]   ;;  %s108_s29 = int_to_ptr.hbm [resolvable:$true] %s107_s29 }
  0x15   :  { %87 = dma.hbm_to_vmem [thread:$0]  %s83_s21, 16, %s85_s2, [#allocation10]  }
  0x16   :  { %s109_s1 = sshll.u32 %s5033_s30, 4  ;;  %s110_s1 = int_to_ptr.vmem [resolvable:$true] %s109_s1 }
  0x17   :  { %115 = dma.hbm_to_vmem [thread:$0]  %s108_s29, 512, %s110_s1, [#allocation13], %s5026_s25, %s5026_s25, %s5027_s26  }
  0x18   :  { %5013 = dma.done.wait [#allocation4], 256  }
  0x19   :  { %5014 = vsyncadd [#allocation4], 4294967040 }
  0x1a   :  { %5015 = dma.done.wait [#allocation7], 1024  }
  0x1b   :  { %5016 = vsyncadd [#allocation7], 4294966272 }
  0x1c   :  { %5017 = dma.done.wait [#allocation10], 528  }
  0x1d   :  { %5018 = vsyncadd [#allocation10], 4294966768 }
  0x1e   :  { %5019 = dma.done.wait [#allocation13], 768  }
  0x1f   :  { %5020 = vsyncadd [#allocation13], 4294966528  ;;  %v188_v0 = vld [vmem:[#allocation9 + $0x10] sm:$0xff]  ;;  %v189_v1 = vld [vmem:[#allocation9 + $0x18] sm:$0xff]  ;;  %vm168_vm0 = vcmask 261120   ;;  %vm281_vm1 = vcmask 130048  }
  0x20   :  { %v186_v2 = vld [vmem:[#allocation9] sm:$0xff]  ;;  %v191_v3 = vpack.c.bf16 %v189_v1, %v188_v0  ;;  %v187_v4 = vld [vmem:[#allocation9 + $0x8] sm:$0xff]  ;;  %v160_v5 = vld [vmem:[#allocation8 + $0x10] sm:$0xff]  ;;  %vm301_vm2 = vcmask 123904   ;;  %s4564_s15 = sshll.u32 %s6003_s10, 4  ;;  %s5036_s16 = smov [#allocation18]   ;;  %s4565_s15 = int_to_ptr.hbm [resolvable:$true] %s4564_s15 }
  0x21   :  { %v161_v6 = vld [vmem:[#allocation8 + $0x18] sm:$0xff]  ;;  %v158_v7 = vld [vmem:[#allocation8] sm:$0xff]  ;;  %v190_v8 = vpack.c.bf16 %v187_v4, %v186_v2  ;;  %v153_v10 = vld [vmem:[#allocation6 + $0x8] sm:$0xff]  ;;  %s5973_s7 = sshll.u32 %s5036_s16, 4  ;;  %s4574_s19 = sshll.u32 %s6004_s11, 4  ;;  %s4573_s7 = int_to_ptr.vmem [resolvable:$true] %s5973_s7  ;;  %s4575_s19 = int_to_ptr.hbm [resolvable:$true] %s4574_s19 }
  0x22   :  { %208 = vmatpush.bf16.msra.mxu1 %v191_v3  ;;  %v152_v9 = vld [vmem:[#allocation6] sm:$0xff]  ;;  %v163_v11 = vpack.c.bf16 %v161_v6, %v160_v5  ;;  %v159_v12 = vld [vmem:[#allocation8 + $0x8] sm:$0xff]  ;;  %v149_v14 = vld [vmem:[#allocation3] sm:$0xff]  ;;  %s5037_s10 = smov 16   ;;  %s5038_s11 = smov 1  }
  0x23   :  { %v162_v13 = vpack.c.bf16 %v159_v12, %v158_v7  ;;  %v150_v15 = vld [vmem:[#allocation3 + $0x8] sm:$0xff]  ;;  %v156_v16 = vpack.c.bf16 %v153_v10, %v152_v9  ;;  %v154_v18 = vld [vmem:[#allocation6 + $0x10] sm:$0xff]  ;;  %v4645_v22 = vld [vmem:[#allocation11] ss:$0 sm:$0xff]  ;;  %s5039_s0 = smov [#allocation15]   ;;  %s4550_s23 = sshll.u32 %s6002_s9, 4  ;;  %s4551_s23 = int_to_ptr.hbm [resolvable:$true] %s4550_s23 }
  0x24   :  { %178 = vmatpush.bf16.msra.mxu0 %v163_v11  ;;  %v151_v17 = vpack.c.bf16 %v150_v15, %v149_v14  ;;  %v155_v19 = vld [vmem:[#allocation6 + $0x18] sm:$0xff]  ;;  %v4646_v25 = vld [vmem:[%s5997_s4] ss:$0 sm:$0xff]  ;;  %v333_v55 = vld [vmem:[%s5999_s6 + $0x2] sm:$0x3]  ;;  %s4548_s20 = sshll.u32 %s5039_s0, 4  ;;  %s4549_s20 = int_to_ptr.vmem [resolvable:$true] %s4548_s20 }
  0x25   :  { %v157_v20 = vpack.c.bf16 %v155_v19, %v154_v18  ;;  %v332_v43 = vld [vmem:[%s5999_s6] sm:$0x3]  ;;  %s5035_s6 = smov [#allocation16]   ;;  %s5040_s24 = smov 32  }
  0x26   :  { %209 = vmatpush.bf16.msra.mxu1 %v190_v8  ;;  %s5967_s12 = sshll.u32 %s5035_s6, 4  ;;  %s5041_s2 = smov 2   ;;  %s4563_s12 = int_to_ptr.vmem [resolvable:$true] %s5967_s12 }
  0x28   :  { %179 = vmatpush.bf16.msra.mxu0 %v162_v13 }
  0x29   :  { %4600 = vmatmul.msk.bf16.vlgmr.msra.gmra.mxu1 %vm168_vm0, %v156_v16 }
  0x2b   :  { %4599 = vmatmul.msk.bf16.vlgmr.msra.gmra.mxu0 %vm168_vm0, %v151_v17 }
  0x39   :  { %4601 = vmatmul.msk.bf16.gmra.mxu1 %vm168_vm0, %v157_v20 }
  0xa6   :  { %v211_v21 = vpop.f32.mrf.mxu1 }
  0xa7   :  { %v212_v27 = vadd.f32 %v4645_v22, %v211_v21 }
  0xa8   :  { %v181_v26 = vpop.f32.mrf.mxu0 }
  0xa9   :  { %v182_v28 = vadd.f32 %v4646_v25, %v181_v26 }
  0xae   :  { %v213_v23 = vpop.f32.mrf.mxu1 }
  0xaf   :  { %v214_v24 = vadd.f32 %v4645_v22, %v213_v23 }
  0xb0   :  { %v183_v33 = vpop.f32.mrf.mxu0 }
  0xb1   :  { %4602 = vmatpush.xpose.msk.msra.mxu2 %vm168_vm0, %v214_v24  ;;  %v184_v34 = vadd.f32 %v4646_v25, %v183_v33 }
  0xb5   :  { %4603 = vmatpush.xpose.msk.msra.mxu2 %vm168_vm0, %v212_v27 }
  0xb6   :  { %v216_v29 = vpop.f32.mrf.mxu1 }
  0xb7   :  { %v217_v32 = vadd.f32 %v4645_v22, %v216_v29 }
  0xb8   :  { %4604 = vmatmul.msk.f32.vlgmr.msra.gmra.mxu2 %vm168_vm0, %v182_v28 }
  0xbe   :  { %v218_v30 = vpop.f32.mrf.mxu1 }
  0xbf   :  { %v219_v31 = vadd.f32 %v4645_v22, %v218_v30 }
  0xc1   :  { %4605 = vmatpush.xpose.msk.msra.mxu3 %vm168_vm0, %v219_v31 }
  0xc5   :  { %4606 = vmatpush.xpose.msk.msra.mxu3 %vm168_vm0, %v217_v32 }
  0xc8   :  { %4607 = vmatmul.msk.f32.vlgmr.msra.gmra.mxu3 %vm168_vm0, %v184_v34 }
 0x13b   :  { %v247_v35 = vpop.f32.mrf.mxu2 }
 0x13c   :  { %v279_v36 = vmul.f32 0.088388346, %v247_v35 }
 0x13e   :  { %v282_v37 = vsel %vm281_vm1, %v279_v36, -inf }
 0x13f   :  { %v283_v38 = vrot.slane %v282_v37, 4 }
 0x141   :  { %v284_v39 = vmax.f32 %v282_v37, %v283_v38 }
 0x143   :  { %v285_v40 = vrot.slane %v284_v39, 2 }
 0x145   :  { %v286_v41 = vmax.f32 %v284_v39, %v285_v40 }
 0x147   :  { %v287_v42 = vrot.slane %v286_v41, 1 }
 0x149   :  { %v5157_v44 = vmax.f32 %v286_v41, %v287_v42 }
 0x14b   :  { %6011 = vst [vmem:[#allocation25_spill] sm:$0xff] %v5157_v44  ;;  %v276_v45 = vpop.f32.mrf.mxu3  ;;  %v334_v46 = vadd.f32 %v332_v43, %v5157_v44 }
 0x14c   :  { %v280_v47 = vmul.f32 0.088388346, %v276_v45 }
 0x14d   :  { %v338_v48 = vsel %vm301_vm2, %v334_v46, -inf }
 0x14e   :  { %v289_v49 = vsel %vm281_vm1, %v280_v47, -inf  ;;  %339 = vmax.xlane.f32.xlu0 %v338_v48 }
 0x14f   :  { %v290_v50 = vrot.slane %v289_v49, 4 }
 0x151   :  { %v291_v51 = vmax.f32 %v289_v49, %v290_v50 }
 0x153   :  { %v292_v52 = vrot.slane %v291_v51, 2 }
 0x155   :  { %v293_v53 = vmax.f32 %v291_v51, %v292_v52 }
 0x157   :  { %v294_v54 = vrot.slane %v293_v53, 1 }
 0x159   :  { %v5165_v56 = vmax.f32 %v293_v53, %v294_v54 }
 0x15b   :  { %6012 = vst [vmem:[#allocation26_spill] sm:$0xff] %v5165_v56  ;;  %v335_v57 = vadd.f32 %v333_v55, %v5165_v56 }
 0x15d   :  { %v341_v58 = vsel %vm301_vm2, %v335_v57, -inf }
 0x15e   :  { %342 = vmax.xlane.f32.xlu0 %v341_v58 }
 0x1c1   :  { %v340_v59 = vpop.xlane.xlu0 %339 }
 0x1c2   :  { %v344_v60 = vsub.f32 %v334_v46, %v340_v59 }
 0x1c4   :  { %v346_v61 = vmul.f32 1.442695, %v344_v60 }
 0x1c6   :  { %4647 = vpow2.f32 %v346_v61 }
 0x1cc   :  { %v4648_v62 = vpop.eup %4647 }
 0x1cd   :  { %v350_v63 = vsel %vm301_vm2, %v4648_v62, 0.0 }
 0x1ce   :  { %351 = vadd.xlane.f32.xlu1 %v350_v63 }
 0x1d1   :  { %v343_v0 = vpop.xlane.xlu0 %342 }
 0x1d2   :  { %v345_v1 = vsub.f32 %v335_v57, %v343_v0 }
 0x1d4   :  { %v348_v2 = vmul.f32 1.442695, %v345_v1 }
 0x1d6   :  { %4649 = vpow2.f32 %v348_v2 }
 0x1dc   :  { %v4650_v3 = vpop.eup %4649 }
 0x1dd   :  { %v353_v4 = vsel %vm301_vm2, %v4650_v3, 0.0 }
 0x1de   :  { %354 = vadd.xlane.f32.xlu1 %v353_v4 }
 0x241   :  { %v352_v5 = vpop.xlane.xlu1 %351 }
 0x242   :  { %4651 = vrcp.f32 %v352_v5 }
 0x248   :  { %v4652_v6 = vpop.eup %4651 }
 0x249   :  { %v5171_v7 = vmul.f32 %v4652_v6, %v4648_v62 }
 0x24b   :  { %v362_v8 = vsub.f32 1.0, %v5171_v7 }
 0x24d   :  { %v364_v9 = vmax.f32 %v362_v8, 1e-20 }
 0x24f   :  { %4653 = vlog2.f32 %v364_v9 }
 0x251   :  { %v355_v10 = vpop.xlane.xlu1 %354 }
 0x252   :  { %4655 = vrcp.f32 %v355_v10 }
 0x255   :  { %v4654_v11 = vpop.eup %4653 }
 0x256   :  { %v367_v12 = vmul.f32 0.6931472, %v4654_v11 }
 0x258   :  { %v4656_v13 = vpop.eup %4655  ;;  %v370_v14 = vadd.f32 %v367_v12, %v334_v46 }
 0x259   :  { %v5174_v15 = vmul.f32 %v4656_v13, %v4650_v3 }
 0x25a   :  { %v372_v16 = vsel %vm301_vm2, %v370_v14, -inf }
 0x25b   :  { %v363_v17 = vsub.f32 1.0, %v5174_v15  ;;  %373 = vmax.xlane.f32.xlu2 %v372_v16 }
 0x25d   :  { %v365_v18 = vmax.f32 %v363_v17, 1e-20 }
 0x25f   :  { %4657 = vlog2.f32 %v365_v18 }
 0x265   :  { %v4658_v19 = vpop.eup %4657 }
 0x266   :  { %v369_v20 = vmul.f32 0.6931472, %v4658_v19 }
 0x268   :  { %v371_v21 = vadd.f32 %v369_v20, %v335_v57 }
 0x26a   :  { %v375_v22 = vsel %vm301_vm2, %v371_v21, -inf }
 0x26b   :  { %376 = vmax.xlane.f32.xlu2 %v375_v22 }
 0x2ce   :  { %v374_v23 = vpop.xlane.xlu2 %373 }
 0x2cf   :  { %v378_v24 = vsub.f32 %v370_v14, %v374_v23 }
 0x2d1   :  { %v380_v25 = vmul.f32 1.442695, %v378_v24 }
 0x2d3   :  { %4659 = vpow2.f32 %v380_v25 }
 0x2d9   :  { %v4660_v26 = vpop.eup %4659 }
 0x2da   :  { %v384_v27 = vsel %vm301_vm2, %v4660_v26, 0.0 }
 0x2db   :  { %385 = vadd.xlane.f32.xlu0 %v384_v27 }
 0x2de   :  { %v377_v28 = vpop.xlane.xlu2 %376 }
 0x2df   :  { %v379_v29 = vsub.f32 %v371_v21, %v377_v28 }
 0x2e1   :  { %v382_v30 = vmul.f32 1.442695, %v379_v29 }
 0x2e3   :  { %4661 = vpow2.f32 %v382_v30 }
 0x2e9   :  { %v4662_v31 = vpop.eup %4661 }
 0x2ea   :  { %v387_v32 = vsel %vm301_vm2, %v4662_v31, 0.0 }
 0x2eb   :  { %388 = vadd.xlane.f32.xlu1 %v387_v32 }
 0x34e   :  { %v386_v33 = vpop.xlane.xlu0 %385 }
 0x34f   :  { %4663 = vrcp.f32 %v386_v33 }
 0x355   :  { %v4664_v34 = vpop.eup %4663 }
 0x356   :  { %v392_v35 = vmul.f32 %v4664_v34, %v4660_v26 }
 0x358   :  { %v396_v36 = vsub.f32 1.0, %v392_v35  ;;  %v394_v1 = vadd.f32 %v392_v35, %v5171_v7 }
 0x35a   :  { %v398_v37 = vmax.f32 %v396_v36, 1e-20 }
 0x35c   :  { %4665 = vlog2.f32 %v398_v37 }
 0x35e   :  { %v389_v38 = vpop.xlane.xlu1 %388 }
 0x35f   :  { %4667 = vrcp.f32 %v389_v38 }
 0x362   :  { %v4666_v39 = vpop.eup %4665 }
 0x363   :  { %v401_v40 = vmul.f32 0.6931472, %v4666_v39 }
 0x365   :  { %v4668_v41 = vpop.eup %4667  ;;  %v404_v42 = vadd.f32 %v401_v40, %v370_v14 }
 0x366   :  { %v393_v43 = vmul.f32 %v4668_v41, %v4662_v31 }
 0x367   :  { %v406_v45 = vsel %vm301_vm2, %v404_v42, -inf }
 0x368   :  { %v397_v46 = vsub.f32 1.0, %v393_v43  ;;  %407 = vmax.xlane.f32.xlu2 %v406_v45  ;;  %v395_v12 = vadd.f32 %v393_v43, %v5174_v15 }
 0x36a   :  { %v399_v47 = vmax.f32 %v397_v46, 1e-20 }
 0x36c   :  { %4669 = vlog2.f32 %v399_v47 }
 0x372   :  { %v4670_v48 = vpop.eup %4669 }
 0x373   :  { %v403_v49 = vmul.f32 0.6931472, %v4670_v48 }
 0x375   :  { %v405_v50 = vadd.f32 %v403_v49, %v371_v21 }
 0x377   :  { %v409_v51 = vsel %vm301_vm2, %v405_v50, -inf }
 0x378   :  { %410 = vmax.xlane.f32.xlu0 %v409_v51 }
 0x3db   :  { %v408_v52 = vpop.xlane.xlu2 %407 }
 0x3dc   :  { %v412_v53 = vsub.f32 %v404_v42, %v408_v52 }
 0x3de   :  { %v414_v54 = vmul.f32 1.442695, %v412_v53 }
 0x3e0   :  { %4671 = vpow2.f32 %v414_v54 }
 0x3e6   :  { %v4672_v55 = vpop.eup %4671 }
 0x3e7   :  { %v418_v57 = vsel %vm301_vm2, %v4672_v55, 0.0 }
 0x3e8   :  { %419 = vadd.xlane.f32.xlu1 %v418_v57 }
 0x3eb   :  { %v411_v58 = vpop.xlane.xlu0 %410 }
 0x3ec   :  { %v413_v59 = vsub.f32 %v405_v50, %v411_v58 }
 0x3ee   :  { %v416_v60 = vmul.f32 1.442695, %v413_v59 }
 0x3f0   :  { %4673 = vpow2.f32 %v416_v60 }
 0x3f6   :  { %v4674_v61 = vpop.eup %4673 }
 0x3f7   :  { %v421_v62 = vsel %vm301_vm2, %v4674_v61, 0.0 }
 0x3f8   :  { %422 = vadd.xlane.f32.xlu2 %v421_v62 }
 0x45b   :  { %v420_v63 = vpop.xlane.xlu1 %419 }
 0x45c   :  { %4675 = vrcp.f32 %v420_v63 }
 0x462   :  { %v4676_v0 = vpop.eup %4675 }
 0x463   :  { %v426_v2 = vmul.f32 %v4676_v0, %v4672_v55 }
 0x465   :  { %v428_v3 = vadd.f32 %v426_v2, %v394_v1  ;;  %v430_v4 = vsub.f32 1.0, %v426_v2 }
 0x467   :  { %v432_v5 = vmax.f32 %v430_v4, 1e-20 }
 0x469   :  { %4677 = vlog2.f32 %v432_v5 }
 0x46b   :  { %v423_v6 = vpop.xlane.xlu2 %422 }
 0x46c   :  { %4679 = vrcp.f32 %v423_v6 }
 0x46f   :  { %v4678_v8 = vpop.eup %4677 }
 0x470   :  { %v435_v9 = vmul.f32 0.6931472, %v4678_v8 }
 0x472   :  { %v4680_v10 = vpop.eup %4679  ;;  %v438_v11 = vadd.f32 %v435_v9, %v404_v42 }
 0x473   :  { %v427_v13 = vmul.f32 %v4680_v10, %v4674_v61 }
 0x474   :  { %v440_v14 = vsel %vm301_vm2, %v438_v11, -inf }
 0x475   :  { %v429_v16 = vadd.f32 %v427_v13, %v395_v12  ;;  %v431_v17 = vsub.f32 1.0, %v427_v13  ;;  %441 = vmax.xlane.f32.xlu0 %v440_v14 }
 0x477   :  { %v433_v7 = vmax.f32 %v431_v17, 1e-20 }
 0x479   :  { %4681 = vlog2.f32 %v433_v7 }
 0x47f   :  { %v4682_v18 = vpop.eup %4681 }
 0x480   :  { %v437_v19 = vmul.f32 0.6931472, %v4682_v18 }
 0x482   :  { %v439_v20 = vadd.f32 %v437_v19, %v405_v50 }
 0x484   :  { %v443_v21 = vsel %vm301_vm2, %v439_v20, -inf }
 0x485   :  { %444 = vmax.xlane.f32.xlu1 %v443_v21 }
 0x4e8   :  { %v442_v22 = vpop.xlane.xlu0 %441 }
 0x4e9   :  { %v446_v23 = vsub.f32 %v438_v11, %v442_v22 }
 0x4eb   :  { %v448_v24 = vmul.f32 1.442695, %v446_v23 }
 0x4ed   :  { %4683 = vpow2.f32 %v448_v24 }
 0x4f3   :  { %v4684_v25 = vpop.eup %4683 }
 0x4f4   :  { %v452_v15 = vsel %vm301_vm2, %v4684_v25, 0.0 }
 0x4f5   :  { %453 = vadd.xlane.f32.xlu2 %v452_v15 }
 0x4f8   :  { %v445_v26 = vpop.xlane.xlu1 %444 }
 0x4f9   :  { %v447_v27 = vsub.f32 %v439_v20, %v445_v26 }
 0x4fb   :  { %v450_v28 = vmul.f32 1.442695, %v447_v27 }
 0x4fd   :  { %4685 = vpow2.f32 %v450_v28 }
 0x503   :  { %v4686_v29 = vpop.eup %4685 }
 0x504   :  { %v455_v30 = vsel %vm301_vm2, %v4686_v29, 0.0 }
 0x505   :  { %456 = vadd.xlane.f32.xlu0 %v455_v30 }
 0x568   :  { %v454_v31 = vpop.xlane.xlu2 %453 }
 0x569   :  { %4687 = vrcp.f32 %v454_v31 }
 0x56f   :  { %v4688_v32 = vpop.eup %4687 }
 0x570   :  { %v460_v33 = vmul.f32 %v4688_v32, %v4684_v25 }
 0x572   :  { %v462_v34 = vadd.f32 %v460_v33, %v428_v3  ;;  %v464_v35 = vsub.f32 1.0, %v460_v33 }
 0x574   :  { %v466_v36 = vmax.f32 %v464_v35, 1e-20 }
 0x576   :  { %4689 = vlog2.f32 %v466_v36 }
 0x578   :  { %v457_v37 = vpop.xlane.xlu0 %456 }
 0x579   :  { %4691 = vrcp.f32 %v457_v37 }
 0x57c   :  { %v4690_v38 = vpop.eup %4689 }
 0x57d   :  { %v469_v39 = vmul.f32 0.6931472, %v4690_v38 }
 0x57f   :  { %v4692_v40 = vpop.eup %4691  ;;  %v472_v41 = vadd.f32 %v469_v39, %v438_v11 }
 0x580   :  { %v461_v42 = vmul.f32 %v4692_v40, %v4686_v29 }
 0x581   :  { %v474_v43 = vsel %vm301_vm2, %v472_v41, -inf }
 0x582   :  { %v463_v45 = vadd.f32 %v461_v42, %v429_v16  ;;  %v465_v46 = vsub.f32 1.0, %v461_v42  ;;  %475 = vmax.xlane.f32.xlu1 %v474_v43 }
 0x584   :  { %v467_v47 = vmax.f32 %v465_v46, 1e-20 }
 0x586   :  { %4693 = vlog2.f32 %v467_v47 }
 0x58c   :  { %v4694_v48 = vpop.eup %4693 }
 0x58d   :  { %v471_v49 = vmul.f32 0.6931472, %v4694_v48 }
 0x58f   :  { %v473_v50 = vadd.f32 %v471_v49, %v439_v20 }
 0x591   :  { %v477_v51 = vsel %vm301_vm2, %v473_v50, -inf }
 0x592   :  { %478 = vmax.xlane.f32.xlu2 %v477_v51 }
 0x5f5   :  { %v476_v52 = vpop.xlane.xlu1 %475 }
 0x5f6   :  { %v480_v53 = vsub.f32 %v472_v41, %v476_v52 }
 0x5f8   :  { %v482_v54 = vmul.f32 1.442695, %v480_v53 }
 0x5fa   :  { %4695 = vpow2.f32 %v482_v54 }
 0x600   :  { %v4696_v55 = vpop.eup %4695 }
 0x601   :  { %v486_v57 = vsel %vm301_vm2, %v4696_v55, 0.0 }
 0x602   :  { %487 = vadd.xlane.f32.xlu0 %v486_v57 }
 0x605   :  { %v479_v58 = vpop.xlane.xlu2 %478 }
 0x606   :  { %v481_v59 = vsub.f32 %v473_v50, %v479_v58 }
 0x608   :  { %v484_v60 = vmul.f32 1.442695, %v481_v59 }
 0x60a   :  { %4697 = vpow2.f32 %v484_v60 }
 0x610   :  { %v4698_v61 = vpop.eup %4697 }
 0x611   :  { %v489_v62 = vsel %vm301_vm2, %v4698_v61, 0.0 }
 0x612   :  { %490 = vadd.xlane.f32.xlu1 %v489_v62 }
 0x675   :  { %v488_v63 = vpop.xlane.xlu0 %487 }
 0x676   :  { %4699 = vrcp.f32 %v488_v63 }
 0x67c   :  { %v4700_v0 = vpop.eup %4699 }
 0x67d   :  { %v494_v1 = vmul.f32 %v4700_v0, %v4696_v55 }
 0x67f   :  { %v496_v2 = vadd.f32 %v494_v1, %v462_v34  ;;  %v498_v3 = vsub.f32 1.0, %v494_v1 }
 0x681   :  { %v500_v4 = vmax.f32 %v498_v3, 1e-20 }
 0x683   :  { %4701 = vlog2.f32 %v500_v4 }
 0x685   :  { %v491_v5 = vpop.xlane.xlu1 %490 }
 0x686   :  { %4703 = vrcp.f32 %v491_v5 }
 0x689   :  { %v4702_v6 = vpop.eup %4701 }
 0x68a   :  { %v503_v8 = vmul.f32 0.6931472, %v4702_v6 }
 0x68c   :  { %v4704_v9 = vpop.eup %4703  ;;  %v506_v10 = vadd.f32 %v503_v8, %v472_v41 }
 0x68d   :  { %v495_v11 = vmul.f32 %v4704_v9, %v4698_v61 }
 0x68e   :  { %v508_v12 = vsel %vm301_vm2, %v506_v10, -inf }
 0x68f   :  { %v497_v13 = vadd.f32 %v495_v11, %v463_v45  ;;  %v499_v14 = vsub.f32 1.0, %v495_v11  ;;  %509 = vmax.xlane.f32.xlu2 %v508_v12 }
 0x691   :  { %v501_v16 = vmax.f32 %v499_v14, 1e-20 }
 0x693   :  { %4705 = vlog2.f32 %v501_v16 }
 0x699   :  { %v4706_v17 = vpop.eup %4705 }
 0x69a   :  { %v505_v7 = vmul.f32 0.6931472, %v4706_v17 }
 0x69c   :  { %v507_v18 = vadd.f32 %v505_v7, %v473_v50 }
 0x69e   :  { %v511_v19 = vsel %vm301_vm2, %v507_v18, -inf }
 0x69f   :  { %512 = vmax.xlane.f32.xlu0 %v511_v19 }
 0x702   :  { %v510_v20 = vpop.xlane.xlu2 %509 }
 0x703   :  { %v514_v21 = vsub.f32 %v506_v10, %v510_v20 }
 0x705   :  { %v516_v22 = vmul.f32 1.442695, %v514_v21 }
 0x707   :  { %4707 = vpow2.f32 %v516_v22 }
 0x70d   :  { %v4708_v23 = vpop.eup %4707 }
 0x70e   :  { %v520_v24 = vsel %vm301_vm2, %v4708_v23, 0.0 }
 0x70f   :  { %521 = vadd.xlane.f32.xlu1 %v520_v24 }
 0x712   :  { %v513_v25 = vpop.xlane.xlu0 %512 }
 0x713   :  { %v515_v15 = vsub.f32 %v507_v18, %v513_v25 }
 0x715   :  { %v518_v26 = vmul.f32 1.442695, %v515_v15 }
 0x717   :  { %4709 = vpow2.f32 %v518_v26 }
 0x71d   :  { %v4710_v27 = vpop.eup %4709 }
 0x71e   :  { %v523_v28 = vsel %vm301_vm2, %v4710_v27, 0.0 }
 0x71f   :  { %524 = vadd.xlane.f32.xlu2 %v523_v28 }
 0x782   :  { %v522_v29 = vpop.xlane.xlu1 %521 }
 0x783   :  { %4711 = vrcp.f32 %v522_v29 }
 0x789   :  { %v4712_v30 = vpop.eup %4711 }
 0x78a   :  { %v528_v31 = vmul.f32 %v4712_v30, %v4708_v23 }
 0x78c   :  { %v530_v32 = vadd.f32 %v528_v31, %v496_v2  ;;  %v532_v33 = vsub.f32 1.0, %v528_v31 }
 0x78e   :  { %v534_v34 = vmax.f32 %v532_v33, 1e-20 }
 0x790   :  { %4713 = vlog2.f32 %v534_v34 }
 0x792   :  { %v525_v35 = vpop.xlane.xlu2 %524 }
 0x793   :  { %4715 = vrcp.f32 %v525_v35 }
 0x796   :  { %v4714_v36 = vpop.eup %4713 }
 0x797   :  { %v537_v37 = vmul.f32 0.6931472, %v4714_v36 }
 0x799   :  { %v4716_v38 = vpop.eup %4715  ;;  %v540_v39 = vadd.f32 %v537_v37, %v506_v10 }
 0x79a   :  { %v529_v40 = vmul.f32 %v4716_v38, %v4710_v27 }
 0x79b   :  { %v542_v41 = vsel %vm301_vm2, %v540_v39, -inf }
 0x79c   :  { %v531_v42 = vadd.f32 %v529_v40, %v497_v13  ;;  %v533_v43 = vsub.f32 1.0, %v529_v40  ;;  %543 = vmax.xlane.f32.xlu0 %v542_v41 }
 0x79e   :  { %v535_v45 = vmax.f32 %v533_v43, 1e-20 }
 0x7a0   :  { %4717 = vlog2.f32 %v535_v45 }
 0x7a6   :  { %v4718_v46 = vpop.eup %4717 }
 0x7a7   :  { %v539_v47 = vmul.f32 0.6931472, %v4718_v46 }
 0x7a9   :  { %v541_v48 = vadd.f32 %v539_v47, %v507_v18 }
 0x7ab   :  { %v545_v49 = vsel %vm301_vm2, %v541_v48, -inf }
 0x7ac   :  { %546 = vmax.xlane.f32.xlu1 %v545_v49 }
 0x80f   :  { %v544_v50 = vpop.xlane.xlu0 %543 }
 0x810   :  { %v548_v51 = vsub.f32 %v540_v39, %v544_v50 }
 0x812   :  { %v550_v52 = vmul.f32 1.442695, %v548_v51 }
 0x814   :  { %4719 = vpow2.f32 %v550_v52 }
 0x81a   :  { %v4720_v53 = vpop.eup %4719 }
 0x81b   :  { %v554_v54 = vsel %vm301_vm2, %v4720_v53, 0.0 }
 0x81c   :  { %555 = vadd.xlane.f32.xlu2 %v554_v54 }
 0x81f   :  { %v547_v55 = vpop.xlane.xlu1 %546 }
 0x820   :  { %v549_v57 = vsub.f32 %v541_v48, %v547_v55 }
 0x822   :  { %v552_v58 = vmul.f32 1.442695, %v549_v57 }
 0x824   :  { %4721 = vpow2.f32 %v552_v58 }
 0x82a   :  { %v4722_v59 = vpop.eup %4721 }
 0x82b   :  { %v557_v60 = vsel %vm301_vm2, %v4722_v59, 0.0 }
 0x82c   :  { %558 = vadd.xlane.f32.xlu0 %v557_v60 }
 0x88f   :  { %v556_v61 = vpop.xlane.xlu2 %555 }
 0x890   :  { %4723 = vrcp.f32 %v556_v61 }
 0x896   :  { %v4724_v62 = vpop.eup %4723 }
 0x897   :  { %v562_v63 = vmul.f32 %v4724_v62, %v4720_v53 }
 0x899   :  { %v564_v0 = vadd.f32 %v562_v63, %v530_v32  ;;  %v566_v1 = vsub.f32 1.0, %v562_v63 }
 0x89b   :  { %v568_v2 = vmax.f32 %v566_v1, 1e-20 }
 0x89d   :  { %4725 = vlog2.f32 %v568_v2 }
 0x89f   :  { %v559_v3 = vpop.xlane.xlu0 %558 }
 0x8a0   :  { %4727 = vrcp.f32 %v559_v3 }
 0x8a3   :  { %v4726_v4 = vpop.eup %4725 }
 0x8a4   :  { %v571_v5 = vmul.f32 0.6931472, %v4726_v4 }
 0x8a6   :  { %v4728_v6 = vpop.eup %4727  ;;  %v574_v8 = vadd.f32 %v571_v5, %v540_v39 }
 0x8a7   :  { %v563_v9 = vmul.f32 %v4728_v6, %v4722_v59 }
 0x8a8   :  { %v576_v10 = vsel %vm301_vm2, %v574_v8, -inf }
 0x8a9   :  { %v565_v11 = vadd.f32 %v563_v9, %v531_v42  ;;  %v567_v12 = vsub.f32 1.0, %v563_v9  ;;  %577 = vmax.xlane.f32.xlu1 %v576_v10 }
 0x8ab   :  { %v569_v13 = vmax.f32 %v567_v12, 1e-20 }
 0x8ad   :  { %4729 = vlog2.f32 %v569_v13 }
 0x8b3   :  { %v4730_v14 = vpop.eup %4729 }
 0x8b4   :  { %v573_v16 = vmul.f32 0.6931472, %v4730_v14 }
 0x8b6   :  { %v575_v17 = vadd.f32 %v573_v16, %v541_v48 }
 0x8b8   :  { %v579_v7 = vsel %vm301_vm2, %v575_v17, -inf }
 0x8b9   :  { %580 = vmax.xlane.f32.xlu2 %v579_v7 }
 0x91c   :  { %v578_v18 = vpop.xlane.xlu1 %577 }
 0x91d   :  { %v582_v19 = vsub.f32 %v574_v8, %v578_v18 }
 0x91f   :  { %v584_v20 = vmul.f32 1.442695, %v582_v19 }
 0x921   :  { %4731 = vpow2.f32 %v584_v20 }
 0x927   :  { %v4732_v21 = vpop.eup %4731 }
 0x928   :  { %v588_v22 = vsel %vm301_vm2, %v4732_v21, 0.0 }
 0x929   :  { %589 = vadd.xlane.f32.xlu0 %v588_v22 }
 0x92c   :  { %v581_v23 = vpop.xlane.xlu2 %580 }
 0x92d   :  { %v583_v24 = vsub.f32 %v575_v17, %v581_v23 }
 0x92f   :  { %v586_v25 = vmul.f32 1.442695, %v583_v24 }
 0x931   :  { %4733 = vpow2.f32 %v586_v25 }
 0x937   :  { %v4734_v15 = vpop.eup %4733 }
 0x938   :  { %v591_v26 = vsel %vm301_vm2, %v4734_v15, 0.0 }
 0x939   :  { %592 = vadd.xlane.f32.xlu1 %v591_v26 }
 0x99c   :  { %v590_v27 = vpop.xlane.xlu0 %589 }
 0x99d   :  { %4735 = vrcp.f32 %v590_v27 }
 0x9a3   :  { %v4736_v28 = vpop.eup %4735 }
 0x9a4   :  { %v596_v29 = vmul.f32 %v4736_v28, %v4732_v21 }
 0x9a6   :  { %v600_v30 = vsub.f32 1.0, %v596_v29  ;;  %v598_v31 = vadd.f32 %v596_v29, %v564_v0 }
 0x9a8   :  { %v602_v32 = vmax.f32 %v600_v30, 1e-20 }
 0x9aa   :  { %4737 = vlog2.f32 %v602_v32 }
 0x9ac   :  { %v593_v33 = vpop.xlane.xlu1 %592 }
 0x9ad   :  { %4739 = vrcp.f32 %v593_v33 }
 0x9b0   :  { %v4738_v34 = vpop.eup %4737 }
 0x9b1   :  { %v605_v35 = vmul.f32 0.6931472, %v4738_v34 }
 0x9b3   :  { %v4740_v36 = vpop.eup %4739  ;;  %v608_v37 = vadd.f32 %v605_v35, %v574_v8  ;;  %v668_v35 = vlaneseq }
 0x9b4   :  { %v597_v38 = vmul.f32 %v4740_v36, %v4734_v15 }
 0x9b5   :  { %v610_v39 = vsel %vm301_vm2, %v608_v37, -inf  ;;  %v5223_v36 = vand.u32 127, %v668_v35 }
 0x9b6   :  { %v601_v40 = vsub.f32 1.0, %v597_v38  ;;  %611 = vmax.xlane.f32.xlu2 %v610_v39  ;;  %v599_v41 = vadd.f32 %v597_v38, %v565_v11 }
 0x9b8   :  { %v603_v42 = vmax.f32 %v601_v40, 1e-20 }
 0x9ba   :  { %4741 = vlog2.f32 %v603_v42 }
 0x9c0   :  { %v4742_v43 = vpop.eup %4741 }
 0x9c1   :  { %v607_v45 = vmul.f32 0.6931472, %v4742_v43 }
 0x9c3   :  { %v609_v46 = vadd.f32 %v607_v45, %v575_v17 }
 0x9c5   :  { %v613_v47 = vsel %vm301_vm2, %v609_v46, -inf }
 0x9c6   :  { %614 = vmax.xlane.f32.xlu0 %v613_v47 }
 0xa29   :  { %v612_v48 = vpop.xlane.xlu2 %611 }
 0xa2a   :  { %v616_v49 = vsub.f32 %v608_v37, %v612_v48 }
 0xa2c   :  { %v618_v50 = vmul.f32 1.442695, %v616_v49 }
 0xa2e   :  { %4743 = vpow2.f32 %v618_v50 }
 0xa34   :  { %v4744_v51 = vpop.eup %4743 }
 0xa35   :  { %v622_v52 = vsel %vm301_vm2, %v4744_v51, 0.0 }
 0xa36   :  { %623 = vadd.xlane.f32.xlu1 %v622_v52 }
 0xa39   :  { %v615_v53 = vpop.xlane.xlu0 %614 }
 0xa3a   :  { %v617_v54 = vsub.f32 %v609_v46, %v615_v53 }
 0xa3c   :  { %v620_v55 = vmul.f32 1.442695, %v617_v54 }
 0xa3e   :  { %4745 = vpow2.f32 %v620_v55 }
 0xa44   :  { %v4746_v57 = vpop.eup %4745 }
 0xa45   :  { %v625_v58 = vsel %vm301_vm2, %v4746_v57, 0.0 }
 0xa46   :  { %626 = vadd.xlane.f32.xlu2 %v625_v58 }
 0xaa9   :  { %v624_v59 = vpop.xlane.xlu1 %623 }
 0xaaa   :  { %4747 = vrcp.f32 %v624_v59  ;;  %v1237_v59 = vld [vmem:[#allocation14] sm:$0xff] }
 0xab0   :  { %v4748_v60 = vpop.eup %4747 }
 0xab1   :  { %v630_v61 = vmul.f32 %v4748_v60, %v4744_v51 }
 0xab3   :  { %v634_v62 = vsub.f32 1.0, %v630_v61  ;;  %v632_v63 = vadd.f32 %v630_v61, %v598_v31  ;;  %v5236_v61 = vand.u32 4294901760, %v1237_v59 }
 0xab5   :  { %v636_v0 = vmax.f32 %v634_v62, 1e-20 }
 0xab7   :  { %4749 = vlog2.f32 %v636_v0 }
 0xab9   :  { %v627_v1 = vpop.xlane.xlu2 %626 }
 0xaba   :  { %4751 = vrcp.f32 %v627_v1 }
 0xabd   :  { %v4750_v2 = vpop.eup %4749 }
 0xabe   :  { %v639_v3 = vmul.f32 0.6931472, %v4750_v2 }
 0xac0   :  { %v4752_v4 = vpop.eup %4751  ;;  %v642_v5 = vadd.f32 %v639_v3, %v608_v37 }
 0xac1   :  { %v631_v6 = vmul.f32 %v4752_v4, %v4746_v57  ;;  %v1238_v57 = vld [vmem:[#allocation14 + $0x8] sm:$0xff] }
 0xac2   :  { %v644_v8 = vsel %vm301_vm2, %v642_v5, -inf  ;;  %v5231_v58 = vand.u32 4294901760, %v1238_v57 }
 0xac3   :  { %645 = vmax.xlane.f32.xlu0 %v644_v8  ;;  %v635_v9 = vsub.f32 1.0, %v631_v6  ;;  %v633_v10 = vadd.f32 %v631_v6, %v599_v41  ;;  %v1239_v8 = vld [vmem:[#allocation14 + $0x10] sm:$0xff] }
 0xac4   :  { %v5234_v60 = vsub.f32 %v1238_v57, %v5231_v58  ;;  %1262 = vmatpush.msrb.mxu2 %v5231_v58 }
 0xac5   :  { %v637_v11 = vmax.f32 %v635_v9, 1e-20  ;;  %v5269_v9 = vand.u32 4294901760, %v1239_v8 }
 0xac6   :  { %v5240_v62 = vand.u32 4294901760, %v5234_v60  ;;  %1321 = vmatpush.msrb.mxu0 %v5234_v60  ;;  %1264 = vmatpush.msrb.mxu2 %v5236_v61 }
 0xac7   :  { %4753 = vlog2.f32 %v637_v11 }
 0xac8   :  { %1346 = vmatpush.msra.mxu2 %v5231_v58  ;;  %v1291_v0 = vsub.f32 %v5234_v60, %v5240_v62 }
 0xaca   :  { %1348 = vmatpush.msra.mxu2 %v5236_v61  ;;  %v5256_v2 = vand.u32 4294901760, %v1291_v0 }
 0xacc   :  { %1293 = vmatpush.msrb.mxu3 %v5256_v2 }
 0xacd   :  { %v4754_v12 = vpop.eup %4753 }
 0xace   :  { %v641_v13 = vmul.f32 0.6931472, %v4754_v12 }
 0xad0   :  { %v643_v14 = vadd.f32 %v641_v13, %v609_v46 }
 0xad2   :  { %v647_v16 = vsel %vm301_vm2, %v643_v14, -inf }
 0xad3   :  { %648 = vmax.xlane.f32.xlu1 %v647_v16 }
 0xb36   :  { %v646_v17 = vpop.xlane.xlu0 %645 }
 0xb37   :  { %v650_v7 = vsub.f32 %v642_v5, %v646_v17  ;;  %v1240_v5 = vld [vmem:[#allocation14 + $0x18] sm:$0xff]  ;;  %v5280_v17 = vsub.f32 %v1239_v8, %v5269_v9 }
 0xb38   :  { %v5267_v6 = vand.u32 4294901760, %v1240_v5 }
 0xb39   :  { %v652_v18 = vmul.f32 1.442695, %v650_v7 }
 0xb3a   :  { %1508 = vmatpush.msrb.mxu1 %v5267_v6  ;;  %v5276_v16 = vsub.f32 %v1240_v5, %v5267_v6 }
 0xb3b   :  { %4755 = vpow2.f32 %v652_v18  ;;  %v6005_v18 = vmov 0.0  }
 0xb3c   :  { %1510 = vmatpush.msrb.mxu1 %v5269_v9 }
 0xb3e   :  { %1622 = vmatpush.msra.mxu1 %v5256_v2 }
 0xb41   :  { %v4756_v19 = vpop.eup %4755 }
 0xb42   :  { %v656_v20 = vsel %vm301_vm2, %v4756_v19, 0.0 }
 0xb43   :  { %657 = vadd.xlane.f32.xlu2 %v656_v20 }
 0xb46   :  { %v649_v21 = vpop.xlane.xlu1 %648 }
 0xb47   :  { %v651_v22 = vsub.f32 %v643_v14, %v649_v21  ;;  %v5293_v21 = vand.u32 4294901760, %v5276_v16 }
 0xb49   :  { %v654_v23 = vmul.f32 1.442695, %v651_v22  ;;  %v5296_v22 = vand.u32 4294901760, %v5280_v17 }
 0xb4b   :  { %4757 = vpow2.f32 %v654_v23  ;;  %v1453_v23 = vsub.f32 %v5276_v16, %v5293_v21 }
 0xb51   :  { %v4758_v24 = vpop.eup %4757 }
 0xb52   :  { %v659_v25 = vsel %vm301_vm2, %v4758_v24, 0.0 }
 0xb53   :  { %660 = vadd.xlane.f32.xlu0 %v659_v25  ;;  %v1459_v25 = vsub.f32 %v5280_v17, %v5296_v22 }
 0xbb6   :  { %v658_v15 = vpop.xlane.xlu2 %657 }
 0xbb7   :  { %4759 = vrcp.f32 %v658_v15 }
 0xbbd   :  { %v4760_v26 = vpop.eup %4759 }
 0xbbe   :  { %v664_v27 = vmul.f32 %v4760_v26, %v4756_v19 }
 0xbc0   :  { %v5215_v28 = vadd.f32 %v664_v27, %v632_v63  ;;  %v5243_v63 = vsub.f32 %v1237_v59, %v5236_v61  ;;  %v5303_v27 = vand.u32 4294901760, %v1453_v23 }
 0xbc2   :  { %v670_v29 = vsel %vm301_vm2, %v5215_v28, -inf  ;;  %v5251_v1 = vand.u32 4294901760, %v5243_v63  ;;  %1324 = vmatpush.msrb.mxu0 %v5243_v63 }
 0xbc3   :  { %671 = vmax.xlane.f32.xlu1 %v670_v29 }
 0xbc4   :  { %1398 = vmatpush.msra.mxu0 %v5231_v58  ;;  %v1297_v3 = vsub.f32 %v5243_v63, %v5251_v1 }
 0xbc6   :  { %v661_v30 = vpop.xlane.xlu0 %660  ;;  %1400 = vmatpush.msra.mxu0 %v5236_v61  ;;  %v5262_v4 = vand.u32 4294901760, %v1297_v3 }
 0xbc7   :  { %4761 = vrcp.f32 %v661_v30 }
 0xbc8   :  { %1299 = vmatpush.msrb.mxu3 %v5262_v4  ;;  %1628 = vmatpush.msra.mxu1 %v5262_v4 }
 0xbca   :  { %1373 = vmatpush.msra.mxu3 %v5240_v62 }
 0xbcc   :  { %1377 = vmatpush.msra.mxu3 %v5251_v1 }
 0xbcd   :  { %v4762_v31 = vpop.eup %4761 }
 0xbce   :  { %v665_v32 = vmul.f32 %v4762_v31, %v4758_v24 }
 0xbd0   :  { %v5219_v33 = vadd.f32 %v665_v32, %v633_v10  ;;  %v5305_v32 = vand.u32 4294901760, %v1459_v25 }
 0xbd2   :  { %v673_v34 = vsel %vm301_vm2, %v5219_v33, -inf }
 0xbd3   :  { %674 = vmax.xlane.f32.xlu2 %v673_v34 }
 0xc36   :  { %v672_v37 = vpop.xlane.xlu1 %671 }
 0xc37   :  { %vm676_vm3 = vcmp.ge.f32.partialorder %v5215_v28, %v672_v37 }
 0xc38   :  { %v678_v38 = vsel %vm676_vm3, %v5223_v36, 16 }
 0xc39   :  { %v680_v39 = vsel %vm301_vm2, %v678_v38, 2147483647 }
 0xc3a   :  { %v682_v40 = vshra.s32 %v680_v39, 16  ;;  %v681_v48 = vand.u32 65535, %v680_v39 }
 0xc3c   :  { %v684_v41 = vcvt.s32.f32 %v682_v40  ;;  %v683_v50 = vcvt.s32.f32 %v681_v48 }
 0xc3e   :  { %685 = vmin.xlane.f32.xlu0 %v684_v41 }
 0xc46   :  { %v675_v42 = vpop.xlane.xlu2 %674 }
 0xc47   :  { %vm677_vm4 = vcmp.ge.f32.partialorder %v5219_v33, %v675_v42 }
 0xc48   :  { %v679_v43 = vsel %vm677_vm4, %v5223_v36, 16 }
 0xc49   :  { %v695_v45 = vsel %vm301_vm2, %v679_v43, 2147483647 }
 0xc4a   :  { %v697_v46 = vshra.s32 %v695_v45, 16  ;;  %v696_v52 = vand.u32 65535, %v695_v45 }
 0xc4c   :  { %v699_v47 = vcvt.s32.f32 %v697_v46  ;;  %v698_v54 = vcvt.s32.f32 %v696_v52 }
 0xc4e   :  { %700 = vmin.xlane.f32.xlu1 %v699_v47 }
 0xcb1   :  { %v686_v49 = vpop.xlane.xlu0 %685 }
 0xcb2   :  { %vm687_vm5 = vcmp.eq.f32.partialorder %v684_v41, %v686_v49  ;;  %v692_v10 = vcvt.f32.s32 %v686_v49 }
 0xcb3   :  { %v688_v51 = vsel %vm687_vm5, %v683_v50, inf }
 0xcb4   :  { %689 = vmin.xlane.f32.xlu2 %v688_v51  ;;  %v693_v12 = vshll.u32 %v692_v10, 16 }
 0xcc1   :  { %v701_v53 = vpop.xlane.xlu1 %700 }
 0xcc2   :  { %vm702_vm6 = vcmp.eq.f32.partialorder %v699_v47, %v701_v53  ;;  %v707_v24 = vcvt.f32.s32 %v701_v53 }
 0xcc3   :  { %v703_v55 = vsel %vm702_vm6, %v698_v54, inf }
 0xcc4   :  { %704 = vmin.xlane.f32.xlu0 %v703_v55  ;;  %v708_v30 = vshll.u32 %v707_v24, 16 }
 0xd27   :  { %v690_v11 = vpop.xlane.xlu2 %689 }
 0xd28   :  { %v691_v13 = vcvt.f32.s32 %v690_v11 }
 0xd2a   :  { %v694_v14 = vadd.s32 %v693_v12, %v691_v13 }
 0xd2c   :  { %vm710_vm7 = vcmp.eq.s32.totalorder %v5223_v36, %v694_v14 }
 0xd2d   :  { %v5283_v7 = vsel %vm710_vm7, -1e+30, %v5215_v28  ;;  %v5286_v19 = vsel %vm710_vm7, 1.0, %v6005_v18 }
 0xd2e   :  { %v722_v20 = vsel %vm301_vm2, %v5283_v7, -inf  ;;  %716 = vst.msk [vmem:[#allocation2] sm:$0x3] %vm301_vm2, %v5286_v19 }
 0xd2f   :  { %723 = vmax.xlane.f32.xlu1 %v722_v20 }
 0xd35   :  { %v1241_v15 = vld [vmem:[#allocation2] sm:$0x3] }
 0xd36   :  { %v1245_v26 = vsel %vm281_vm1, %v1241_v15, 0 }
 0xd37   :  { %v705_v28 = vpop.xlane.xlu0 %704  ;;  %v1265_v29 = vand.u32 4294901760, %v1245_v26 }
 0xd38   :  { %v706_v31 = vcvt.f32.s32 %v705_v28 }
 0xd39   :  { %1301 = vmatmul.f32.vlgmr.msrb.gmra.mxu3 %v1265_v29  ;;  %v1266_v34 = vsub.f32 %v1245_v26, %v1265_v29 }
 0xd3a   :  { %v709_v35 = vadd.s32 %v708_v30, %v706_v31  ;;  %1455 = vmatpush.msrb.mxu3 %v5303_v27 }
 0xd3b   :  { %1327 = vmatmul.f32.vlgmr.msrb.gmra.mxu0 %v1266_v34  ;;  %v1267_v37 = vand.u32 4294901760, %v1266_v34 }
 0xd3c   :  { %vm711_vm8 = vcmp.eq.s32.totalorder %v5223_v36, %v709_v35  ;;  %1461 = vmatpush.msrb.mxu3 %v5305_v32  ;;  %1483 = vmatpush.msrb.mxu0 %v5276_v16 }
 0xd3d   :  { %v5312_v38 = vsel %vm711_vm8, -1e+30, %v5219_v33  ;;  %v5315_v39 = vsel %vm711_vm8, 1.0, %v6005_v18  ;;  %v1268_v40 = vsub.f32 %v1266_v34, %v1267_v37 }
 0xd3e   :  { %v725_v41 = vsel %vm301_vm2, %v5312_v38, -inf  ;;  %717 = vst.msk [vmem:[#allocation2 + $0x2] sm:$0x3] %vm301_vm2, %v5315_v39  ;;  %1486 = vmatpush.msrb.mxu0 %v5280_v17 }
 0xd3f   :  { %726 = vmax.xlane.f32.xlu2 %v725_v41  ;;  %v1269_v42 = vand.u32 4294901760, %v1268_v40 }
 0xd41   :  { %1270 = vmatmul.f32.vlgmr.msrb.gmra.mxu2 %v1269_v42  ;;  %1379 = vmatmul.f32.vlgmr.msra.gmra.mxu3 %v1265_v29 }
 0xd42   :  { %1424 = vmatpush.msrb.mxu2 %v5267_v6  ;;  %1560 = vmatpush.msra.mxu3 %v5267_v6 }
 0xd43   :  { %1402 = vmatmul.f32.vlgmr.msra.gmra.mxu0 %v1265_v29 }
 0xd44   :  { %1426 = vmatpush.msrb.mxu2 %v5269_v9  ;;  %1562 = vmatpush.msra.mxu3 %v5269_v9 }
 0xd45   :  { %v1242_v33 = vld [vmem:[#allocation2 + $0x2] sm:$0x3]  ;;  %1591 = vmatpush.msra.mxu0 %v5231_v58 }
 0xd46   :  { %v1407_v43 = vsel %vm281_vm1, %v1242_v33, 0 }
 0xd47   :  { %v1427_v45 = vand.u32 4294901760, %v1407_v43  ;;  %1593 = vmatpush.msra.mxu0 %v5236_v61 }
 0xd49   :  { %1352 = vmatmul.f32.vlgmr.msra.gmra.mxu2 %v1267_v37  ;;  %1463 = vmatmul.f32.vlgmr.msrb.gmra.mxu3 %v1427_v45  ;;  %v1428_v46 = vsub.f32 %v1407_v43, %v1427_v45 }
 0xd4a   :  { %1535 = vmatpush.msra.mxu2 %v5293_v21  ;;  %1675 = vmatpush.msrb.mxu3 %v5231_v58 }
 0xd4b   :  { %1489 = vmatmul.f32.vlgmr.msrb.gmra.mxu0 %v1428_v46  ;;  %v1429_v47 = vand.u32 4294901760, %v1428_v46 }
 0xd4c   :  { %1539 = vmatpush.msra.mxu2 %v5296_v22  ;;  %1677 = vmatpush.msrb.mxu3 %v5236_v61 }
 0xd4d   :  { %v1430_v48 = vsub.f32 %v1428_v46, %v1429_v47  ;;  %1514 = vmatmul.f32.vlgmr.msrb.gmra.mxu1 %v1429_v47  ;;  %1702 = vmatpush.msrb.mxu0 %v5240_v62 }
 0xd4e   :  { %1727 = vmatpush.msrb.mxu1 %v5231_v58 }
 0xd4f   :  { %v1431_v49 = vand.u32 4294901760, %v1430_v48  ;;  %1706 = vmatpush.msrb.mxu0 %v5251_v1 }
 0xd50   :  { %1729 = vmatpush.msrb.mxu1 %v5236_v61 }
 0xd51   :  { %1432 = vmatmul.f32.vlgmr.msrb.gmra.mxu2 %v1431_v49  ;;  %1564 = vmatmul.f32.vlgmr.msra.gmra.mxu3 %v1427_v45 }
 0xd52   :  { %1650 = vmatpush.msrb.mxu2 %v5234_v60  ;;  %1784 = vmatpush.msra.mxu3 %v5303_v27 }
 0xd54   :  { %1653 = vmatpush.msrb.mxu2 %v5243_v63  ;;  %1790 = vmatpush.msra.mxu3 %v5305_v32 }
 0xd59   :  { %1541 = vmatmul.f32.vlgmr.msra.gmra.mxu2 %v1427_v45 }
 0xd5a   :  { %1753 = vmatpush.msra.mxu2 %v5267_v6 }
 0xd5c   :  { %1755 = vmatpush.msra.mxu2 %v5269_v9 }
 0xda2   :  { %v724_v50 = vpop.xlane.xlu1 %723 }
 0xda3   :  { %vm728_vm9 = vcmp.ge.f32.partialorder %v5283_v7, %v724_v50 }
 0xda4   :  { %v730_v51 = vsel %vm728_vm9, %v5223_v36, 16 }
 0xda5   :  { %v732_v52 = vsel %vm301_vm2, %v730_v51, 2147483647 }
 0xda6   :  { %v734_v53 = vshra.s32 %v732_v52, 16  ;;  %v733_v5 = vand.u32 65535, %v732_v52 }
 0xda8   :  { %v736_v54 = vcvt.s32.f32 %v734_v53  ;;  %v735_v10 = vcvt.s32.f32 %v733_v5 }
 0xdaa   :  { %737 = vmin.xlane.f32.xlu0 %v736_v54 }
 0xdb2   :  { %v727_v55 = vpop.xlane.xlu2 %726 }
 0xdb3   :  { %vm729_vm10 = vcmp.ge.f32.partialorder %v5312_v38, %v727_v55 }
 0xdb4   :  { %v731_v57 = vsel %vm729_vm10, %v5223_v36, 16 }
 0xdb5   :  { %v747_v59 = vsel %vm301_vm2, %v731_v57, 2147483647 }
 0xdb6   :  { %v749_v0 = vshra.s32 %v747_v59, 16  ;;  %v748_v12 = vand.u32 65535, %v747_v59 }
 0xdb8   :  { %v751_v3 = vcvt.s32.f32 %v749_v0  ;;  %v750_v14 = vcvt.s32.f32 %v748_v12 }
 0xdba   :  { %752 = vmin.xlane.f32.xlu1 %v751_v3 }
 0xe1d   :  { %v738_v8 = vpop.xlane.xlu0 %737 }
 0xe1e   :  { %vm739_vm11 = vcmp.eq.f32.partialorder %v736_v54, %v738_v8  ;;  %v744_v23 = vcvt.f32.s32 %v738_v8 }
 0xe1f   :  { %v740_v11 = vsel %vm739_vm11, %v735_v10, inf }
 0xe20   :  { %741 = vmin.xlane.f32.xlu2 %v740_v11  ;;  %v745_v25 = vshll.u32 %v744_v23, 16 }
 0xe2d   :  { %v753_v13 = vpop.xlane.xlu1 %752 }
 0xe2e   :  { %vm754_vm12 = vcmp.eq.f32.partialorder %v751_v3, %v753_v13  ;;  %v759_v31 = vcvt.f32.s32 %v753_v13 }
 0xe2f   :  { %v755_v20 = vsel %vm754_vm12, %v750_v14, inf }
 0xe30   :  { %756 = vmin.xlane.f32.xlu0 %v755_v20  ;;  %v760_v41 = vshll.u32 %v759_v31, 16 }
 0xe93   :  { %v742_v24 = vpop.xlane.xlu2 %741 }
 0xe94   :  { %v743_v15 = vcvt.f32.s32 %v742_v24 }
 0xe96   :  { %v5349_v26 = vadd.s32 %v745_v25, %v743_v15 }
 0xe98   :  { %vm762_vm13 = vcmp.eq.s32.totalorder %v5223_v36, %v5349_v26 }
 0xe99   :  { %v4610_v28 = vsel %vm762_vm13, 1.0, %v6005_v18  ;;  %v5361_v29 = vsel %vm762_vm13, -1e+30, %v5283_v7 }
 0xe9a   :  { %769 = vst.msk [vmem:[#allocation2 + $0x4] sm:$0x3] %vm301_vm2, %v4610_v28  ;;  %v775_v30 = vsel %vm301_vm2, %v5361_v29, -inf }
 0xe9b   :  { %776 = vmax.xlane.f32.xlu1 %v775_v30 }
 0xea1   :  { %v1571_v34 = vld [vmem:[#allocation2 + $0x4] sm:$0x3] }
 0xea2   :  { %v1574_v35 = vsel %vm281_vm1, %v1571_v34, 0 }
 0xea3   :  { %v757_v37 = vpop.xlane.xlu0 %756  ;;  %v1594_v40 = vand.u32 4294901760, %v1574_v35 }
 0xea4   :  { %v758_v42 = vcvt.f32.s32 %v757_v37 }
 0xea5   :  { %1630 = vmatmul.f32.vlgmr.msra.gmra.mxu1 %v1594_v40  ;;  %v1595_v33 = vsub.f32 %v1574_v35, %v1594_v40 }
 0xea6   :  { %v5367_v43 = vadd.s32 %v760_v41, %v758_v42  ;;  %1837 = vmatpush.msra.mxu1 %v5267_v6  ;;  %v771_v41 = vsel %vm762_vm13, 1.0, %v5286_v19 }
 0xea7   :  { %1656 = vmatmul.f32.vlgmr.msrb.gmra.mxu2 %v1595_v33  ;;  %v1596_v7 = vand.u32 4294901760, %v1595_v33 }
 0xea8   :  { %vm763_vm14 = vcmp.eq.s32.totalorder %v5223_v36, %v5367_v43  ;;  %1839 = vmatpush.msra.mxu1 %v5269_v9  ;;  %1864 = vmatpush.msrb.mxu2 %v5293_v21 }
 0xea9   :  { %v4611_v45 = vsel %vm763_vm14, 1.0, %v6005_v18  ;;  %1681 = vmatmul.f32.vlgmr.msrb.gmra.mxu3 %v1596_v7  ;;  %v5382_v46 = vsel %vm763_vm14, -1e+30, %v5312_v38  ;;  %v1597_v47 = vsub.f32 %v1595_v33, %v1596_v7 }
 0xeaa   :  { %770 = vst.msk [vmem:[#allocation2 + $0x6] sm:$0x3] %vm301_vm2, %v4611_v45  ;;  %v778_v48 = vsel %vm301_vm2, %v5382_v46, -inf  ;;  %1889 = vmatpush.msrb.mxu3 %v5267_v6  ;;  %1868 = vmatpush.msrb.mxu2 %v5296_v22 }
 0xeab   :  { %779 = vmax.xlane.f32.xlu2 %v778_v48  ;;  %v1598_v49 = vand.u32 4294901760, %v1597_v47 }
 0xeac   :  { %1891 = vmatpush.msrb.mxu3 %v5269_v9 }
 0xead   :  { %1599 = vmatmul.f32.vlgmr.msra.gmra.mxu0 %v1598_v49  ;;  %1731 = vmatmul.f32.vlgmr.msrb.gmra.mxu1 %v1594_v40 }
 0xeae   :  { %1812 = vmatpush.msra.mxu0 %v5276_v16  ;;  %1951 = vmatpush.msrb.mxu1 %v5256_v2 }
 0xeb0   :  { %1815 = vmatpush.msra.mxu0 %v5280_v17  ;;  %1957 = vmatpush.msrb.mxu1 %v5262_v4 }
 0xeb1   :  { %v1572_v38 = vld [vmem:[#allocation2 + $0x6] sm:$0x3] }
 0xeb2   :  { %v1736_v50 = vsel %vm281_vm1, %v1572_v38, 0 }
 0xeb3   :  { %v1756_v51 = vand.u32 4294901760, %v1736_v50 }
 0xeb5   :  { %1708 = vmatmul.f32.vlgmr.msrb.gmra.mxu0 %v1594_v40  ;;  %v1757_v52 = vsub.f32 %v1736_v50, %v1756_v51  ;;  %1792 = vmatmul.f32.vlgmr.msra.gmra.mxu3 %v1756_v51 }
 0xeb6   :  { %2004 = vmatpush.msra.mxu3 %v5231_v58  ;;  %1920 = vmatpush.msrb.mxu0 %v5231_v58 }
 0xeb7   :  { %v1758_v53 = vand.u32 4294901760, %v1757_v52 }
 0xeb8   :  { %2006 = vmatpush.msra.mxu3 %v5236_v61  ;;  %1922 = vmatpush.msrb.mxu0 %v5236_v61 }
 0xeb9   :  { %1843 = vmatmul.f32.vlgmr.msra.gmra.mxu1 %v1758_v53  ;;  %v1759_v54 = vsub.f32 %v1757_v52, %v1758_v53  ;;  %v772_v53 = vsel %vm763_vm14, 1.0, %v5315_v39 }
 0xeba   :  { %2056 = vmatpush.msra.mxu1 %v5231_v58 }
 0xebb   :  { %v1760_v55 = vand.u32 4294901760, %v1759_v54 }
 0xebc   :  { %2058 = vmatpush.msra.mxu1 %v5236_v61 }
 0xebd   :  { %1761 = vmatmul.f32.vlgmr.msra.gmra.mxu2 %v1760_v55  ;;  %1818 = vmatmul.f32.vlgmr.msra.gmra.mxu0 %v1757_v52 }
 0xebe   :  { %1893 = vmatmul.f32.vlgmr.msrb.gmra.mxu3 %v1756_v51  ;;  %1979 = vmatpush.msra.mxu2 %v5234_v60 }
 0xebf   :  { %2031 = vmatpush.msra.mxu0 %v5240_v62  ;;  %2113 = vmatpush.msrb.mxu3 %v5303_v27 }
 0xec0   :  { %1982 = vmatpush.msra.mxu2 %v5243_v63 }
 0xec1   :  { %2035 = vmatpush.msra.mxu0 %v5251_v1  ;;  %2119 = vmatpush.msrb.mxu3 %v5305_v32 }
 0xec5   :  { %1870 = vmatmul.f32.vlgmr.msrb.gmra.mxu2 %v1756_v51 }
 0xec6   :  { %2082 = vmatpush.msrb.mxu2 %v5267_v6 }
 0xec8   :  { %2084 = vmatpush.msrb.mxu2 %v5269_v9 }
 0xf0e   :  { %v777_v57 = vpop.xlane.xlu1 %776 }
 0xf0f   :  { %vm781_vm15 = vcmp.ge.f32.partialorder %v5361_v29, %v777_v57 }
 0xf10   :  { %v783_v59 = vsel %vm781_vm15, %v5223_v36, 16 }
 0xf11   :  { %v785_v0 = vsel %vm301_vm2, %v783_v59, 2147483647 }
 0xf12   :  { %v787_v3 = vshra.s32 %v785_v0, 16  ;;  %v786_v14 = vand.u32 65535, %v785_v0 }
 0xf14   :  { %v789_v5 = vcvt.s32.f32 %v787_v3  ;;  %v788_v23 = vcvt.s32.f32 %v786_v14  ;;  %v5473_v14 = vpop.f32.mrf.mxu0 }
 0xf16   :  { %790 = vmin.xlane.f32.xlu0 %v789_v5 }
 0xf1e   :  { %v780_v8 = vpop.xlane.xlu2 %779 }
 0xf1f   :  { %vm782_vm3 = vcmp.ge.f32.partialorder %v5382_v46, %v780_v8 }
 0xf20   :  { %v784_v10 = vsel %vm782_vm3, %v5223_v36, 16 }
 0xf21   :  { %v800_v11 = vsel %vm301_vm2, %v784_v10, 2147483647 }
 0xf22   :  { %v802_v12 = vshra.s32 %v800_v11, 16  ;;  %v801_v25 = vand.u32 65535, %v800_v11 }
 0xf24   :  { %v804_v13 = vcvt.s32.f32 %v802_v12  ;;  %v803_v28 = vcvt.s32.f32 %v801_v25  ;;  %v5469_v12 = vpop.f32.mrf.mxu2 }
 0xf26   :  { %805 = vmin.xlane.f32.xlu1 %v804_v13 }
 0xf89   :  { %v791_v20 = vpop.xlane.xlu0 %790 }
 0xf8a   :  { %vm792_vm4 = vcmp.eq.f32.partialorder %v789_v5, %v791_v20  ;;  %v797_v31 = vcvt.f32.s32 %v791_v20  ;;  %v5475_v20 = vpop.f32.mrf.mxu2 }
 0xf8b   :  { %v793_v24 = vsel %vm792_vm4, %v788_v23, inf }
 0xf8c   :  { %794 = vmin.xlane.f32.xlu2 %v793_v24  ;;  %v798_v35 = vshll.u32 %v797_v31, 16  ;;  %v5479_v24 = vpop.f32.mrf.mxu0 }
 0xf92   :  { %v5481_v25 = vpop.f32.mrf.mxu2 }
 0xf99   :  { %v806_v15 = vpop.xlane.xlu1 %805 }
 0xf9a   :  { %vm807_vm5 = vcmp.eq.f32.partialorder %v804_v13, %v806_v15  ;;  %v812_v47 = vcvt.f32.s32 %v806_v15  ;;  %v5471_v13 = vpop.f32.mrf.mxu3  ;;  %v5489_v31 = vpop.f32.mrf.mxu2 }
 0xf9b   :  { %v808_v30 = vsel %vm807_vm5, %v803_v28, inf  ;;  %v5485_v28 = vpop.f32.mrf.mxu0 }
 0xf9c   :  { %809 = vmin.xlane.f32.xlu0 %v808_v30  ;;  %v813_v38 = vshll.u32 %v812_v47, 16  ;;  %v5487_v30 = vpop.f32.mrf.mxu1 }
 0xfa2   :  { %v5477_v23 = vpop.f32.mrf.mxu3 }
 0xfaa   :  { %v5483_v15 = vpop.f32.mrf.mxu3 }
 0xfff   :  { %v795_v34 = vpop.xlane.xlu2 %794 }
0x1000   :  { %v796_v37 = vcvt.f32.s32 %v795_v34  ;;  %v5491_v34 = vpop.f32.mrf.mxu3 }
0x1001   :  { %6013 = vst [vmem:[#allocation27_spill] sm:$0xff] %v5491_v34 }
0x1002   :  { %v799_v40 = vadd.s32 %v798_v35, %v796_v37  ;;  %v5493_v35 = vpop.f32.mrf.mxu0 }
0x1004   :  { %vm815_vm6 = vcmp.eq.s32.totalorder %v5223_v36, %v799_v40  ;;  %v5496_v40 = vpop.f32.mrf.mxu1 }
0x1005   :  { %v4612_v42 = vsel %vm815_vm6, 1.0, %v6005_v18  ;;  %v5421_v33 = vsel %vm815_vm6, 1.0, %v771_v41  ;;  %v5424_v7 = vsel %vm815_vm6, -1e+30, %v5361_v29 }
0x1006   :  { %822 = vst.msk [vmem:[#allocation2 + $0x8] sm:$0x3] %vm301_vm2, %v4612_v42  ;;  %v828_v45 = vsel %vm301_vm2, %v5424_v7, -inf }
0x1007   :  { %829 = vmax.xlane.f32.xlu1 %v828_v45  ;;  %v5500_v45 = vpop.f32.mrf.mxu2 }
0x100d   :  { %v1900_v48 = vld [vmem:[#allocation2 + $0x8] sm:$0x3] }
0x100e   :  { %v1903_v26 = vsel %vm281_vm1, %v1900_v48, 0  ;;  %v5502_v48 = vpop.f32.mrf.mxu3 }
0x100f   :  { %v810_v19 = vpop.xlane.xlu0 %809  ;;  %v1923_v49 = vand.u32 4294901760, %v1903_v26 }
0x1010   :  { %v811_v50 = vcvt.f32.s32 %v810_v19  ;;  %v5504_v19 = vpop.f32.mrf.mxu0 }
0x1011   :  { %1959 = vmatmul.f32.vlgmr.msrb.gmra.mxu1 %v1923_v49  ;;  %v1924_v51 = vsub.f32 %v1903_v26, %v1923_v49 }
0x1012   :  { %v814_v52 = vadd.s32 %v813_v38, %v811_v50  ;;  %2166 = vmatpush.msrb.mxu1 %v5267_v6  ;;  %v5508_v38 = vpop.f32.mrf.mxu2 }
0x1013   :  { %1985 = vmatmul.f32.vlgmr.msra.gmra.mxu2 %v1924_v51  ;;  %v1925_v29 = vand.u32 4294901760, %v1924_v51 }
0x1014   :  { %vm816_vm7 = vcmp.eq.s32.totalorder %v5223_v36, %v814_v52  ;;  %2168 = vmatpush.msrb.mxu1 %v5269_v9  ;;  %2193 = vmatpush.msra.mxu2 %v5293_v21 }
0x1015   :  { %v4613_v54 = vsel %vm816_vm7, 1.0, %v6005_v18  ;;  %v5439_v55 = vsel %vm816_vm7, 1.0, %v772_v53  ;;  %2010 = vmatmul.f32.vlgmr.msra.gmra.mxu3 %v1925_v29  ;;  %v5442_v57 = vsel %vm816_vm7, -1e+30, %v5382_v46  ;;  %v1926_v59 = vsub.f32 %v1924_v51, %v1925_v29 }
0x1016   :  { %823 = vst.msk [vmem:[#allocation2 + $0xa] sm:$0x3] %vm301_vm2, %v4613_v54  ;;  %v831_v39 = vsel %vm301_vm2, %v5442_v57, -inf  ;;  %2218 = vmatpush.msra.mxu3 %v5267_v6  ;;  %2197 = vmatpush.msra.mxu2 %v5296_v22  ;;  %v5510_v50 = vpop.f32.mrf.mxu3 }
0x1017   :  { %832 = vmax.xlane.f32.xlu2 %v831_v39  ;;  %v1927_v43 = vand.u32 4294901760, %v1926_v59 }
0x1018   :  { %2220 = vmatpush.msra.mxu3 %v5269_v9  ;;  %v5517_v54 = vpop.f32.mrf.mxu0 }
0x1019   :  { %1928 = vmatmul.f32.vlgmr.msrb.gmra.mxu0 %v1927_v43  ;;  %2060 = vmatmul.f32.vlgmr.msra.gmra.mxu1 %v1923_v49 }
0x101a   :  { %2141 = vmatpush.msrb.mxu0 %v5276_v16  ;;  %2280 = vmatpush.msra.mxu1 %v5256_v2  ;;  %v5519_v39 = vpop.f32.mrf.mxu2 }
0x101b   :  { %6014 = vst [vmem:[#allocation28_spill] sm:$0xff] %v5519_v39 }
0x101c   :  { %2144 = vmatpush.msrb.mxu0 %v5280_v17  ;;  %2286 = vmatpush.msra.mxu1 %v5262_v4 }
0x101d   :  { %v1901_v46 = vld [vmem:[#allocation2 + $0xa] sm:$0x3] }
0x101e   :  { %v2065_v0 = vsel %vm281_vm1, %v1901_v46, 0  ;;  %v5521_v46 = vpop.f32.mrf.mxu3 }
0x101f   :  { %v2085_v3 = vand.u32 4294901760, %v2065_v0  ;;  %6015 = vst [vmem:[#allocation29_spill] sm:$0xff] %v5521_v46 }
0x1021   :  { %2037 = vmatmul.f32.vlgmr.msra.gmra.mxu0 %v1923_v49  ;;  %v2086_v5 = vsub.f32 %v2065_v0, %v2085_v3  ;;  %2121 = vmatmul.f32.vlgmr.msrb.gmra.mxu3 %v2085_v3  ;;  %v5506_v49 = vpop.f32.mrf.mxu1 }
0x1022   :  { %2333 = vmatpush.msrb.mxu3 %v5231_v58  ;;  %2249 = vmatpush.msra.mxu0 %v5231_v58 }
0x1023   :  { %v2087_v8 = vand.u32 4294901760, %v2086_v5 }
0x1024   :  { %2335 = vmatpush.msrb.mxu3 %v5236_v61  ;;  %2251 = vmatpush.msra.mxu0 %v5236_v61 }
0x1025   :  { %2172 = vmatmul.f32.vlgmr.msrb.gmra.mxu1 %v2087_v8  ;;  %v2088_v10 = vsub.f32 %v2086_v5, %v2087_v8 }
0x1026   :  { %2385 = vmatpush.msrb.mxu1 %v5231_v58 }
0x1027   :  { %v2089_v11 = vand.u32 4294901760, %v2088_v10 }
0x1028   :  { %2387 = vmatpush.msrb.mxu1 %v5236_v61 }
0x1029   :  { %2090 = vmatmul.f32.vlgmr.msrb.gmra.mxu2 %v2089_v11  ;;  %2147 = vmatmul.f32.vlgmr.msrb.gmra.mxu0 %v2086_v5  ;;  %v5515_v53 = vpop.f32.mrf.mxu1 }
0x102a   :  { %2222 = vmatmul.f32.vlgmr.msra.gmra.mxu3 %v2085_v3  ;;  %2308 = vmatpush.msrb.mxu2 %v5234_v60 }
0x102b   :  { %2360 = vmatpush.msrb.mxu0 %v5240_v62  ;;  %2442 = vmatpush.msra.mxu3 %v5303_v27 }
0x102c   :  { %2311 = vmatpush.msrb.mxu2 %v5243_v63 }
0x102d   :  { %2364 = vmatpush.msrb.mxu0 %v5251_v1  ;;  %2448 = vmatpush.msra.mxu3 %v5305_v32 }
0x1031   :  { %2199 = vmatmul.f32.vlgmr.msra.gmra.mxu2 %v2085_v3 }
0x1032   :  { %2411 = vmatpush.msra.mxu2 %v5267_v6 }
0x1034   :  { %2413 = vmatpush.msra.mxu2 %v5269_v9 }
0x107a   :  { %v830_v37 = vpop.xlane.xlu1 %829 }
0x107b   :  { %vm834_vm8 = vcmp.ge.f32.partialorder %v5424_v7, %v830_v37 }
0x107c   :  { %v836_v41 = vsel %vm834_vm8, %v5223_v36, 16 }
0x107d   :  { %v838_v42 = vsel %vm301_vm2, %v836_v41, 2147483647 }
0x107e   :  { %v840_v47 = vshra.s32 %v838_v42, 16 }
0x1080   :  { %v842_v26 = vcvt.s32.f32 %v840_v47 }
0x1082   :  { %843 = vmin.xlane.f32.xlu0 %v842_v26 }
0x108a   :  { %v833_v51 = vpop.xlane.xlu2 %832 }
0x108b   :  { %vm835_vm9 = vcmp.ge.f32.partialorder %v5442_v57, %v833_v51 }
0x108c   :  { %v837_v52 = vsel %vm835_vm9, %v5223_v36, 16 }
0x108d   :  { %v853_v29 = vsel %vm301_vm2, %v837_v52, 2147483647 }
0x108e   :  { %v855_v59 = vshra.s32 %v853_v29, 16  ;;  %v1960_v0 = vpop.f32.mrf.mxu1 }
0x1090   :  { %v857_v43 = vcvt.s32.f32 %v855_v59  ;;  %v839_v59 = vand.u32 65535, %v838_v42 }
0x1092   :  { %858 = vmin.xlane.f32.xlu1 %v857_v43  ;;  %v841_v46 = vcvt.s32.f32 %v839_v59 }
0x1096   :  { %v1929_v3 = vpop.f32.mrf.mxu0  ;;  %v1986_v8 = vpop.f32.mrf.mxu2 }
0x1097   :  { %v1961_v5 = vadd.f32 %v1960_v0, %v1929_v3  ;;  %v2061_v51 = vpop.f32.mrf.mxu1  ;;  %v854_v0 = vand.u32 65535, %v853_v29 }
0x1098   :  { %v2011_v11 = vpop.f32.mrf.mxu3 }
0x1099   :  { %v1987_v10 = vadd.f32 %v1986_v8, %v1961_v5  ;;  %v856_v5 = vcvt.s32.f32 %v854_v0 }
0x109b   :  { %v2012_v37 = vadd.f32 %v2011_v11, %v1987_v10 }
0x109e   :  { %v2038_v41 = vpop.f32.mrf.mxu0 }
0x109f   :  { %v2039_v47 = vadd.f32 %v2038_v41, %v2012_v37 }
0x10a1   :  { %v5523_v52 = vadd.f32 %v2061_v51, %v2039_v47 }
0x10a4   :  { %v2122_v18 = vpop.f32.mrf.mxu3 }
0x10ac   :  { %v2091_v56 = vpop.f32.mrf.mxu2 }
0x10ad   :  { %v5525_v44 = vadd.f32 %v2122_v18, %v2091_v56  ;;  %v6016_v56 = vmov 0.0  }
0x10f5   :  { %v844_v34 = vpop.xlane.xlu0 %843 }
0x10f6   :  { %vm845_vm10 = vcmp.eq.f32.partialorder %v842_v26, %v844_v34  ;;  %v850_v10 = vcvt.f32.s32 %v844_v34 }
0x10f7   :  { %v846_v39 = vsel %vm845_vm10, %v841_v46, inf }
0x10f8   :  { %847 = vmin.xlane.f32.xlu2 %v846_v39  ;;  %v851_v37 = vshll.u32 %v850_v10, 16 }
0x1105   :  { %v859_v3 = vpop.xlane.xlu1 %858 }
0x1106   :  { %vm860_vm11 = vcmp.eq.f32.partialorder %v857_v43, %v859_v3  ;;  %v865_v34 = vcvt.f32.s32 %v859_v3 }
0x1107   :  { %v861_v8 = vsel %vm860_vm11, %v856_v5, inf }
0x1108   :  { %862 = vmin.xlane.f32.xlu0 %v861_v8  ;;  %v866_v59 = vshll.u32 %v865_v34, 16 }
0x116b   :  { %v848_v11 = vpop.xlane.xlu2 %847 }
0x116c   :  { %v849_v41 = vcvt.f32.s32 %v848_v11 }
0x116e   :  { %v852_v47 = vadd.s32 %v851_v37, %v849_v41 }
0x1170   :  { %vm868_vm12 = vcmp.eq.s32.totalorder %v5223_v36, %v852_v47 }
0x1171   :  { %v4614_v18 = vsel %vm868_vm12, 1.0, %v6016_v56  ;;  %v5530_v42 = vsel %vm868_vm12, 1.0, %v5421_v33  ;;  %v5533_v26 = vsel %vm868_vm12, -1e+30, %v5424_v7 }
0x1172   :  { %875 = vst.msk [vmem:[#allocation2 + $0xc] sm:$0x3] %vm301_vm2, %v4614_v18  ;;  %v881_v29 = vsel %vm301_vm2, %v5533_v26, -inf }
0x1173   :  { %882 = vmax.xlane.f32.xlu1 %v881_v29 }
0x1179   :  { %v2229_v39 = vld [vmem:[#allocation2 + $0xc] sm:$0x3] }
0x117a   :  { %v2232_v43 = vsel %vm281_vm1, %v2229_v39, 0 }
0x117b   :  { %v863_v46 = vpop.xlane.xlu0 %862  ;;  %v2252_v51 = vand.u32 4294901760, %v2232_v43 }
0x117c   :  { %v864_v0 = vcvt.f32.s32 %v863_v46 }
0x117d   :  { %2288 = vmatmul.f32.vlgmr.msra.gmra.mxu1 %v2252_v51  ;;  %v2253_v33 = vsub.f32 %v2232_v43, %v2252_v51 }
0x117e   :  { %v867_v5 = vadd.s32 %v866_v59, %v864_v0  ;;  %2495 = vmatpush.msra.mxu1 %v5267_v6 }
0x117f   :  { %2314 = vmatmul.f32.vlgmr.msrb.gmra.mxu2 %v2253_v33  ;;  %v2254_v7 = vand.u32 4294901760, %v2253_v33 }
0x1180   :  { %vm869_vm13 = vcmp.eq.s32.totalorder %v5223_v36, %v867_v5  ;;  %2497 = vmatpush.msra.mxu1 %v5269_v9  ;;  %2522 = vmatpush.msrb.mxu2 %v5293_v21  ;;  %v1303_v5 = vadd.f32 %v5471_v13, %v5469_v12 }
0x1181   :  { %v4615_v3 = vsel %vm869_vm13, 1.0, %v6016_v56  ;;  %v5545_v8 = vsel %vm869_vm13, 1.0, %v5439_v55  ;;  %2339 = vmatmul.f32.vlgmr.msrb.gmra.mxu3 %v2254_v7  ;;  %v5548_v10 = vsel %vm869_vm13, -1e+30, %v5442_v57  ;;  %v2255_v11 = vsub.f32 %v2253_v33, %v2254_v7 }
0x1182   :  { %876 = vst.msk [vmem:[#allocation2 + $0xe] sm:$0x3] %vm301_vm2, %v4615_v3  ;;  %v884_v37 = vsel %vm301_vm2, %v5548_v10, -inf  ;;  %2547 = vmatpush.msrb.mxu3 %v5267_v6  ;;  %2526 = vmatpush.msrb.mxu2 %v5296_v22  ;;  %v1632_v3 = vadd.f32 %v5496_v40, %v5493_v35 }
0x1183   :  { %885 = vmax.xlane.f32.xlu2 %v884_v37  ;;  %v2256_v41 = vand.u32 4294901760, %v2255_v11  ;;  %v2173_v37 = vpop.f32.mrf.mxu1 }
0x1184   :  { %2549 = vmatpush.msrb.mxu3 %v5269_v9  ;;  %v1658_v13 = vadd.f32 %v5500_v45, %v1632_v3 }
0x1185   :  { %2257 = vmatmul.f32.vlgmr.msra.gmra.mxu0 %v2256_v41  ;;  %2389 = vmatmul.f32.vlgmr.msrb.gmra.mxu1 %v2252_v51  ;;  %v2148_v41 = vpop.f32.mrf.mxu0 }
0x1186   :  { %2470 = vmatpush.msra.mxu0 %v5276_v16  ;;  %2609 = vmatpush.msrb.mxu1 %v5256_v2  ;;  %v1683_v40 = vadd.f32 %v5502_v48, %v1658_v13  ;;  %v1465_v48 = vadd.f32 %v5483_v15, %v5481_v25  ;;  %v1794_v13 = vadd.f32 %v5510_v50, %v5508_v38 }
0x1188   :  { %2473 = vmatpush.msra.mxu0 %v5280_v17  ;;  %2615 = vmatpush.msrb.mxu1 %v5262_v4 }
0x1189   :  { %v2230_v55 = vld [vmem:[#allocation2 + $0xe] sm:$0x3] }
0x118a   :  { %v2394_v57 = vsel %vm281_vm1, %v2230_v55, 0 }
0x118b   :  { %v2414_v47 = vand.u32 4294901760, %v2394_v57 }
0x118d   :  { %2366 = vmatmul.f32.vlgmr.msrb.gmra.mxu0 %v2252_v51  ;;  %v2415_v18 = vsub.f32 %v2394_v57, %v2414_v47  ;;  %2450 = vmatmul.f32.vlgmr.msra.gmra.mxu3 %v2414_v47  ;;  %v1329_v57 = vadd.f32 %v5473_v14, %v1303_v5 }
0x118e   :  { %2662 = vmatpush.msra.mxu3 %v5231_v58  ;;  %2578 = vmatpush.msrb.mxu0 %v5231_v58 }
0x118f   :  { %v2416_v29 = vand.u32 4294901760, %v2415_v18  ;;  %v1354_v12 = vadd.f32 %v5475_v20, %v1329_v57 }
0x1190   :  { %2664 = vmatpush.msra.mxu3 %v5236_v61  ;;  %2580 = vmatpush.msrb.mxu0 %v5236_v61 }
0x1191   :  { %2501 = vmatmul.f32.vlgmr.msra.gmra.mxu1 %v2416_v29  ;;  %v2417_v34 = vsub.f32 %v2415_v18, %v2416_v29  ;;  %v2223_v29 = vpop.f32.mrf.mxu3  ;;  %v1381_v35 = vadd.f32 %v5477_v23, %v1354_v12 }
0x1192   :  { %2714 = vmatpush.msra.mxu1 %v5231_v58 }
0x1193   :  { %v2418_v39 = vand.u32 4294901760, %v2417_v34 }
0x1194   :  { %2716 = vmatpush.msra.mxu1 %v5236_v61 }
0x1195   :  { %2419 = vmatmul.f32.vlgmr.msra.gmra.mxu2 %v2418_v39  ;;  %2476 = vmatmul.f32.vlgmr.msra.gmra.mxu0 %v2415_v18 }
0x1196   :  { %2551 = vmatmul.f32.vlgmr.msrb.gmra.mxu3 %v2414_v47  ;;  %2637 = vmatpush.msra.mxu2 %v5234_v60 }
0x1197   :  { %2689 = vmatpush.msra.mxu0 %v5240_v62  ;;  %2771 = vmatpush.msrb.mxu3 %v5303_v27 }
0x1198   :  { %2640 = vmatpush.msra.mxu2 %v5243_v63 }
0x1199   :  { %2693 = vmatpush.msra.mxu0 %v5251_v1  ;;  %2777 = vmatpush.msrb.mxu3 %v5305_v32 }
0x119d   :  { %2528 = vmatmul.f32.vlgmr.msrb.gmra.mxu2 %v2414_v47  ;;  %v2200_v47 = vpop.f32.mrf.mxu2 }
0x119e   :  { %2740 = vmatpush.msrb.mxu2 %v5267_v6 }
0x11a0   :  { %2742 = vmatpush.msrb.mxu2 %v5269_v9 }
0x11e6   :  { %v883_v43 = vpop.xlane.xlu1 %882 }
0x11e7   :  { %vm887_vm14 = vcmp.ge.f32.partialorder %v5533_v26, %v883_v43  ;;  %v1710_v43 = vadd.f32 %v5504_v19, %v1683_v40 }
0x11e8   :  { %v889_v46 = vsel %vm887_vm14, %v5223_v36, 16 }
0x11e9   :  { %v5578_v51 = vsel %vm301_vm2, %v889_v46, 2147483647  ;;  %v1733_v20 = vadd.f32 %v5506_v49, %v1710_v43  ;;  %v1820_v49 = vadd.f32 %v5517_v54, %v1794_v13  ;;  %v6017_v43 = vld [vmem:[#allocation28_spill] sm:$0xff]  ;;  %v6019_v54 = vld [vmem:[#allocation29_spill] sm:$0xff] }
0x11ea   :  { %v893_v59 = vshra.s32 %v5578_v51, 16 }
0x11eb   :  { %v1845_v25 = vadd.f32 %v5515_v53, %v1820_v49 }
0x11ec   :  { %v5581_v0 = vcvt.s32.f32 %v893_v59  ;;  %v1404_v59 = vadd.f32 %v5479_v24, %v1381_v35  ;;  %v1491_v35 = vadd.f32 %v5485_v28, %v1465_v48 }
0x11ee   :  { %896 = vmin.xlane.f32.xlu0 %v5581_v0  ;;  %v1516_v40 = vadd.f32 %v5487_v30, %v1491_v35 }
0x11f6   :  { %v886_v33 = vpop.xlane.xlu2 %885 }
0x11f7   :  { %vm888_vm15 = vcmp.ge.f32.partialorder %v5548_v10, %v886_v33 }
0x11f8   :  { %v890_v7 = vsel %vm888_vm15, %v5223_v36, 16 }
0x11f9   :  { %v5591_v11 = vsel %vm301_vm2, %v890_v7, 2147483647  ;;  %v1568_v7 = vmax.f32 %v1404_v59, 0.0  ;;  %v6018_v59 = vld [vmem:[#allocation27_spill] sm:$0xff] }
0x11fa   :  { %v908_v55 = vshra.s32 %v5591_v11, 16  ;;  %v2289_v34 = vpop.f32.mrf.mxu1 }
0x11fc   :  { %v5595_v18 = vcvt.s32.f32 %v908_v55  ;;  %v1897_v55 = vmax.f32 %v1568_v7, %v1733_v20 }
0x11fe   :  { %911 = vmin.xlane.f32.xlu1 %v5595_v18  ;;  %v2226_v12 = vmax.f32 %v1897_v55, %v5523_v52 }
0x1202   :  { %v2258_v39 = vpop.f32.mrf.mxu0  ;;  %v2315_v14 = vpop.f32.mrf.mxu2 }
0x1203   :  { %v2290_v46 = vadd.f32 %v2289_v34, %v2258_v39  ;;  %v2390_v23 = vpop.f32.mrf.mxu1  ;;  %v2149_v34 = vadd.f32 %v2148_v41, %v5525_v44  ;;  %v1543_v39 = vadd.f32 %v5489_v31, %v1516_v40 }
0x1204   :  { %v2340_v5 = vpop.f32.mrf.mxu3 }
0x1205   :  { %v2316_v33 = vadd.f32 %v2315_v14, %v2290_v46  ;;  %v1872_v46 = vadd.f32 %v6017_v43, %v1845_v25  ;;  %v2174_v14 = vadd.f32 %v2173_v37, %v2149_v34  ;;  %v892_v37 = vand.u32 65535, %v5578_v51 }
0x1207   :  { %v2341_v45 = vadd.f32 %v2340_v5, %v2316_v33  ;;  %v1566_v33 = vadd.f32 %v6018_v59, %v1543_v39  ;;  %v2201_v28 = vadd.f32 %v2200_v47, %v2174_v14  ;;  %v1895_v20 = vadd.f32 %v6019_v54, %v1872_v46 }
0x1209   :  { %v2224_v44 = vadd.f32 %v2223_v29, %v2201_v28 }
0x120a   :  { %v2367_v3 = vpop.f32.mrf.mxu0 }
0x120b   :  { %v2368_v57 = vadd.f32 %v2367_v3, %v2341_v45  ;;  %v1569_v45 = vmax.f32 %v1566_v33, 0.0 }
0x120d   :  { %v2391_v19 = vadd.f32 %v2390_v23, %v2368_v57  ;;  %v1898_v7 = vmax.f32 %v1569_v45, %v1895_v20 }
0x120e   :  { %v2502_v30 = vpop.f32.mrf.mxu1 }
0x120f   :  { %v5610_v24 = vmax.f32 %v2226_v12, %v2391_v19  ;;  %v2227_v55 = vmax.f32 %v1898_v7, %v2224_v44  ;;  %v894_v12 = vcvt.s32.f32 %v892_v37  ;;  %v907_v19 = vand.u32 65535, %v5591_v11 }
0x1210   :  { %v2451_v15 = vpop.f32.mrf.mxu3 }
0x1211   :  { %v909_v13 = vcvt.s32.f32 %v907_v19 }
0x1212   :  { %v2477_v50 = vpop.f32.mrf.mxu0 }
0x1218   :  { %v2420_v52 = vpop.f32.mrf.mxu2 }
0x1219   :  { %v2452_v38 = vadd.f32 %v2451_v15, %v2420_v52  ;;  %v2552_v3 = vpop.f32.mrf.mxu3 }
0x121b   :  { %v2478_v5 = vadd.f32 %v2477_v50, %v2452_v38 }
0x121d   :  { %v2503_v41 = vadd.f32 %v2502_v30, %v2478_v5 }
0x1220   :  { %v2529_v31 = vpop.f32.mrf.mxu2 }
0x1221   :  { %v2530_v53 = vadd.f32 %v2529_v31, %v2503_v41 }
0x1223   :  { %v2553_v57 = vadd.f32 %v2552_v3, %v2530_v53 }
0x1225   :  { %v5621_v23 = vmax.f32 %v2227_v55, %v2553_v57 }
0x1261   :  { %v897_v48 = vpop.xlane.xlu0 %896 }
0x1262   :  { %vm898_vm3 = vcmp.eq.f32.partialorder %v5581_v0, %v897_v48  ;;  %v903_v49 = vcvt.f32.s32 %v897_v48 }
0x1263   :  { %v899_v47 = vsel %vm898_vm3, %v894_v12, inf }
0x1264   :  { %900 = vmin.xlane.f32.xlu2 %v899_v47  ;;  %v904_v34 = vshll.u32 %v903_v49, 16 }
0x1271   :  { %v912_v29 = vpop.xlane.xlu1 %911 }
0x1272   :  { %vm913_vm4 = vcmp.eq.f32.partialorder %v5595_v18, %v912_v29  ;;  %v918_v15 = vcvt.f32.s32 %v912_v29 }
0x1273   :  { %v914_v35 = vsel %vm913_vm4, %v909_v13, inf }
0x1274   :  { %915 = vmin.xlane.f32.xlu0 %v914_v35  ;;  %v919_v38 = vshll.u32 %v918_v15, 16 }
0x12d7   :  { %v901_v40 = vpop.xlane.xlu2 %900 }
0x12d8   :  { %v902_v39 = vcvt.f32.s32 %v901_v40 }
0x12da   :  { %v905_v25 = vadd.s32 %v904_v34, %v902_v39 }
0x12dc   :  { %vm921_vm5 = vcmp.eq.s32.totalorder %v5223_v36, %v905_v25 }
0x12dd   :  { %v4616_v51 = vsel %vm921_vm5, 1.0, %v6016_v56  ;;  %v5630_v0 = vsel %vm921_vm5, 1.0, %v5530_v42  ;;  %v5633_v11 = vsel %vm921_vm5, -1e+30, %v5533_v26 }
0x12de   :  { %928 = vst.msk [vmem:[#allocation2 + $0x10] sm:$0x3] %vm301_vm2, %v4616_v51  ;;  %v934_v18 = vsel %vm301_vm2, %v5633_v11, -inf }
0x12df   :  { %935 = vmax.xlane.f32.xlu1 %v934_v18 }
0x12e5   :  { %v2558_v52 = vld [vmem:[#allocation2 + $0x10] sm:$0x3] }
0x12e6   :  { %v2561_v43 = vsel %vm281_vm1, %v2558_v52, 0 }
0x12e7   :  { %v916_v46 = vpop.xlane.xlu0 %915  ;;  %v2581_v14 = vand.u32 4294901760, %v2561_v43 }
0x12e8   :  { %v917_v50 = vcvt.f32.s32 %v916_v46 }
0x12e9   :  { %2617 = vmatmul.f32.vlgmr.msrb.gmra.mxu1 %v2581_v14  ;;  %v2582_v42 = vsub.f32 %v2561_v43, %v2581_v14 }
0x12ea   :  { %v920_v59 = vadd.s32 %v919_v38, %v917_v50  ;;  %2824 = vmatpush.msrb.mxu1 %v5267_v6 }
0x12eb   :  { %2643 = vmatmul.f32.vlgmr.msra.gmra.mxu2 %v2582_v42  ;;  %v2583_v26 = vand.u32 4294901760, %v2582_v42 }
0x12ec   :  { %vm922_vm6 = vcmp.eq.s32.totalorder %v5223_v36, %v920_v59  ;;  %2826 = vmatpush.msrb.mxu1 %v5269_v9  ;;  %2851 = vmatpush.msra.mxu2 %v5293_v21 }
0x12ed   :  { %v4617_v33 = vsel %vm922_vm6, 1.0, %v6016_v56  ;;  %v5645_v28 = vsel %vm922_vm6, 1.0, %v5545_v8  ;;  %2668 = vmatmul.f32.vlgmr.msra.gmra.mxu3 %v2583_v26  ;;  %v5648_v5 = vsel %vm922_vm6, -1e+30, %v5548_v10  ;;  %v2584_v54 = vsub.f32 %v2582_v42, %v2583_v26 }
0x12ee   :  { %929 = vst.msk [vmem:[#allocation2 + $0x12] sm:$0x3] %vm301_vm2, %v4617_v33  ;;  %v937_v20 = vsel %vm301_vm2, %v5648_v5, -inf  ;;  %2876 = vmatpush.msra.mxu3 %v5267_v6  ;;  %2855 = vmatpush.msra.mxu2 %v5296_v22 }
0x12ef   :  { %938 = vmax.xlane.f32.xlu2 %v937_v20  ;;  %v2585_v30 = vand.u32 4294901760, %v2584_v54 }
0x12f0   :  { %2878 = vmatpush.msra.mxu3 %v5269_v9 }
0x12f1   :  { %2586 = vmatmul.f32.vlgmr.msrb.gmra.mxu0 %v2585_v30  ;;  %2718 = vmatmul.f32.vlgmr.msra.gmra.mxu1 %v2581_v14 }
0x12f2   :  { %2799 = vmatpush.msrb.mxu0 %v5276_v16  ;;  %2938 = vmatpush.msra.mxu1 %v5256_v2 }
0x12f4   :  { %2802 = vmatpush.msrb.mxu0 %v5280_v17  ;;  %2944 = vmatpush.msra.mxu1 %v5262_v4 }
0x12f5   :  { %v2559_v8 = vld [vmem:[#allocation2 + $0x12] sm:$0x3] }
0x12f6   :  { %v2723_v10 = vsel %vm281_vm1, %v2559_v8, 0 }
0x12f7   :  { %v2743_v45 = vand.u32 4294901760, %v2723_v10 }
0x12f9   :  { %2695 = vmatmul.f32.vlgmr.msra.gmra.mxu0 %v2581_v14  ;;  %v2744_v44 = vsub.f32 %v2723_v10, %v2743_v45  ;;  %2779 = vmatmul.f32.vlgmr.msrb.gmra.mxu3 %v2743_v45 }
0x12fa   :  { %2991 = vmatpush.msrb.mxu3 %v5231_v58  ;;  %2907 = vmatpush.msra.mxu0 %v5231_v58 }
0x12fb   :  { %v2745_v41 = vand.u32 4294901760, %v2744_v44 }
0x12fc   :  { %2993 = vmatpush.msrb.mxu3 %v5236_v61  ;;  %2909 = vmatpush.msra.mxu0 %v5236_v61 }
0x12fd   :  { %2830 = vmatmul.f32.vlgmr.msrb.gmra.mxu1 %v2745_v41  ;;  %v2746_v31 = vsub.f32 %v2744_v44, %v2745_v41 }
0x12fe   :  { %3043 = vmatpush.msrb.mxu1 %v5231_v58 }
0x12ff   :  { %v2747_v7 = vand.u32 4294901760, %v2746_v31 }
0x1300   :  { %3045 = vmatpush.msrb.mxu1 %v5236_v61 }
0x1301   :  { %2748 = vmatmul.f32.vlgmr.msrb.gmra.mxu2 %v2747_v7  ;;  %2805 = vmatmul.f32.vlgmr.msrb.gmra.mxu0 %v2744_v44 }
0x1302   :  { %2880 = vmatmul.f32.vlgmr.msra.gmra.mxu3 %v2743_v45  ;;  %2966 = vmatpush.msrb.mxu2 %v5234_v60 }
0x1303   :  { %3018 = vmatpush.msrb.mxu0 %v5240_v62  ;;  %3100 = vmatpush.msra.mxu3 %v5303_v27 }
0x1304   :  { %2969 = vmatpush.msrb.mxu2 %v5243_v63 }
0x1305   :  { %3022 = vmatpush.msrb.mxu0 %v5251_v1  ;;  %3106 = vmatpush.msra.mxu3 %v5305_v32 }
0x1309   :  { %2857 = vmatmul.f32.vlgmr.msra.gmra.mxu2 %v2743_v45 }
0x130a   :  { %3069 = vmatpush.msra.mxu2 %v5267_v6 }
0x130c   :  { %3071 = vmatpush.msra.mxu2 %v5269_v9 }
0x1352   :  { %v936_v53 = vpop.xlane.xlu1 %935 }
0x1353   :  { %vm940_vm7 = vcmp.ge.f32.partialorder %v5633_v11, %v936_v53 }
0x1354   :  { %v942_v3 = vsel %vm940_vm7, %v5223_v36, 16 }
0x1355   :  { %v944_v55 = vsel %vm301_vm2, %v942_v3, 2147483647 }
0x1356   :  { %v946_v57 = vshra.s32 %v944_v55, 16  ;;  %v945_v10 = vand.u32 65535, %v944_v55 }
0x1358   :  { %v948_v37 = vcvt.s32.f32 %v946_v57  ;;  %v947_v44 = vcvt.s32.f32 %v945_v10 }
0x135a   :  { %949 = vmin.xlane.f32.xlu0 %v948_v37 }
0x1362   :  { %v939_v48 = vpop.xlane.xlu2 %938 }
0x1363   :  { %vm941_vm8 = vcmp.ge.f32.partialorder %v5648_v5, %v939_v48 }
0x1364   :  { %v943_v12 = vsel %vm941_vm8, %v5223_v36, 16 }
0x1365   :  { %v959_v47 = vsel %vm301_vm2, %v943_v12, 2147483647 }
0x1366   :  { %v961_v19 = vshra.s32 %v959_v47, 16  ;;  %v2618_v13 = vpop.f32.mrf.mxu1  ;;  %v960_v31 = vand.u32 65535, %v959_v47 }
0x1368   :  { %v963_v29 = vcvt.s32.f32 %v961_v19  ;;  %v962_v53 = vcvt.s32.f32 %v960_v31 }
0x136a   :  { %964 = vmin.xlane.f32.xlu1 %v963_v29 }
0x136e   :  { %v2587_v35 = vpop.f32.mrf.mxu0  ;;  %v2644_v40 = vpop.f32.mrf.mxu2 }
0x136f   :  { %v2619_v49 = vadd.f32 %v2618_v13, %v2587_v35  ;;  %v2719_v15 = vpop.f32.mrf.mxu1 }
0x1370   :  { %v2669_v39 = vpop.f32.mrf.mxu3 }
0x1371   :  { %v2645_v34 = vadd.f32 %v2644_v40, %v2619_v49 }
0x1373   :  { %v2670_v25 = vadd.f32 %v2669_v39, %v2645_v34 }
0x1376   :  { %v2696_v51 = vpop.f32.mrf.mxu0 }
0x1377   :  { %v2697_v18 = vadd.f32 %v2696_v51, %v2670_v25 }
0x1379   :  { %v5681_v52 = vadd.f32 %v2719_v15, %v2697_v18 }
0x137a   :  { %v2831_v59 = vpop.f32.mrf.mxu1 }
0x137b   :  { %v2884_v43 = vmax.f32 %v5610_v24, %v5681_v52 }
0x137c   :  { %v2780_v46 = vpop.f32.mrf.mxu3 }
0x137e   :  { %v2806_v50 = vpop.f32.mrf.mxu0 }
0x1384   :  { %v2749_v14 = vpop.f32.mrf.mxu2 }
0x1385   :  { %v2781_v38 = vadd.f32 %v2780_v46, %v2749_v14  ;;  %v2881_v20 = vpop.f32.mrf.mxu3 }
0x1387   :  { %v2807_v42 = vadd.f32 %v2806_v50, %v2781_v38 }
0x1389   :  { %v2832_v26 = vadd.f32 %v2831_v59, %v2807_v42 }
0x138c   :  { %v2858_v33 = vpop.f32.mrf.mxu2 }
0x138d   :  { %v2859_v54 = vadd.f32 %v2858_v33, %v2832_v26 }
0x138f   :  { %v5685_v30 = vadd.f32 %v2881_v20, %v2859_v54 }
0x1391   :  { %v2885_v8 = vmax.f32 %v5621_v23, %v5685_v30 }
0x13cd   :  { %v950_v45 = vpop.xlane.xlu0 %949 }
0x13ce   :  { %vm951_vm9 = vcmp.eq.f32.partialorder %v948_v37, %v950_v45  ;;  %v956_v57 = vcvt.f32.s32 %v950_v45 }
0x13cf   :  { %v952_v41 = vsel %vm951_vm9, %v947_v44, inf }
0x13d0   :  { %953 = vmin.xlane.f32.xlu2 %v952_v41  ;;  %v957_v12 = vshll.u32 %v956_v57, 16 }
0x13dd   :  { %v965_v7 = vpop.xlane.xlu1 %964 }
0x13de   :  { %vm966_vm10 = vcmp.eq.f32.partialorder %v963_v29, %v965_v7  ;;  %v971_v29 = vcvt.f32.s32 %v965_v7 }
0x13df   :  { %v967_v3 = vsel %vm966_vm10, %v962_v53, inf }
0x13e0   :  { %968 = vmin.xlane.f32.xlu0 %v967_v3  ;;  %v972_v25 = vshll.u32 %v971_v29, 16 }
0x1443   :  { %v954_v48 = vpop.xlane.xlu2 %953 }
0x1444   :  { %v955_v19 = vcvt.f32.s32 %v954_v48 }
0x1446   :  { %v958_v13 = vadd.s32 %v957_v12, %v955_v19 }
0x1448   :  { %vm974_vm11 = vcmp.eq.s32.totalorder %v5223_v36, %v958_v13 }
0x1449   :  { %v4618_v55 = vsel %vm974_vm11, 1.0, %v6016_v56  ;;  %v5692_v35 = vsel %vm974_vm11, 1.0, %v5630_v0  ;;  %v5695_v37 = vsel %vm974_vm11, -1e+30, %v5633_v11 }
0x144a   :  { %981 = vst.msk [vmem:[#allocation2 + $0x14] sm:$0x3] %vm301_vm2, %v4618_v55  ;;  %v987_v47 = vsel %vm301_vm2, %v5695_v37, -inf }
0x144b   :  { %988 = vmax.xlane.f32.xlu1 %v987_v47 }
0x1451   :  { %v2887_v49 = vld [vmem:[#allocation2 + $0x14] sm:$0x3] }
0x1452   :  { %v2890_v40 = vsel %vm281_vm1, %v2887_v49, 0 }
0x1453   :  { %v969_v34 = vpop.xlane.xlu0 %968  ;;  %v2910_v39 = vand.u32 4294901760, %v2890_v40 }
0x1454   :  { %v970_v51 = vcvt.f32.s32 %v969_v34 }
0x1455   :  { %2946 = vmatmul.f32.vlgmr.msra.gmra.mxu1 %v2910_v39  ;;  %v2911_v0 = vsub.f32 %v2890_v40, %v2910_v39 }
0x1456   :  { %v973_v18 = vadd.s32 %v972_v25, %v970_v51  ;;  %3153 = vmatpush.msra.mxu1 %v5267_v6 }
0x1457   :  { %2972 = vmatmul.f32.vlgmr.msrb.gmra.mxu2 %v2911_v0  ;;  %v2912_v11 = vand.u32 4294901760, %v2911_v0 }
0x1458   :  { %vm975_vm12 = vcmp.eq.s32.totalorder %v5223_v36, %v973_v18  ;;  %3155 = vmatpush.msra.mxu1 %v5269_v9  ;;  %3180 = vmatpush.msrb.mxu2 %v5293_v21 }
0x1459   :  { %v4619_v15 = vsel %vm975_vm12, 1.0, %v6016_v56  ;;  %v5707_v46 = vsel %vm975_vm12, 1.0, %v5645_v28  ;;  %2997 = vmatmul.f32.vlgmr.msrb.gmra.mxu3 %v2912_v11  ;;  %v5710_v14 = vsel %vm975_vm12, -1e+30, %v5648_v5  ;;  %v2913_v38 = vsub.f32 %v2911_v0, %v2912_v11 }
0x145a   :  { %982 = vst.msk [vmem:[#allocation2 + $0x16] sm:$0x3] %vm301_vm2, %v4619_v15  ;;  %v990_v50 = vsel %vm301_vm2, %v5710_v14, -inf  ;;  %3205 = vmatpush.msrb.mxu3 %v5267_v6  ;;  %3184 = vmatpush.msrb.mxu2 %v5296_v22 }
0x145b   :  { %991 = vmax.xlane.f32.xlu2 %v990_v50  ;;  %v2914_v42 = vand.u32 4294901760, %v2913_v38 }
0x145c   :  { %3207 = vmatpush.msrb.mxu3 %v5269_v9 }
0x145d   :  { %2915 = vmatmul.f32.vlgmr.msra.gmra.mxu0 %v2914_v42  ;;  %3047 = vmatmul.f32.vlgmr.msrb.gmra.mxu1 %v2910_v39 }
0x145e   :  { %3128 = vmatpush.msra.mxu0 %v5276_v16  ;;  %3267 = vmatpush.msrb.mxu1 %v5256_v2 }
0x1460   :  { %3131 = vmatpush.msra.mxu0 %v5280_v17  ;;  %3273 = vmatpush.msrb.mxu1 %v5262_v4 }
0x1461   :  { %v2888_v28 = vld [vmem:[#allocation2 + $0x16] sm:$0x3] }
0x1462   :  { %v3052_v5 = vsel %vm281_vm1, %v2888_v28, 0 }
0x1463   :  { %v3072_v59 = vand.u32 4294901760, %v3052_v5 }
0x1465   :  { %3024 = vmatmul.f32.vlgmr.msrb.gmra.mxu0 %v2910_v39  ;;  %v3073_v26 = vsub.f32 %v3052_v5, %v3072_v59  ;;  %3108 = vmatmul.f32.vlgmr.msra.gmra.mxu3 %v3072_v59 }
0x1466   :  { %3320 = vmatpush.msra.mxu3 %v5231_v58  ;;  %3236 = vmatpush.msrb.mxu0 %v5231_v58 }
0x1467   :  { %v3074_v33 = vand.u32 4294901760, %v3073_v26 }
0x1468   :  { %3322 = vmatpush.msra.mxu3 %v5236_v61  ;;  %3238 = vmatpush.msrb.mxu0 %v5236_v61 }
0x1469   :  { %3159 = vmatmul.f32.vlgmr.msra.gmra.mxu1 %v3074_v33  ;;  %v3075_v54 = vsub.f32 %v3073_v26, %v3074_v33 }
0x146a   :  { %3372 = vmatpush.msra.mxu1 %v5231_v58 }
0x146b   :  { %v3076_v20 = vand.u32 4294901760, %v3075_v54 }
0x146c   :  { %3374 = vmatpush.msra.mxu1 %v5236_v61 }
0x146d   :  { %3077 = vmatmul.f32.vlgmr.msra.gmra.mxu2 %v3076_v20  ;;  %3134 = vmatmul.f32.vlgmr.msra.gmra.mxu0 %v3073_v26 }
0x146e   :  { %3209 = vmatmul.f32.vlgmr.msrb.gmra.mxu3 %v3072_v59  ;;  %3295 = vmatpush.msra.mxu2 %v5234_v60 }
0x146f   :  { %3347 = vmatpush.msra.mxu0 %v5240_v62  ;;  %3429 = vmatpush.msrb.mxu3 %v5303_v27 }
0x1470   :  { %3298 = vmatpush.msra.mxu2 %v5243_v63 }
0x1471   :  { %3351 = vmatpush.msra.mxu0 %v5251_v1  ;;  %3435 = vmatpush.msrb.mxu3 %v5305_v32 }
0x1475   :  { %3186 = vmatmul.f32.vlgmr.msrb.gmra.mxu2 %v3072_v59 }
0x1476   :  { %3398 = vmatpush.msrb.mxu2 %v5267_v6 }
0x1478   :  { %3400 = vmatpush.msrb.mxu2 %v5269_v9 }
0x14be   :  { %v989_v10 = vpop.xlane.xlu1 %988 }
0x14bf   :  { %vm993_vm13 = vcmp.ge.f32.partialorder %v5695_v37, %v989_v10 }
0x14c0   :  { %v995_v45 = vsel %vm993_vm13, %v5223_v36, 16 }
0x14c1   :  { %v997_v44 = vsel %vm301_vm2, %v995_v45, 2147483647 }
0x14c2   :  { %v999_v41 = vshra.s32 %v997_v44, 16  ;;  %v998_v54 = vand.u32 65535, %v997_v44 }
0x14c4   :  { %v1001_v31 = vcvt.s32.f32 %v999_v41  ;;  %v1000_v52 = vcvt.s32.f32 %v998_v54 }
0x14c6   :  { %1002 = vmin.xlane.f32.xlu0 %v1001_v31 }
0x14ce   :  { %v992_v7 = vpop.xlane.xlu2 %991 }
0x14cf   :  { %vm994_vm14 = vcmp.ge.f32.partialorder %v5710_v14, %v992_v7 }
0x14d0   :  { %v996_v53 = vsel %vm994_vm14, %v5223_v36, 16 }
0x14d1   :  { %v1012_v3 = vsel %vm301_vm2, %v996_v53, 2147483647 }
0x14d2   :  { %v1014_v57 = vshra.s32 %v1012_v3, 16  ;;  %v2947_v12 = vpop.f32.mrf.mxu1  ;;  %v1013_v20 = vand.u32 65535, %v1012_v3 }
0x14d4   :  { %v1016_v48 = vcvt.s32.f32 %v1014_v57  ;;  %v1015_v45 = vcvt.s32.f32 %v1013_v20 }
0x14d6   :  { %1017 = vmin.xlane.f32.xlu1 %v1016_v48 }
0x14da   :  { %v2916_v19 = vpop.f32.mrf.mxu0  ;;  %v2973_v55 = vpop.f32.mrf.mxu2 }
0x14db   :  { %v2948_v13 = vadd.f32 %v2947_v12, %v2916_v19  ;;  %v3048_v39 = vpop.f32.mrf.mxu1 }
0x14dc   :  { %v2998_v29 = vpop.f32.mrf.mxu3 }
0x14dd   :  { %v2974_v47 = vadd.f32 %v2973_v55, %v2948_v13 }
0x14df   :  { %v2999_v49 = vadd.f32 %v2998_v29, %v2974_v47 }
0x14e2   :  { %v3025_v40 = vpop.f32.mrf.mxu0 }
0x14e3   :  { %v3026_v34 = vadd.f32 %v3025_v40, %v2999_v49 }
0x14e5   :  { %v3049_v25 = vadd.f32 %v3048_v39, %v3026_v34 }
0x14e6   :  { %v3160_v50 = vpop.f32.mrf.mxu1 }
0x14e7   :  { %v5746_v51 = vmax.f32 %v2884_v43, %v3049_v25 }
0x14e8   :  { %v3109_v0 = vpop.f32.mrf.mxu3 }
0x14ea   :  { %v3135_v15 = vpop.f32.mrf.mxu0 }
0x14f0   :  { %v3078_v18 = vpop.f32.mrf.mxu2 }
0x14f1   :  { %v3110_v11 = vadd.f32 %v3109_v0, %v3078_v18  ;;  %v3210_v59 = vpop.f32.mrf.mxu3 }
0x14f3   :  { %v3136_v38 = vadd.f32 %v3135_v15, %v3110_v11 }
0x14f5   :  { %v3161_v42 = vadd.f32 %v3160_v50, %v3136_v38 }
0x14f8   :  { %v3187_v28 = vpop.f32.mrf.mxu2 }
0x14f9   :  { %v3188_v5 = vadd.f32 %v3187_v28, %v3161_v42 }
0x14fb   :  { %v3211_v26 = vadd.f32 %v3210_v59, %v3188_v5 }
0x14fd   :  { %v5751_v33 = vmax.f32 %v2885_v8, %v3211_v26 }
0x1539   :  { %v1003_v24 = vpop.xlane.xlu0 %1002 }
0x153a   :  { %vm1004_vm15 = vcmp.eq.f32.partialorder %v1001_v31, %v1003_v24  ;;  %v1009_v7 = vcvt.f32.s32 %v1003_v24 }
0x153b   :  { %v1005_v43 = vsel %vm1004_vm15, %v1000_v52, inf }
0x153c   :  { %1006 = vmin.xlane.f32.xlu2 %v1005_v43  ;;  %v1010_v57 = vshll.u32 %v1009_v7, 16 }
0x1549   :  { %v1018_v10 = vpop.xlane.xlu1 %1017 }
0x154a   :  { %vm1019_vm3 = vcmp.eq.f32.partialorder %v1016_v48, %v1018_v10  ;;  %v1024_v31 = vcvt.f32.s32 %v1018_v10 }
0x154b   :  { %v1020_v41 = vsel %vm1019_vm3, %v1015_v45, inf }
0x154c   :  { %1021 = vmin.xlane.f32.xlu0 %v1020_v41  ;;  %v1025_v47 = vshll.u32 %v1024_v31, 16 }
0x15af   :  { %v1007_v53 = vpop.xlane.xlu2 %1006 }
0x15b0   :  { %v1008_v12 = vcvt.f32.s32 %v1007_v53 }
0x15b2   :  { %v1011_v19 = vadd.s32 %v1010_v57, %v1008_v12 }
0x15b4   :  { %vm1027_vm4 = vcmp.eq.s32.totalorder %v5223_v36, %v1011_v19 }
0x15b5   :  { %v4620_v23 = vsel %vm1027_vm4, 1.0, %v6016_v56  ;;  %v5756_v30 = vsel %vm1027_vm4, -1e+30, %v5695_v37  ;;  %v5759_v8 = vsel %vm1027_vm4, 1.0, %v5692_v35 }
0x15b6   :  { %1034 = vst.msk [vmem:[#allocation2 + $0x18] sm:$0x3] %vm301_vm2, %v4620_v23  ;;  %v1040_v44 = vsel %vm301_vm2, %v5756_v30, -inf }
0x15b7   :  { %1041 = vmax.xlane.f32.xlu1 %v1040_v44 }
0x15bd   :  { %v3216_v3 = vld [vmem:[#allocation2 + $0x18] sm:$0x3] }
0x15be   :  { %v3219_v48 = vsel %vm281_vm1, %v3216_v3, 0 }
0x15bf   :  { %v1022_v13 = vpop.xlane.xlu0 %1021  ;;  %v3239_v55 = vand.u32 4294901760, %v3219_v48 }
0x15c0   :  { %v1023_v29 = vcvt.f32.s32 %v1022_v13 }
0x15c1   :  { %3275 = vmatmul.f32.vlgmr.msrb.gmra.mxu1 %v3239_v55  ;;  %v3240_v37 = vsub.f32 %v3219_v48, %v3239_v55 }
0x15c2   :  { %v1026_v49 = vadd.s32 %v1025_v47, %v1023_v29  ;;  %3482 = vmatpush.msrb.mxu1 %v5267_v6 }
0x15c3   :  { %3301 = vmatmul.f32.vlgmr.msra.gmra.mxu2 %v3240_v37  ;;  %v3241_v35 = vand.u32 4294901760, %v3240_v37 }
0x15c4   :  { %vm1028_vm5 = vcmp.eq.s32.totalorder %v5223_v36, %v1026_v49  ;;  %3484 = vmatpush.msrb.mxu1 %v5269_v9  ;;  %3509 = vmatpush.msra.mxu2 %v5293_v21 }
0x15c5   :  { %v4621_v40 = vsel %vm1028_vm5, 1.0, %v6016_v56  ;;  %3326 = vmatmul.f32.vlgmr.msra.gmra.mxu3 %v3241_v35  ;;  %v5771_v34 = vsel %vm1028_vm5, -1e+30, %v5710_v14  ;;  %v3242_v39 = vsub.f32 %v3240_v37, %v3241_v35  ;;  %v5774_v25 = vsel %vm1028_vm5, 1.0, %v5707_v46 }
0x15c6   :  { %1035 = vst.msk [vmem:[#allocation2 + $0x1a] sm:$0x3] %vm301_vm2, %v4621_v40  ;;  %v1043_v0 = vsel %vm301_vm2, %v5771_v34, -inf  ;;  %3534 = vmatpush.msra.mxu3 %v5267_v6  ;;  %3513 = vmatpush.msra.mxu2 %v5296_v22 }
0x15c7   :  { %1044 = vmax.xlane.f32.xlu2 %v1043_v0  ;;  %v3243_v18 = vand.u32 4294901760, %v3242_v39 }
0x15c8   :  { %3536 = vmatpush.msra.mxu3 %v5269_v9 }
0x15c9   :  { %3244 = vmatmul.f32.vlgmr.msrb.gmra.mxu0 %v3243_v18  ;;  %3376 = vmatmul.f32.vlgmr.msra.gmra.mxu1 %v3239_v55 }
0x15ca   :  { %3457 = vmatpush.msrb.mxu0 %v5276_v16  ;;  %3596 = vmatpush.msra.mxu1 %v5256_v2 }
0x15cc   :  { %3460 = vmatpush.msrb.mxu0 %v5280_v17  ;;  %3602 = vmatpush.msra.mxu1 %v5262_v4 }
0x15cd   :  { %v3217_v46 = vld [vmem:[#allocation2 + $0x1a] sm:$0x3] }
0x15ce   :  { %v3381_v14 = vsel %vm281_vm1, %v3217_v46, 0 }
0x15cf   :  { %v3401_v11 = vand.u32 4294901760, %v3381_v14 }
0x15d1   :  { %3353 = vmatmul.f32.vlgmr.msra.gmra.mxu0 %v3239_v55  ;;  %v3402_v15 = vsub.f32 %v3381_v14, %v3401_v11  ;;  %3437 = vmatmul.f32.vlgmr.msrb.gmra.mxu3 %v3401_v11 }
0x15d2   :  { %3649 = vmatpush.msrb.mxu3 %v5231_v58  ;;  %3565 = vmatpush.msra.mxu0 %v5231_v58 }
0x15d3   :  { %v3403_v38 = vand.u32 4294901760, %v3402_v15 }
0x15d4   :  { %3651 = vmatpush.msrb.mxu3 %v5236_v61  ;;  %3567 = vmatpush.msra.mxu0 %v5236_v61 }
0x15d5   :  { %3488 = vmatmul.f32.vlgmr.msrb.gmra.mxu1 %v3403_v38  ;;  %v3404_v50 = vsub.f32 %v3402_v15, %v3403_v38 }
0x15d6   :  { %3701 = vmatpush.msrb.mxu1 %v5231_v58 }
0x15d7   :  { %v3405_v42 = vand.u32 4294901760, %v3404_v50 }
0x15d8   :  { %3703 = vmatpush.msrb.mxu1 %v5236_v61 }
0x15d9   :  { %3406 = vmatmul.f32.vlgmr.msrb.gmra.mxu2 %v3405_v42  ;;  %3463 = vmatmul.f32.vlgmr.msrb.gmra.mxu0 %v3402_v15 }
0x15da   :  { %3538 = vmatmul.f32.vlgmr.msra.gmra.mxu3 %v3401_v11  ;;  %3624 = vmatpush.msrb.mxu2 %v5234_v60 }
0x15db   :  { %3676 = vmatpush.msrb.mxu0 %v5240_v62  ;;  %3758 = vmatpush.msra.mxu3 %v5303_v27 }
0x15dc   :  { %3627 = vmatpush.msrb.mxu2 %v5243_v63 }
0x15dd   :  { %3680 = vmatpush.msrb.mxu0 %v5251_v1  ;;  %3764 = vmatpush.msra.mxu3 %v5305_v32 }
0x15e1   :  { %3515 = vmatmul.f32.vlgmr.msra.gmra.mxu2 %v3401_v11 }
0x15e2   :  { %3727 = vmatpush.msra.mxu2 %v5267_v6 }
0x15e4   :  { %3729 = vmatpush.msra.mxu2 %v5269_v9 }
0x162a   :  { %v1042_v28 = vpop.xlane.xlu1 %1041 }
0x162b   :  { %vm1046_vm6 = vcmp.ge.f32.partialorder %v5756_v30, %v1042_v28 }
0x162c   :  { %v1048_v5 = vsel %vm1046_vm6, %v5223_v36, 16 }
0x162d   :  { %v1050_v59 = vsel %vm301_vm2, %v1048_v5, 2147483647 }
0x162e   :  { %v1052_v26 = vshra.s32 %v1050_v59, 16  ;;  %v1051_v14 = vand.u32 65535, %v1050_v59 }
0x1630   :  { %v1054_v54 = vcvt.s32.f32 %v1052_v26  ;;  %v1053_v15 = vcvt.s32.f32 %v1051_v14 }
0x1632   :  { %1055 = vmin.xlane.f32.xlu0 %v1054_v54 }
0x163a   :  { %v1045_v24 = vpop.xlane.xlu2 %1044 }
0x163b   :  { %vm1047_vm7 = vcmp.ge.f32.partialorder %v5771_v34, %v1045_v24 }
0x163c   :  { %v1049_v52 = vsel %vm1047_vm7, %v5223_v36, 16  ;;  %vm298_vm7 = vcmask 1041409  }
0x163d   :  { %v1065_v43 = vsel %vm301_vm2, %v1049_v52, 2147483647 }
0x163e   :  { %v1067_v20 = vshra.s32 %v1065_v43, 16  ;;  %v3276_v45 = vpop.f32.mrf.mxu1  ;;  %v1066_v50 = vand.u32 65535, %v1065_v43 }
0x1640   :  { %v1069_v10 = vcvt.s32.f32 %v1067_v20  ;;  %v1068_v28 = vcvt.s32.f32 %v1066_v50 }
0x1642   :  { %1070 = vmin.xlane.f32.xlu1 %v1069_v10 }
0x1646   :  { %v3245_v41 = vpop.f32.mrf.mxu0  ;;  %v3302_v53 = vpop.f32.mrf.mxu2 }
0x1647   :  { %v3277_v7 = vadd.f32 %v3276_v45, %v3245_v41  ;;  %v3377_v31 = vpop.f32.mrf.mxu1 }
0x1648   :  { %v3327_v12 = vpop.f32.mrf.mxu3 }
0x1649   :  { %v3303_v57 = vadd.f32 %v3302_v53, %v3277_v7 }
0x164b   :  { %v3328_v19 = vadd.f32 %v3327_v12, %v3303_v57 }
0x164e   :  { %v3354_v23 = vpop.f32.mrf.mxu0 }
0x164f   :  { %v3355_v44 = vadd.f32 %v3354_v23, %v3328_v19 }
0x1651   :  { %v5807_v3 = vadd.f32 %v3377_v31, %v3355_v44 }
0x1652   :  { %v3489_v49 = vpop.f32.mrf.mxu1 }
0x1653   :  { %v3542_v48 = vmax.f32 %v5746_v51, %v5807_v3 }
0x1654   :  { %v3438_v13 = vpop.f32.mrf.mxu3 }
0x1656   :  { %v3464_v29 = vpop.f32.mrf.mxu0 }
0x165c   :  { %v3407_v55 = vpop.f32.mrf.mxu2 }
0x165d   :  { %v3439_v47 = vadd.f32 %v3438_v13, %v3407_v55  ;;  %v3539_v0 = vpop.f32.mrf.mxu3 }
0x165f   :  { %v3465_v37 = vadd.f32 %v3464_v29, %v3439_v47 }
0x1661   :  { %v3490_v35 = vadd.f32 %v3489_v49, %v3465_v37 }
0x1664   :  { %v3516_v40 = vpop.f32.mrf.mxu2 }
0x1665   :  { %v3517_v39 = vadd.f32 %v3516_v40, %v3490_v35 }
0x1667   :  { %v5811_v18 = vadd.f32 %v3539_v0, %v3517_v39 }
0x1669   :  { %v3543_v46 = vmax.f32 %v5751_v33, %v5811_v18 }
0x16a5   :  { %v1056_v11 = vpop.xlane.xlu0 %1055 }
0x16a6   :  { %vm1057_vm8 = vcmp.eq.f32.partialorder %v1054_v54, %v1056_v11  ;;  %v1062_v26 = vcvt.f32.s32 %v1056_v11 }
0x16a7   :  { %v1058_v38 = vsel %vm1057_vm8, %v1053_v15, inf }
0x16a8   :  { %1059 = vmin.xlane.f32.xlu2 %v1058_v38  ;;  %v1063_v52 = vshll.u32 %v1062_v26, 16 }
0x16b5   :  { %v1071_v42 = vpop.xlane.xlu1 %1070 }
0x16b6   :  { %vm1072_vm9 = vcmp.eq.f32.partialorder %v1069_v10, %v1071_v42  ;;  %v1077_v10 = vcvt.f32.s32 %v1071_v42 }
0x16b7   :  { %v1073_v5 = vsel %vm1072_vm9, %v1068_v28, inf }
0x16b8   :  { %1074 = vmin.xlane.f32.xlu0 %v1073_v5  ;;  %v1078_v19 = vshll.u32 %v1077_v10, 16 }
0x171b   :  { %v1060_v24 = vpop.xlane.xlu2 %1059 }
0x171c   :  { %v1061_v20 = vcvt.f32.s32 %v1060_v24 }
0x171e   :  { %v1064_v45 = vadd.s32 %v1063_v52, %v1061_v20 }
0x1720   :  { %vm1080_vm10 = vcmp.eq.s32.totalorder %v5223_v36, %v1064_v45 }
0x1721   :  { %v4622_v59 = vsel %vm1080_vm10, 1.0, %v6016_v56  ;;  %v5818_v41 = vsel %vm1080_vm10, -1e+30, %v5756_v30  ;;  %v5821_v54 = vsel %vm1080_vm10, 1.0, %v5759_v8 }
0x1722   :  { %1087 = vst.msk [vmem:[#allocation2 + $0x1c] sm:$0x3] %vm301_vm2, %v4622_v59  ;;  %v1093_v43 = vsel %vm301_vm2, %v5818_v41, -inf }
0x1723   :  { %1094 = vmax.xlane.f32.xlu1 %v1093_v43 }
0x1729   :  { %v3545_v7 = vld [vmem:[#allocation2 + $0x1c] sm:$0x3] }
0x172a   :  { %v3548_v53 = vsel %vm281_vm1, %v3545_v7, 0 }
0x172b   :  { %v1075_v57 = vpop.xlane.xlu0 %1074  ;;  %v3568_v12 = vand.u32 4294901760, %v3548_v53 }
0x172c   :  { %v1076_v23 = vcvt.f32.s32 %v1075_v57 }
0x172d   :  { %3604 = vmatmul.f32.vlgmr.msra.gmra.mxu1 %v3568_v12  ;;  %v3569_v30 = vsub.f32 %v3548_v53, %v3568_v12 }
0x172e   :  { %v1079_v44 = vadd.s32 %v1078_v19, %v1076_v23  ;;  %3811 = vmatpush.msra.mxu1 %v5267_v6 }
0x172f   :  { %3630 = vmatmul.f32.vlgmr.msrb.gmra.mxu2 %v3569_v30  ;;  %v3570_v8 = vand.u32 4294901760, %v3569_v30 }
0x1730   :  { %vm1081_vm11 = vcmp.eq.s32.totalorder %v5223_v36, %v1079_v44  ;;  %3813 = vmatpush.msra.mxu1 %v5269_v9  ;;  %3838 = vmatpush.msrb.mxu2 %v5293_v21 }
0x1731   :  { %v4623_v31 = vsel %vm1081_vm11, 1.0, %v6016_v56  ;;  %3655 = vmatmul.f32.vlgmr.msrb.gmra.mxu3 %v3570_v8  ;;  %v5833_v13 = vsel %vm1081_vm11, -1e+30, %v5771_v34  ;;  %v3571_v55 = vsub.f32 %v3569_v30, %v3570_v8  ;;  %v5836_v47 = vsel %vm1081_vm11, 1.0, %v5774_v25 }
0x1732   :  { %1088 = vst.msk [vmem:[#allocation2 + $0x1e] sm:$0x3] %vm301_vm2, %v4623_v31  ;;  %v1096_v29 = vsel %vm301_vm2, %v5833_v13, -inf  ;;  %3863 = vmatpush.msrb.mxu3 %v5267_v6  ;;  %3842 = vmatpush.msrb.mxu2 %v5296_v22  ;;  %vm1217_vm11 = vcmask 122880  }
0x1733   :  { %1097 = vmax.xlane.f32.xlu2 %v1096_v29  ;;  %v3572_v37 = vand.u32 4294901760, %v3571_v55 }
0x1734   :  { %3865 = vmatpush.msrb.mxu3 %v5269_v9 }
0x1735   :  { %3573 = vmatmul.f32.vlgmr.msra.gmra.mxu0 %v3572_v37  ;;  %3705 = vmatmul.f32.vlgmr.msrb.gmra.mxu1 %v3568_v12 }
0x1736   :  { %3786 = vmatpush.msra.mxu0 %v5276_v16  ;;  %3925 = vmatpush.msrb.mxu1 %v5256_v2 }
0x1738   :  { %3789 = vmatpush.msra.mxu0 %v5280_v17  ;;  %3931 = vmatpush.msrb.mxu1 %v5262_v4 }
0x1739   :  { %v3546_v34 = vld [vmem:[#allocation2 + $0x1e] sm:$0x3] }
0x173a   :  { %v3710_v25 = vsel %vm281_vm1, %v3546_v34, 0 }
0x173b   :  { %v3730_v49 = vand.u32 4294901760, %v3710_v25 }
0x173d   :  { %3682 = vmatmul.f32.vlgmr.msrb.gmra.mxu0 %v3568_v12  ;;  %v3731_v35 = vsub.f32 %v3710_v25, %v3730_v49  ;;  %3766 = vmatmul.f32.vlgmr.msra.gmra.mxu3 %v3730_v49 }
0x173e   :  { %3978 = vmatpush.msra.mxu3 %v5231_v58  ;;  %3894 = vmatpush.msrb.mxu0 %v5231_v58 }
0x173f   :  { %v3732_v40 = vand.u32 4294901760, %v3731_v35 }
0x1740   :  { %3980 = vmatpush.msra.mxu3 %v5236_v61  ;;  %3896 = vmatpush.msrb.mxu0 %v5236_v61 }
0x1741   :  { %3817 = vmatmul.f32.vlgmr.msra.gmra.mxu1 %v3732_v40  ;;  %v3733_v39 = vsub.f32 %v3731_v35, %v3732_v40 }
0x1742   :  { %4030 = vmatpush.msra.mxu1 %v5231_v58 }
0x1743   :  { %v3734_v0 = vand.u32 4294901760, %v3733_v39 }
0x1744   :  { %4032 = vmatpush.msra.mxu1 %v5236_v61 }
0x1745   :  { %3735 = vmatmul.f32.vlgmr.msra.gmra.mxu2 %v3734_v0  ;;  %3792 = vmatmul.f32.vlgmr.msra.gmra.mxu0 %v3731_v35 }
0x1746   :  { %3867 = vmatmul.f32.vlgmr.msrb.gmra.mxu3 %v3730_v49  ;;  %3953 = vmatpush.msra.mxu2 %v5234_v60 }
0x1747   :  { %4005 = vmatpush.msra.mxu0 %v5240_v62  ;;  %4087 = vmatpush.msrb.mxu3 %v5303_v27 }
0x1748   :  { %3956 = vmatpush.msra.mxu2 %v5243_v63 }
0x1749   :  { %4009 = vmatpush.msra.mxu0 %v5251_v1  ;;  %4093 = vmatpush.msrb.mxu3 %v5305_v32 }
0x174d   :  { %3844 = vmatmul.f32.vlgmr.msrb.gmra.mxu2 %v3730_v49 }
0x174e   :  { %4056 = vmatpush.msrb.mxu2 %v5267_v6 }
0x1750   :  { %4058 = vmatpush.msrb.mxu2 %v5269_v9 }
0x1796   :  { %v1095_v14 = vpop.xlane.xlu1 %1094 }
0x1797   :  { %vm1099_vm12 = vcmp.ge.f32.partialorder %v5818_v41, %v1095_v14 }
0x1798   :  { %v1101_v11 = vsel %vm1099_vm12, %v5223_v36, 16 }
0x1799   :  { %v1103_v15 = vsel %vm301_vm2, %v1101_v11, 2147483647 }
0x179a   :  { %v1105_v38 = vshra.s32 %v1103_v15, 16  ;;  %v1104_v52 = vand.u32 65535, %v1103_v15 }
0x179c   :  { %v1107_v50 = vcvt.s32.f32 %v1105_v38  ;;  %v1106_v45 = vcvt.s32.f32 %v1104_v52  ;;  %v6020_v52 = vld [vmem:[#allocation25_spill] sm:$0xff] }
0x179e   :  { %1108 = vmin.xlane.f32.xlu0 %v1107_v50 }
0x17a6   :  { %v1098_v42 = vpop.xlane.xlu2 %1097 }
0x17a7   :  { %vm1100_vm13 = vcmp.ge.f32.partialorder %v5833_v13, %v1098_v42 }
0x17a8   :  { %v1102_v28 = vsel %vm1100_vm13, %v5223_v36, 16 }
0x17a9   :  { %v1118_v5 = vsel %vm301_vm2, %v1102_v28, 2147483647 }
0x17aa   :  { %v1120_v26 = vshra.s32 %v1118_v5, 16  ;;  %v1119_v43 = vand.u32 65535, %v1118_v5 }
0x17ac   :  { %v1122_v24 = vcvt.s32.f32 %v1120_v26  ;;  %v1121_v7 = vcvt.s32.f32 %v1119_v43 }
0x17ae   :  { %1123 = vmin.xlane.f32.xlu1 %v1122_v24 }
0x1811   :  { %v1109_v20 = vpop.xlane.xlu0 %1108 }
0x1812   :  { %vm1110_vm14 = vcmp.eq.f32.partialorder %v1107_v50, %v1109_v20  ;;  %v1115_v57 = vcvt.f32.s32 %v1109_v20  ;;  %v6021_v20 = vld [vmem:[#allocation26_spill] sm:$0xff] }
0x1813   :  { %v1111_v59 = vsel %vm1110_vm14, %v1106_v45, inf  ;;  %v299_v45 = vsel %vm298_vm7, %v6021_v20, %v6020_v52 }
0x1814   :  { %1112 = vmin.xlane.f32.xlu2 %v1111_v59  ;;  %v1116_v19 = vshll.u32 %v1115_v57, 16  ;;  %v302_v59 = vsel %vm301_vm2, %v299_v45, -inf }
0x1821   :  { %v1124_v10 = vpop.xlane.xlu1 %1123 }
0x1822   :  { %vm1125_vm15 = vcmp.eq.f32.partialorder %v1122_v24, %v1124_v10  ;;  %v1130_v29 = vcvt.f32.s32 %v1124_v10 }
0x1823   :  { %v1126_v53 = vsel %vm1125_vm15, %v1121_v7, inf }
0x1824   :  { %1127 = vmin.xlane.f32.xlu0 %v1126_v53  ;;  %v1131_v35 = vshll.u32 %v1130_v29, 16 }
0x1887   :  { %v1113_v12 = vpop.xlane.xlu2 %1112 }
0x1888   :  { %v1114_v23 = vcvt.f32.s32 %v1113_v12 }
0x188a   :  { %v1117_v30 = vadd.s32 %v1116_v19, %v1114_v23 }
0x188c   :  { %vm1133_vm3 = vcmp.eq.s32.totalorder %v5223_v36, %v1117_v30 }
0x188d   :  { %v5871_v44 = vsel %vm1133_vm3, -1e+30, %v5818_v41  ;;  %v4624_v8 = vsel %vm1133_vm3, 1.0, %v6016_v56  ;;  %v5875_v31 = vsel %vm1133_vm3, 1.0, %v5821_v54 }
0x188e   :  { %v1146_v55 = vsel %vm301_vm2, %v5871_v44, -inf  ;;  %1140 = vst.msk [vmem:[#allocation2 + $0x20] sm:$0x3] %vm301_vm2, %v4624_v8 }
0x188f   :  { %1147 = vmax.xlane.f32.xlu1 %v1146_v55 }
0x1895   :  { %v3874_v37 = vld [vmem:[#allocation2 + $0x20] sm:$0x3] }
0x1896   :  { %v3877_v34 = vsel %vm281_vm1, %v3874_v37, 0 }
0x1897   :  { %v1128_v25 = vpop.xlane.xlu0 %1127  ;;  %v3897_v49 = vand.u32 4294901760, %v3877_v34 }
0x1898   :  { %v1129_v41 = vcvt.f32.s32 %v1128_v25 }
0x1899   :  { %3933 = vmatmul.f32.vlgmr.msrb.gmra.mxu1 %v3897_v49  ;;  %v3898_v40 = vsub.f32 %v3877_v34, %v3897_v49 }
0x189a   :  { %v1132_v39 = vadd.s32 %v1131_v35, %v1129_v41  ;;  %4140 = vmatpush.msrb.mxu1 %v5267_v6 }
0x189b   :  { %3959 = vmatmul.f32.vlgmr.msra.gmra.mxu2 %v3898_v40  ;;  %v3899_v54 = vand.u32 4294901760, %v3898_v40 }
0x189c   :  { %vm1134_vm4 = vcmp.eq.s32.totalorder %v5223_v36, %v1132_v39  ;;  %4142 = vmatpush.msrb.mxu1 %v5269_v9  ;;  %4167 = vmatpush.msra.mxu2 %v5293_v21 }
0x189d   :  { %3984 = vmatmul.f32.vlgmr.msra.gmra.mxu3 %v3899_v54  ;;  %v1145_v0 = vsel %vm1134_vm4, -1e+30, %v5833_v13  ;;  %v4625_v14 = vsel %vm1134_vm4, 1.0, %v6016_v56  ;;  %v3900_v11 = vsub.f32 %v3898_v40, %v3899_v54  ;;  %v5888_v15 = vsel %vm1134_vm4, 1.0, %v5836_v47 }
0x189e   :  { %v1149_v38 = vsel %vm301_vm2, %v1145_v0, -inf  ;;  %1141 = vst.msk [vmem:[#allocation2 + $0x22] sm:$0x3] %vm301_vm2, %v4625_v14  ;;  %4192 = vmatpush.msra.mxu3 %v5267_v6  ;;  %4171 = vmatpush.msra.mxu2 %v5296_v22 }
0x189f   :  { %1150 = vmax.xlane.f32.xlu2 %v1149_v38  ;;  %v3901_v50 = vand.u32 4294901760, %v3900_v11 }
0x18a0   :  { %4194 = vmatpush.msra.mxu3 %v5269_v9 }
0x18a1   :  { %3902 = vmatmul.f32.vlgmr.msrb.gmra.mxu0 %v3901_v50  ;;  %4034 = vmatmul.f32.vlgmr.msra.gmra.mxu1 %v3897_v49 }
0x18a2   :  { %4115 = vmatpush.msrb.mxu0 %v5276_v16  ;;  %4254 = vmatpush.msra.mxu1 %v5256_v2 }
0x18a4   :  { %4118 = vmatpush.msrb.mxu0 %v5280_v17  ;;  %4260 = vmatpush.msra.mxu1 %v5262_v4 }
0x18a5   :  { %v3875_v13 = vld [vmem:[#allocation2 + $0x22] sm:$0x3] }
0x18a6   :  { %v4039_v47 = vsel %vm281_vm1, %v3875_v13, 0 }
0x18a7   :  { %v4059_v42 = vand.u32 4294901760, %v4039_v47 }
0x18a9   :  { %4011 = vmatmul.f32.vlgmr.msra.gmra.mxu0 %v3897_v49  ;;  %v4060_v28 = vsub.f32 %v4039_v47, %v4059_v42  ;;  %4095 = vmatmul.f32.vlgmr.msrb.gmra.mxu3 %v4059_v42 }
0x18aa   :  { %4307 = vmatpush.msrb.mxu3 %v5231_v58  ;;  %4223 = vmatpush.msra.mxu0 %v5231_v58 }
0x18ab   :  { %v4061_v5 = vand.u32 4294901760, %v4060_v28 }
0x18ac   :  { %4309 = vmatpush.msrb.mxu3 %v5236_v61  ;;  %4225 = vmatpush.msra.mxu0 %v5236_v61 }
0x18ad   :  { %4146 = vmatmul.f32.vlgmr.msrb.gmra.mxu1 %v4061_v5  ;;  %v4062_v2 = vsub.f32 %v4060_v28, %v4061_v5 }
0x18ae   :  { %4359 = vmatpush.msrb.mxu1 %v5231_v58 }
0x18af   :  { %v4063_v4 = vand.u32 4294901760, %v4062_v2 }
0x18b0   :  { %4361 = vmatpush.msrb.mxu1 %v5236_v61 }
0x18b1   :  { %4064 = vmatmul.f32.vlgmr.msrb.gmra.mxu2 %v4063_v4  ;;  %4121 = vmatmul.f32.vlgmr.msrb.gmra.mxu0 %v4060_v28 }
0x18b2   :  { %4196 = vmatmul.f32.vlgmr.msra.gmra.mxu3 %v4059_v42  ;;  %4282 = vmatpush.msrb.mxu2 %v5234_v60 }
0x18b3   :  { %4334 = vmatpush.msrb.mxu0 %v5240_v62  ;;  %4416 = vmatpush.msra.mxu3 %v5303_v27 }
0x18b4   :  { %4285 = vmatpush.msrb.mxu2 %v5243_v63 }
0x18b5   :  { %4338 = vmatpush.msrb.mxu0 %v5251_v1  ;;  %4422 = vmatpush.msra.mxu3 %v5305_v32 }
0x18b9   :  { %4173 = vmatmul.f32.vlgmr.msra.gmra.mxu2 %v4059_v42 }
0x18ba   :  { %4385 = vmatpush.msra.mxu2 %v5267_v6 }
0x18bc   :  { %4387 = vmatpush.msra.mxu2 %v5269_v9 }
0x1902   :  { %v1148_v58 = vpop.xlane.xlu1 %1147 }
0x1903   :  { %vm1152_vm5 = vcmp.ge.f32.partialorder %v5871_v44, %v1148_v58 }
0x1904   :  { %v1154_v60 = vsel %vm1152_vm5, %v5223_v36, 16 }
0x1905   :  { %v1156_v61 = vsel %vm301_vm2, %v1154_v60, 2147483647 }
0x1906   :  { %v1158_v62 = vshra.s32 %v1156_v61, 16  ;;  %v1157_v43 = vand.u32 65535, %v1156_v61 }
0x1908   :  { %v1160_v27 = vcvt.s32.f32 %v1158_v62  ;;  %v1159_v7 = vcvt.s32.f32 %v1157_v43 }
0x190a   :  { %1161 = vmin.xlane.f32.xlu0 %v1160_v27 }
0x1912   :  { %v1151_v63 = vpop.xlane.xlu2 %1150 }
0x1913   :  { %vm1153_vm6 = vcmp.ge.f32.partialorder %v1145_v0, %v1151_v63 }
0x1914   :  { %v1155_v1 = vsel %vm1153_vm6, %v5223_v36, 16 }
0x1915   :  { %v1171_v32 = vsel %vm301_vm2, %v1155_v1, 2147483647 }
0x1916   :  { %v1173_v26 = vshra.s32 %v1171_v32, 16  ;;  %v1172_v57 = vand.u32 65535, %v1171_v32 }
0x1918   :  { %v1175_v24 = vcvt.s32.f32 %v1173_v26  ;;  %v1174_v19 = vcvt.s32.f32 %v1172_v57 }
0x191a   :  { %1176 = vmin.xlane.f32.xlu1 %v1175_v24 }
0x1922   :  { %303 = vmax.xlane.f32.xlu1 %v302_v59 }
0x197d   :  { %v1162_v10 = vpop.xlane.xlu0 %1161 }
0x197e   :  { %vm1163_vm8 = vcmp.eq.f32.partialorder %v1160_v27, %v1162_v10  ;;  %v1168_v40 = vcvt.f32.s32 %v1162_v10 }
0x197f   :  { %v1164_v53 = vsel %vm1163_vm8, %v1159_v7, inf }
0x1980   :  { %1165 = vmin.xlane.f32.xlu2 %v1164_v53  ;;  %v1169_v54 = vshll.u32 %v1168_v40, 16 }
0x198d   :  { %v1177_v12 = vpop.xlane.xlu1 %1176 }
0x198e   :  { %vm1178_vm9 = vcmp.eq.f32.partialorder %v1175_v24, %v1177_v12  ;;  %v1183_v13 = vcvt.f32.s32 %v1177_v12 }
0x198f   :  { %v1179_v23 = vsel %vm1178_vm9, %v1174_v19, inf }
0x1990   :  { %1180 = vmin.xlane.f32.xlu0 %v1179_v23  ;;  %v1184_v2 = vshll.u32 %v1183_v13, 16  ;;  %v3574_v23 = vpop.f32.mrf.mxu0 }
0x1995   :  { %v5923_v30 = vpop.xlane.xlu1 %303 }
0x1996   :  { %v306_v44 = vrot.slane %v5923_v30, 1  ;;  %v309_v8 = vsub.f32 %v6020_v52, %v5923_v30 }
0x1998   :  { %v310_v55 = vsub.f32 %v6021_v20, %v306_v44  ;;  %v311_v29 = vmul.f32 1.442695, %v309_v8  ;;  %v3605_v44 = vpop.f32.mrf.mxu1  ;;  %v3631_v8 = vpop.f32.mrf.mxu2 }
0x1999   :  { %v3606_v13 = vadd.f32 %v3605_v44, %v3574_v23 }
0x199a   :  { %v313_v37 = vmul.f32 1.442695, %v310_v55  ;;  %v3683_v55 = vpop.f32.mrf.mxu0 }
0x199c   :  { %4763 = vpow2.f32 %v313_v37 }
0x199d   :  { %4765 = vpow2.f32 %v311_v29 }
0x19a0   :  { %v3706_v29 = vpop.f32.mrf.mxu1  ;;  %v3736_v37 = vpop.f32.mrf.mxu2 }
0x19a2   :  { %v4764_v34 = vpop.eup %4763 }
0x19a3   :  { %v317_v25 = vrot.slane %v4764_v34, 7  ;;  %v4766_v49 = vpop.eup %4765  ;;  %v3793_v34 = vpop.f32.mrf.mxu0 }
0x19a5   :  { %v318_v35 = vsel %vm298_vm7, %v317_v25, %v4766_v49 }
0x19a6   :  { %v320_v41 = vsel %vm301_vm2, %v318_v35, 0.0 }
0x19a7   :  { %321 = vadd.xlane.f32.xlu2 %v320_v41 }
0x19a8   :  { %v3818_v25 = vpop.f32.mrf.mxu1 }
0x19ab   :  { %v3903_v35 = vpop.f32.mrf.mxu0 }
0x19b0   :  { %v3934_v41 = vpop.f32.mrf.mxu1 }
0x19f3   :  { %v1166_v39 = vpop.xlane.xlu2 %1165 }
0x19f4   :  { %v1167_v0 = vcvt.f32.s32 %v1166_v39 }
0x19f6   :  { %v1170_v14 = vadd.s32 %v1169_v54, %v1167_v0  ;;  %v4012_v54 = vpop.f32.mrf.mxu0  ;;  %v4035_v0 = vpop.f32.mrf.mxu1 }
0x19f8   :  { %vm1186_vm10 = vcmp.eq.s32.totalorder %v5223_v36, %v1170_v14 }
0x19f9   :  { %v4626_v11 = vsel %vm1186_vm10, 1.0, %v6016_v56  ;;  %v1195_v38 = vsel %vm1186_vm10, 1.0, %v5875_v31 }
0x19fa   :  { %1193 = vst.msk [vmem:[#allocation2 + $0x24] sm:$0x3] %vm301_vm2, %v4626_v11  ;;  %v1215_v50 = vpack.c.bf16 %v1195_v38, %v1195_v38  ;;  %v1220_v11 = vld [vmem:[#allocation12] sm:$0xff] }
0x19fc   :  { %1218 = vst.msk [vmem:[#allocation18] sm:$0x1] %vm1217_vm11, %v1215_v50  ;;  %v1223_v50 = vsel %vm168_vm0, %v1220_v11, -inf }
0x1a01   :  { %v4203_v47 = vld [vmem:[#allocation2 + $0x24] sm:$0x3] }
0x1a02   :  { %v4206_v42 = vsel %vm281_vm1, %v4203_v47, 0  ;;  %v1224_v47 = vrot.slane %v1223_v50, 4 }
0x1a03   :  { %v1181_v28 = vpop.xlane.xlu0 %1180  ;;  %v4226_v5 = vand.u32 4294901760, %v4206_v42 }
0x1a04   :  { %v1182_v4 = vcvt.f32.s32 %v1181_v28  ;;  %v4122_v28 = vpop.f32.mrf.mxu0 }
0x1a05   :  { %4262 = vmatmul.f32.vlgmr.msra.gmra.mxu1 %v4226_v5  ;;  %v4227_v58 = vsub.f32 %v4206_v42, %v4226_v5  ;;  %v4147_v42 = vpop.f32.mrf.mxu1 }
0x1a06   :  { %v1185_v60 = vadd.s32 %v1184_v2, %v1182_v4  ;;  %4469 = vmatpush.msra.mxu1 %v5267_v6  ;;  %v3632_v4 = vadd.f32 %v3631_v8, %v3606_v13 }
0x1a07   :  { %4288 = vmatmul.f32.vlgmr.msrb.gmra.mxu2 %v4227_v58  ;;  %v4228_v31 = vand.u32 4294901760, %v4227_v58 }
0x1a08   :  { %vm1187_vm12 = vcmp.eq.s32.totalorder %v5223_v36, %v1185_v60  ;;  %4471 = vmatpush.msra.mxu1 %v5269_v9  ;;  %4496 = vmatpush.msrb.mxu2 %v5293_v21 }
0x1a09   :  { %v4627_v61 = vsel %vm1187_vm12, 1.0, %v6016_v56  ;;  %4313 = vmatmul.f32.vlgmr.msrb.gmra.mxu3 %v4228_v31  ;;  %v4229_v62 = vsub.f32 %v4227_v58, %v4228_v31  ;;  %v1196_v27 = vsel %vm1187_vm12, 1.0, %v5888_v15  ;;  %v1225_v58 = vmax.f32 %v1223_v50, %v1224_v47 }
0x1a0a   :  { %1194 = vst.msk [vmem:[#allocation2 + $0x26] sm:$0x3] %vm301_vm2, %v4627_v61  ;;  %4521 = vmatpush.msrb.mxu3 %v5267_v6  ;;  %4500 = vmatpush.msrb.mxu2 %v5296_v22  ;;  %v1216_v63 = vpack.c.bf16 %v1196_v27, %v1196_v27 }
0x1a0b   :  { %v4230_v1 = vand.u32 4294901760, %v4229_v62  ;;  %v1226_v62 = vrot.slane %v1225_v58, 2 }
0x1a0c   :  { %4523 = vmatpush.msrb.mxu3 %v5269_v9  ;;  %1219 = vst.msk [vmem:[#allocation18 + $0x1] sm:$0x1] %vm1217_vm11, %v1216_v63 }
0x1a0d   :  { %4231 = vmatmul.f32.vlgmr.msra.gmra.mxu0 %v4230_v1  ;;  %4363 = vmatmul.f32.vlgmr.msrb.gmra.mxu1 %v4226_v5 }
0x1a0e   :  { %4444 = vmatpush.msra.mxu0 %v5276_v16 }
0x1a10   :  { %4447 = vmatpush.msra.mxu0 %v5280_v17 }
0x1a11   :  { %v4204_v21 = vld [vmem:[#allocation2 + $0x26] sm:$0x3] }
0x1a12   :  { %v4368_v56 = vsel %vm281_vm1, %v4204_v21, 0  ;;  %vm4541_vm1 = vcmask 254976  }
0x1a13   :  { %v4388_v15 = vand.u32 4294901760, %v4368_v56 }
0x1a15   :  { %4340 = vmatmul.f32.vlgmr.msrb.gmra.mxu0 %v4226_v5  ;;  %v4389_v6 = vsub.f32 %v4368_v56, %v4388_v15  ;;  %4424 = vmatmul.f32.vlgmr.msra.gmra.mxu3 %v4388_v15  ;;  %v3935_v5 = vadd.f32 %v3934_v41, %v3903_v35 }
0x1a17   :  { %v4390_v22 = vand.u32 4294901760, %v4389_v6 }
0x1a19   :  { %4475 = vmatmul.f32.vlgmr.msra.gmra.mxu1 %v4390_v22  ;;  %v4391_v32 = vsub.f32 %v4389_v6, %v4390_v22 }
0x1a1a   :  { %v322_v26 = vpop.xlane.xlu2 %321 }
0x1a1b   :  { %4767 = vlog2.f32 %v322_v26  ;;  %v4392_v9 = vand.u32 4294901760, %v4391_v32  ;;  %v1227_v32 = vmax.f32 %v1225_v58, %v1226_v62 }
0x1a1d   :  { %4393 = vmatmul.f32.vlgmr.msra.gmra.mxu2 %v4392_v9  ;;  %4450 = vmatmul.f32.vlgmr.msra.gmra.mxu0 %v4389_v6 }
0x1a1e   :  { %4525 = vmatmul.f32.vlgmr.msrb.gmra.mxu3 %v4388_v15 }
0x1a21   :  { %v4768_v24 = vpop.eup %4767 }
0x1a22   :  { %v324_v16 = vmul.f32 0.6931472, %v4768_v24 }
0x1a24   :  { %v325_v17 = vadd.f32 %v324_v16, %v5923_v30  ;;  %v3656_v30 = vpop.f32.mrf.mxu3 }
0x1a25   :  { %4502 = vmatmul.f32.vlgmr.msrb.gmra.mxu2 %v4388_v15  ;;  %v3657_v61 = vadd.f32 %v3656_v30, %v3632_v4 }
0x1a26   :  { %v327_v45 = vrot.slane %v325_v17, 1  ;;  %v330_v59 = vsub.f32 %v6020_v52, %v325_v17  ;;  %v1228_v17 = vrot.slane %v1227_v32, 1 }
0x1a27   :  { %v3684_v1 = vadd.f32 %v3683_v55, %v3657_v61 }
0x1a28   :  { %v1197_v43 = vperm.slane %v330_v59, 0  ;;  %v331_v10 = vsub.f32 %v6021_v20, %v327_v45  ;;  %v5956_v20 = vpop.f32.mrf.mxu2  ;;  %v1221_v45 = vld [vmem:[#allocation12 + $0x8] sm:$0xff] }
0x1a29   :  { %v3707_v26 = vadd.f32 %v3706_v29, %v3684_v1 }
0x1a2a   :  { %v1199_v7 = vmul.f32 %v1197_v43, %v1195_v38  ;;  %v1198_v53 = vperm.slane %v331_v10, 0 }
0x1a2b   :  { %v3871_v43 = vmax.f32 %v3542_v48, %v3707_v26 }
0x1a2c   :  { %v1201_v57 = vsel %vm301_vm2, %v1199_v7, 0.0  ;;  %v1200_v12 = vmul.f32 %v1198_v53, %v1196_v27  ;;  %v3767_v52 = vpop.f32.mrf.mxu3  ;;  %v1230_v53 = vsel %vm168_vm0, %v1221_v45, -inf  ;;  %vm1213_vm0 = vcmask 9216  }
0x1a2d   :  { %1202 = vadd.xlane.f32.xlu0 %v1201_v57  ;;  %v3768_v23 = vadd.f32 %v3767_v52, %v3736_v37  ;;  %v1231_v8 = vrot.slane %v1230_v53, 4 }
0x1a2e   :  { %v1204_v19 = vsel %vm301_vm2, %v1200_v12, 0.0  ;;  %v1229_v12 = vmax.f32 %v1227_v32, %v1228_v17 }
0x1a2f   :  { %1205 = vadd.xlane.f32.xlu1 %v1204_v19  ;;  %v3794_v29 = vadd.f32 %v3793_v34, %v3768_v23  ;;  %v1232_v41 = vmax.f32 %v1230_v53, %v1231_v8 }
0x1a30   :  { %v3960_v40 = vpop.f32.mrf.mxu2 }
0x1a31   :  { %v3961_v60 = vadd.f32 %v3960_v40, %v3935_v5  ;;  %v1233_v3 = vrot.slane %v1232_v41, 2 }
0x1a33   :  { %v1234_v47 = vmax.f32 %v1232_v41, %v1233_v3 }
0x1a34   :  { %v5958_v49 = vpop.f32.mrf.mxu3 }
0x1a35   :  { %v1235_v58 = vrot.slane %v1234_v47, 1 }
0x1a38   :  { %v4065_v14 = vpop.f32.mrf.mxu2 }
0x1a3c   :  { %v3985_v39 = vpop.f32.mrf.mxu3 }
0x1a3d   :  { %v3986_v21 = vadd.f32 %v3985_v39, %v3961_v60 }
0x1a3f   :  { %v4013_v6 = vadd.f32 %v4012_v54, %v3986_v21  ;;  %v3819_v54 = vadd.f32 %v3818_v25, %v3794_v29 }
0x1a40   :  { %v4174_v2 = vpop.f32.mrf.mxu2 }
0x1a41   :  { %v4036_v24 = vadd.f32 %v4035_v0, %v4013_v6  ;;  %v3846_v37 = vadd.f32 %v5956_v20, %v3819_v54 }
0x1a43   :  { %v4200_v57 = vmax.f32 %v3871_v43, %v4036_v24 }
0x1a44   :  { %v4096_v38 = vpop.f32.mrf.mxu3 }
0x1a45   :  { %v4097_v30 = vadd.f32 %v4096_v38, %v4065_v14 }
0x1a47   :  { %v4123_v40 = vadd.f32 %v4122_v28, %v4097_v30 }
0x1a49   :  { %v4148_v48 = vadd.f32 %v4147_v42, %v4123_v40  ;;  %v3869_v42 = vadd.f32 %v5958_v49, %v3846_v37 }
0x1a4b   :  { %v4175_v34 = vadd.f32 %v4174_v2, %v4148_v48  ;;  %v3872_v49 = vmax.f32 %v3543_v46, %v3869_v42 }
0x1a4c   :  { %v5961_v31 = vpop.f32.mrf.mxu3 }
0x1a4d   :  { %v4198_v4 = vadd.f32 %v5961_v31, %v4175_v34 }
0x1a82   :  { %v4263_v27 = vpop.f32.mrf.mxu1 }
0x1a8a   :  { %v4232_v63 = vpop.f32.mrf.mxu0  ;;  %v4289_v15 = vpop.f32.mrf.mxu2 }
0x1a8b   :  { %v4264_v56 = vadd.f32 %v4263_v27, %v4232_v63  ;;  %v4364_v7 = vpop.f32.mrf.mxu1  ;;  %v4201_v27 = vmax.f32 %v3872_v49, %v4198_v4  ;;  %v1236_v63 = vmax.f32 %v1234_v47, %v1235_v58 }
0x1a8c   :  { %v4314_v9 = vpop.f32.mrf.mxu3 }
0x1a8d   :  { %v4290_v22 = vadd.f32 %v4289_v15, %v4264_v56 }
0x1a8f   :  { %v4315_v16 = vadd.f32 %v4314_v9, %v4290_v22 }
0x1a92   :  { %v4341_v59 = vpop.f32.mrf.mxu0 }
0x1a93   :  { %v4342_v10 = vadd.f32 %v4341_v59, %v4315_v16 }
0x1a95   :  { %v4365_v19 = vadd.f32 %v4364_v7, %v4342_v10 }
0x1a96   :  { %v4476_v2 = vpop.f32.mrf.mxu1 }
0x1a97   :  { %v4529_v44 = vmax.f32 %v4200_v57, %v4365_v19 }
0x1a98   :  { %v4425_v51 = vpop.f32.mrf.mxu3 }
0x1a99   :  { %v4531_v55 = vadd.f32 %v4529_v44, %v1229_v12 }
0x1a9a   :  { %v4451_v25 = vpop.f32.mrf.mxu0 }
0x1a9b   :  { %v4533_v35 = vmax.f32 %v4531_v55, 0.0 }
0x1a9d   :  { %v4535_v39 = vadd.f32 1.0, %v4533_v35 }
0x1a9f   :  { %4769 = vlog2.f32 %v4535_v39 }
0x1aa0   :  { %v4394_v0 = vpop.f32.mrf.mxu2  ;;  %v1203_v11 = vpop.xlane.xlu0 %1202 }
0x1aa1   :  { %v4426_v52 = vadd.f32 %v4425_v51, %v4394_v0  ;;  %v1209_v50 = vperm.slane %v1203_v11, %v5223_v36  ;;  %v4526_v62 = vpop.f32.mrf.mxu3 }
0x1aa2   :  { %v1206_v14 = vpop.xlane.xlu1 %1205 }
0x1aa3   :  { %v4452_v38 = vadd.f32 %v4451_v25, %v4426_v52  ;;  %v1210_v13 = vperm.slane %v1206_v14, %v5223_v36 }
0x1aa5   :  { %v4770_v20 = vpop.eup %4769  ;;  %v1211_v28 = vsel %vm298_vm7, %v1210_v13, %v1209_v50  ;;  %v4477_v60 = vadd.f32 %v4476_v2, %v4452_v38 }
0x1aa6   :  { %v4538_v5 = vmul.f32 0.6931472, %v4770_v20  ;;  %1214 = vst.msk [vmem:[#allocation16] sm:$0x3] %vm1213_vm0, %v1211_v28 }
0x1aa7   :  { %4567 = dma.vmem_to_hbm [thread:$0]  %s4563_s12, 32, %s4565_s15, [#allocation17]  }
0x1aa8   :  { %v4503_v36 = vpop.f32.mrf.mxu2  ;;  %4542 = vst.msk [vmem:[#allocation15] sm:$0x3] %vm4541_vm1, %v4538_v5  ;;  %4580 = dma.vmem_to_hbm [thread:$0]  %s4573_s7, 32, %s4575_s19, [#allocation17], %s5037_s10, %s5037_s10, %s5038_s11  }
0x1aa9   :  { %v4504_v61 = vadd.f32 %v4503_v36, %v4477_v60 }
0x1aab   :  { %v4527_v1 = vadd.f32 %v4526_v62, %v4504_v61 }
0x1aad   :  { %v4530_v21 = vmax.f32 %v4201_v27, %v4527_v1 }
0x1aaf   :  { %v4532_v31 = vadd.f32 %v4530_v21, %v1236_v63 }
0x1ab1   :  { %v4534_v56 = vmax.f32 %v4532_v31, 0.0 }
0x1ab3   :  { %v4536_v15 = vadd.f32 1.0, %v4534_v56 }
0x1ab5   :  { %4771 = vlog2.f32 %v4536_v15 }
0x1abb   :  { %v4772_v6 = vpop.eup %4771 }
0x1abc   :  { %v4540_v33 = vmul.f32 0.6931472, %v4772_v6 }
0x1abe   :  { %4543 = vst.msk [vmem:[#allocation15 + $0x2] sm:$0x3] %vm4541_vm1, %v4540_v33 }
0x1abf   :  { %4556 = dma.vmem_to_hbm [thread:$0]  %s4549_s20, 64, %s4551_s23, [#allocation5], %s5040_s24, %s5040_s24, %s5041_s2  }
0x1ac0   :  { %5021 = dma.done.wait [#allocation5], 64  }
0x1ac1   :  { %5022 = vsyncadd [#allocation5], 4294967232 }
0x1ac2   :  { %5023 = dma.done.wait [#allocation17], 64  }
0x1ac3   :  { %5024 = vsyncadd [#allocation17], 4294967232 }
0x1ac4   :  { %4593 = vsyncpa [#allocation4], 1 }
0x1ac5   :  { %4594 = vsyncpa [#allocation7], 1 }
0x1ac6   :  { %4595 = vsyncpa [#allocation10], 1 }
0x1ac7   :  { %4596 = vsyncpa [#allocation13], 1 }
0x1ac8   :  { %4597 = vsyncpa [#allocation5], 1 }
0x1ac9   :  { %4598 = vsyncpa [#allocation17], 1 }

</bundles_post_ra>
